<compile_context>
chip_gen: v7x
topology: tpu7x:2x2x1
jax: 0.10.0
libtpu: 0.0.40
codegen_flags: <defaults>
</compile_context>

<pallas_src>
import functools

import jax
import jax.numpy as jnp
from jax.experimental import pallas as pl
from jax.experimental.pallas import tpu as pltpu


# ----------------------------------------------------------------------------
# Tile pickers.
# ----------------------------------------------------------------------------
def _pick_tm(M, target=1024):
    """Largest divisor of M that is <= target and a multiple of 16
    (or M itself when M is small / has no such divisor)."""
    if M <= target:
        return M
    for d in range(target, 0, -1):
        if d % 16 == 0 and M % d == 0:
            return d
    return M


def _pick_tk(K, target=8192):
    """Largest divisor of K that is <= target and a multiple of 128
    (falls back to K itself)."""
    if K <= target:
        return K
    for d in range(target - target % 128, 0, -128):
        if K % d == 0:
            return d
    return K


# ----------------------------------------------------------------------------
# Conv-as-matmul kernel: single K step, M-tiled, fused bias + ReLU.
# No accumulator scratch needed (single-K-step special case).
# ----------------------------------------------------------------------------
def _matmul_bias_relu_kernel(a_ref, w_ref, b_ref, o_ref, *, relu):
    out = jnp.dot(a_ref[...], w_ref[...], preferred_element_type=jnp.float32)
    out = out + b_ref[...]
    if relu:
        out = jnp.maximum(out, 0.0)
    o_ref[...] = out.astype(o_ref.dtype)


def matmul_bias_relu(a, w, b, *, relu=True, tm=None):
    """relu_opt(a @ w + b); a:[M,K] f32, w:[K,N] f32, b:[N] f32 -> [M,N] f32."""
    M, K = a.shape
    K2, N = w.shape
    assert K == K2, (K, K2)
    if tm is None:
        tm = _pick_tm(M)
    assert M % tm == 0, (M, tm)
    mt = M // tm

    kernel = functools.partial(_matmul_bias_relu_kernel, relu=relu)
    return pl.pallas_call(
        kernel,
        out_shape=jax.ShapeDtypeStruct((M, N), jnp.float32),
        grid_spec=pltpu.PrefetchScalarGridSpec(
            num_scalar_prefetch=0,
            grid=(mt,),
            in_specs=[
                pl.BlockSpec((tm, K), lambda m: (m, 0)),   # patches (row tile)
                pl.BlockSpec((K, N), lambda m: (0, 0)),    # conv weight (resident)
                pl.BlockSpec((1, N), lambda m: (0, 0)),    # bias
            ],
            out_specs=pl.BlockSpec((tm, N), lambda m: (m, 0)),
        ),
        compiler_params=pltpu.CompilerParams(
            dimension_semantics=("parallel",)
        ),
    )(a, w, b.reshape(1, N))
    # TODO(synk): conv output last dim (32/64) < 128 -> masked vst; making it
    # lane-dense needs an in-kernel sublane->lane repack or channel padding.


# ----------------------------------------------------------------------------
# Fused fc1 + fc2 head: K-tiled fc1 with f32 accumulator; on the last K step
# apply bias + ReLU and the resident (128x10) fc2 matmul + bias.
# A and W1 stream in bf16; accumulation is f32.
# ----------------------------------------------------------------------------
def _fc_head_kernel(a_ref, w1_ref, b1_ref, w2_ref, b2_ref, o_ref, acc_ref):
    k = pl.program_id(1)

    @pl.when(k == 0)
    def _():
        acc_ref[...] = jnp.zeros_like(acc_ref)

    acc_ref[...] += jnp.dot(
        a_ref[...], w1_ref[...], preferred_element_type=jnp.float32
    )

    @pl.when(k == pl.num_programs(1) - 1)
    def _():
        h = jnp.maximum(acc_ref[...] + b1_ref[...], 0.0)              # fc1 + ReLU
        out = jnp.dot(h, w2_ref[...], preferred_element_type=jnp.float32)
        o_ref[...] = (out + b2_ref[...]).astype(o_ref.dtype)          # fc2


def fc_head(a, w1, b1, w2, b2, *, tk=None, tm=None):
    """fc2(relu(fc1(a))) in one kernel. a:[M,K] bf16, w1:[K,Nh] bf16,
    b1:[Nh] f32, w2:[Nh,No] f32, b2:[No] f32 -> [M,No] f32."""
    M, K = a.shape
    K1, Nh = w1.shape
    Nh2, No = w2.shape
    assert K == K1 and Nh == Nh2, (K, K1, Nh, Nh2)
    if tk is None:
        tk = _pick_tk(K)
    assert K % tk == 0, (K, tk)
    kt = K // tk
    if tm is None:
        tm = _pick_tm(M)
    assert M % tm == 0, (M, tm)
    mt = M // tm

    return pl.pallas_call(
        _fc_head_kernel,
        out_shape=jax.ShapeDtypeStruct((M, No), jnp.float32),
        grid_spec=pltpu.PrefetchScalarGridSpec(
            num_scalar_prefetch=0,
            grid=(mt, kt),
            in_specs=[
                pl.BlockSpec((tm, tk), lambda m, k: (m, k)),   # A (bf16)
                pl.BlockSpec((tk, Nh), lambda m, k: (k, 0)),   # W1 (bf16 stream)
                pl.BlockSpec((1, Nh), lambda m, k: (0, 0)),    # b1
                pl.BlockSpec((Nh, No), lambda m, k: (0, 0)),   # W2 (resident)
                pl.BlockSpec((1, No), lambda m, k: (0, 0)),    # b2
            ],
            out_specs=pl.BlockSpec((tm, No), lambda m, k: (m, 0)),
            scratch_shapes=[pltpu.VMEM((tm, Nh), jnp.float32)],
        ),
        compiler_params=pltpu.CompilerParams(
            dimension_semantics=("parallel", "arbitrary")
        ),
    )(a, w1, b1.reshape(1, Nh), w2, b2.reshape(1, No))


# ----------------------------------------------------------------------------
# im2col glue (pure data movement / reshape, kept in plain JAX)
# ----------------------------------------------------------------------------
def im2col_3x3_pad1(x_nhwc):
    """[N,H,W,C] -> [N*H*W, 9*C] patches for a 3x3 conv, padding=1.
    Column order is (kh, kw, c), matching the conv weight layout."""
    N, H, W, C = x_nhwc.shape
    xp = jnp.pad(x_nhwc, ((0, 0), (1, 1), (1, 1), (0, 0)))
    cols = []
    for kh in range(3):
        for kw in range(3):
            cols.append(xp[:, kh:kh + H, kw:kw + W, :])
    patches = jnp.concatenate(cols, axis=-1)  # [N, H, W, 9*C]
    return patches.reshape(N * H * W, 9 * C)


# ----------------------------------------------------------------------------
# Forward pass
# ----------------------------------------------------------------------------
def simple_cnn_forward(x_nchw, params):
    N, C, H, W = x_nchw.shape
    assert C == 1 and H == 28 and W == 28, "fc1 hardcodes 64*28*28 inputs"

    x = jnp.transpose(x_nchw, (0, 2, 3, 1))  # NCHW -> NHWC

    # conv1 + relu
    p1 = im2col_3x3_pad1(x)                                    # [N*784, 9]
    h1 = matmul_bias_relu(p1, params["w1"], params["b1"])      # [N*784, 32]
    h1 = h1.reshape(N, H, W, 32)

    # conv2 + relu
    # TODO(synk): fuse the im2col (9 shifted views) into the conv2 kernel to
    # avoid materializing the 9x patch matrix in HBM at large batch.
    p2 = im2col_3x3_pad1(h1)                                   # [N*784, 288]
    h2 = matmul_bias_relu(p2, params["w2"], params["b2"])      # [N*784, 64]

    # Flatten. Torch flattens in (c,h,w) order; wf1's rows were permuted once
    # at init to (h,w,c) order, so the natural contiguous reshape is exact and
    # no runtime transpose is needed.  Cast activations to bf16 for fc1.
    flat = h2.reshape(N, H * W * 64).astype(jnp.bfloat16)      # [N, 50176]

    # fc1 + relu + fc2, fused (K = 50176 split into multiple-of-128 chunks)
    out = fc_head(flat, params["wf1"], params["bf1"],
                  params["wf2"], params["bf2"])                # [N, 10]
    return out


# ----------------------------------------------------------------------------
# Parameters: generated in torch layouts, converted once to kernel layouts.
# ----------------------------------------------------------------------------
def convert_torch_params(Wc1, bc1, Wc2, bc2, Wf1, bf1, Wf2, bf2):
    # conv weights: [Cout,Cin,kh,kw] -> [(kh,kw,cin), cout]
    w1 = jnp.transpose(Wc1, (2, 3, 1, 0)).reshape(9 * 1, 32)
    w2 = jnp.transpose(Wc2, (2, 3, 1, 0)).reshape(9 * 32, 64)
    # fc1: torch [128, 50176] with k = c*784 + h*28 + w.  Transpose then
    # permute rows to (h, w, c) order so the NHWC flatten matches exactly.
    wf1_chw = Wf1.T.reshape(64, 28, 28, 128)                    # [c, h, w, out]
    wf1 = jnp.transpose(wf1_chw, (1, 2, 0, 3)).reshape(64 * 28 * 28, 128)
    wf1 = wf1.astype(jnp.bfloat16)                              # bf16 weight stream
    # fc2: torch [10, 128] -> [128, 10]
    wf2 = Wf2.T
    return {
        "w1": w1, "b1": bc1,
        "w2": w2, "b2": bc2,
        "wf1": wf1, "bf1": bf1,
        "wf2": wf2, "bf2": bf2,
    }


def init_params(key):
    ks = jax.random.split(key, 8)
    s = 0.05
    # torch-layout parameters
    Wc1 = s * jax.random.normal(ks[0], (32, 1, 3, 3), jnp.float32)
    bc1 = s * jax.random.normal(ks[1], (32,), jnp.float32)
    Wc2 = s * jax.random.normal(ks[2], (64, 32, 3, 3), jnp.float32)
    bc2 = s * jax.random.normal(ks[3], (64,), jnp.float32)
    Wf1 = s * jax.random.normal(ks[4], (128, 64 * 28 * 28), jnp.float32)
    bf1 = s * jax.random.normal(ks[5], (128,), jnp.float32)
    Wf2 = s * jax.random.normal(ks[6], (10, 128), jnp.float32)
    bf2 = s * jax.random.normal(ks[7], (10,), jnp.float32)
    return convert_torch_params(Wc1, bc1, Wc2, bc2, Wf1, bf1, Wf2, bf2)


if __name__ == "__main__":
    key = jax.random.PRNGKey(0)
    kparams, kx = jax.random.split(key)
    params = init_params(kparams)

    # NCHW input, matching torch convention (batch=2, 1 channel, 28x28;
    # spatial size is fixed by fc1 = 64*28*28).
    x = jax.random.normal(kx, (2, 1, 28, 28), jnp.float32)

    out = jax.jit(simple_cnn_forward)(x, params)
    out = jax.block_until_ready(out)
    assert out.shape == (2, 10), out.shape
    assert out.dtype == jnp.float32
    print("KERNEL_OK")
</pallas_src>

<mosaic_0001>
module attributes {stable_mosaic.version = 11 : i64} {
  func.func @_matmul_bias_relu_kernel(%arg0: i32, %arg1: memref<784x9xf32, #tpu.memory_space<vmem>>, %arg2: memref<9x32xf32, #tpu.memory_space<vmem>>, %arg3: memref<1x32xf32, #tpu.memory_space<vmem>>, %arg4: memref<784x32xf32, #tpu.memory_space<vmem>>) attributes {dimension_semantics = [#tpu.dimension_semantics<parallel>], iteration_bounds = array<i64: 2>, scalar_prefetch = 0 : i64, scratch_operands = 0 : i64, tpu.core_type = #tpu.core_type<tc>, window_params = [{transform_indices = @transform_0, window_bounds = array<i64: 784, 9>}, {pipeline_mode = #tpu.pipeline_mode<synchronous>, transform_indices = @transform_1, window_bounds = array<i64: 9, 32>}, {pipeline_mode = #tpu.pipeline_mode<synchronous>, transform_indices = @transform_2, window_bounds = array<i64: 1, 32>}, {transform_indices = @transform_3, window_bounds = array<i64: 784, 32>}]} {
    %c0 = arith.constant 0 : index
    %c0_0 = arith.constant 0 : index
    %0 = vector.load %arg1[%c0, %c0_0] : memref<784x9xf32, #tpu.memory_space<vmem>>, vector<784x9xf32>
    %c0_1 = arith.constant 0 : index
    %c0_2 = arith.constant 0 : index
    %1 = vector.load %arg2[%c0_1, %c0_2] : memref<9x32xf32, #tpu.memory_space<vmem>>, vector<9x32xf32>
    %cst = arith.constant dense<0.000000e+00> : vector<784x32xf32>
    %2 = tpu.matmul %0, %1, %cst {dimension_numbers = #tpu.dot_dimension_numbers<[1], [0], [0], [1], [0, 0, 1, 1], [], []>} : vector<784x9xf32>, vector<9x32xf32>, vector<784x32xf32> -> vector<784x32xf32>
    %c0_3 = arith.constant 0 : index
    %c0_4 = arith.constant 0 : index
    %3 = vector.load %arg3[%c0_3, %c0_4] : memref<1x32xf32, #tpu.memory_space<vmem>>, vector<1x32xf32>
    %4 = vector.broadcast %3 : vector<1x32xf32> to vector<784x32xf32>
    %5 = arith.addf %2, %4 : vector<784x32xf32>
    %cst_5 = arith.constant 0.000000e+00 : f32
    %6 = vector.broadcast %cst_5 : f32 to vector<784x32xf32>
    %7 = arith.maximumf %5, %6 : vector<784x32xf32>
    %c0_6 = arith.constant 0 : index
    %c0_7 = arith.constant 0 : index
    %8 = vector.load %arg4[%c0_6, %c0_7] : memref<784x32xf32, #tpu.memory_space<vmem>>, vector<784x32xf32>
    tpu.vector_store %arg4[%c0_6, %c0_7], %7 {strides = array<i32>} : memref<784x32xf32, #tpu.memory_space<vmem>>, vector<784x32xf32>,
    return
  }
  func.func @transform_0(%arg0: i32) -> (i32, i32) {
    %c0_i32 = arith.constant 0 : i32
    %c0_i32_0 = arith.constant 0 : i32
    return %arg0, %c0_i32 : i32, i32
  }
  func.func @transform_1(%arg0: i32) -> (i32, i32) {
    %c0_i32 = arith.constant 0 : i32
    %c0_i32_0 = arith.constant 0 : i32
    %c0_i32_1 = arith.constant 0 : i32
    return %c0_i32, %c0_i32_0 : i32, i32
  }
  func.func @transform_2(%arg0: i32) -> (i32, i32) {
    %c0_i32 = arith.constant 0 : i32
    %c0_i32_0 = arith.constant 0 : i32
    %c0_i32_1 = arith.constant 0 : i32
    return %c0_i32, %c0_i32_0 : i32, i32
  }
  func.func @transform_3(%arg0: i32) -> (i32, i32) {
    %c0_i32 = arith.constant 0 : i32
    %c0_i32_0 = arith.constant 0 : i32
    return %arg0, %c0_i32 : i32, i32
  }
}

module attributes {stable_mosaic.version = 11 : i64} {
  func.func @_matmul_bias_relu_kernel(%arg0: i32, %arg1: memref<784x288xf32, #tpu.memory_space<vmem>>, %arg2: memref<288x64xf32, #tpu.memory_space<vmem>>, %arg3: memref<1x64xf32, #tpu.memory_space<vmem>>, %arg4: memref<784x64xf32, #tpu.memory_space<vmem>>) attributes {dimension_semantics = [#tpu.dimension_semantics<parallel>], iteration_bounds = array<i64: 2>, scalar_prefetch = 0 : i64, scratch_operands = 0 : i64, tpu.core_type = #tpu.core_type<tc>, window_params = [{transform_indices = @transform_0, window_bounds = array<i64: 784, 288>}, {pipeline_mode = #tpu.pipeline_mode<synchronous>, transform_indices = @transform_1, window_bounds = array<i64: 288, 64>}, {pipeline_mode = #tpu.pipeline_mode<synchronous>, transform_indices = @transform_2, window_bounds = array<i64: 1, 64>}, {transform_indices = @transform_3, window_bounds = array<i64: 784, 64>}]} {
    %c0 = arith.constant 0 : index
    %c0_0 = arith.constant 0 : index
    %0 = vector.load %arg1[%c0, %c0_0] : memref<784x288xf32, #tpu.memory_space<vmem>>, vector<784x288xf32>
    %c0_1 = arith.constant 0 : index
    %c0_2 = arith.constant 0 : index
    %1 = vector.load %arg2[%c0_1, %c0_2] : memref<288x64xf32, #tpu.memory_space<vmem>>, vector<288x64xf32>
    %cst = arith.constant dense<0.000000e+00> : vector<784x64xf32>
    %2 = tpu.matmul %0, %1, %cst {dimension_numbers = #tpu.dot_dimension_numbers<[1], [0], [0], [1], [0, 0, 1, 1], [], []>} : vector<784x288xf32>, vector<288x64xf32>, vector<784x64xf32> -> vector<784x64xf32>
    %c0_3 = arith.constant 0 : index
    %c0_4 = arith.constant 0 : index
    %3 = vector.load %arg3[%c0_3, %c0_4] : memref<1x64xf32, #tpu.memory_space<vmem>>, vector<1x64xf32>
    %4 = vector.broadcast %3 : vector<1x64xf32> to vector<784x64xf32>
    %5 = arith.addf %2, %4 : vector<784x64xf32>
    %cst_5 = arith.constant 0.000000e+00 : f32
    %6 = vector.broadcast %cst_5 : f32 to vector<784x64xf32>
    %7 = arith.maximumf %5, %6 : vector<784x64xf32>
    %c0_6 = arith.constant 0 : index
    %c0_7 = arith.constant 0 : index
    %8 = vector.load %arg4[%c0_6, %c0_7] : memref<784x64xf32, #tpu.memory_space<vmem>>, vector<784x64xf32>
    tpu.vector_store %arg4[%c0_6, %c0_7], %7 {strides = array<i32>} : memref<784x64xf32, #tpu.memory_space<vmem>>, vector<784x64xf32>,
    return
  }
  func.func @transform_0(%arg0: i32) -> (i32, i32) {
    %c0_i32 = arith.constant 0 : i32
    %c0_i32_0 = arith.constant 0 : i32
    return %arg0, %c0_i32 : i32, i32
  }
  func.func @transform_1(%arg0: i32) -> (i32, i32) {
    %c0_i32 = arith.constant 0 : i32
    %c0_i32_0 = arith.constant 0 : i32
    %c0_i32_1 = arith.constant 0 : i32
    return %c0_i32, %c0_i32_0 : i32, i32
  }
  func.func @transform_2(%arg0: i32) -> (i32, i32) {
    %c0_i32 = arith.constant 0 : i32
    %c0_i32_0 = arith.constant 0 : i32
    %c0_i32_1 = arith.constant 0 : i32
    return %c0_i32, %c0_i32_0 : i32, i32
  }
  func.func @transform_3(%arg0: i32) -> (i32, i32) {
    %c0_i32 = arith.constant 0 : i32
    %c0_i32_0 = arith.constant 0 : i32
    return %arg0, %c0_i32 : i32, i32
  }
}

module attributes {stable_mosaic.version = 11 : i64} {
  func.func @_fc_head_kernel(%arg0: i32, %arg1: i32, %arg2: memref<2x7168xbf16, #tpu.memory_space<vmem>>, %arg3: memref<7168x128xbf16, #tpu.memory_space<vmem>>, %arg4: memref<1x128xf32, #tpu.memory_space<vmem>>, %arg5: memref<128x10xf32, #tpu.memory_space<vmem>>, %arg6: memref<1x10xf32, #tpu.memory_space<vmem>>, %arg7: memref<2x10xf32, #tpu.memory_space<vmem>>, %arg8: memref<2x128xf32, #tpu.memory_space<vmem>>) attributes {dimension_semantics = [#tpu.dimension_semantics<parallel>, #tpu.dimension_semantics<arbitrary>], iteration_bounds = array<i64: 1, 7>, scalar_prefetch = 0 : i64, scratch_operands = 1 : i64, tpu.core_type = #tpu.core_type<tc>, window_params = [{transform_indices = @transform_0, window_bounds = array<i64: 2, 7168>}, {transform_indices = @transform_1, window_bounds = array<i64: 7168, 128>}, {pipeline_mode = #tpu.pipeline_mode<synchronous>, transform_indices = @transform_2, window_bounds = array<i64: 1, 128>}, {pipeline_mode = #tpu.pipeline_mode<synchronous>, transform_indices = @transform_3, window_bounds = array<i64: 128, 10>}, {pipeline_mode = #tpu.pipeline_mode<synchronous>, transform_indices = @transform_4, window_bounds = array<i64: 1, 10>}, {transform_indices = @transform_5, window_bounds = array<i64: 2, 10>}]} {
    %c0_i32 = arith.constant 0 : i32
    %0 = arith.cmpi eq, %arg1, %c0_i32 : i32
    %1 = arith.extui %0 : i1 to i32
    %c0_i32_0 = arith.constant 0 : i32
    %2 = arith.cmpi ne, %1, %c0_i32_0 : i32
    scf.if %2 {
      %cst_9 = arith.constant 0.000000e+00 : f32
      %12 = vector.broadcast %cst_9 : f32 to vector<2x128xf32>
      %c0_10 = arith.constant 0 : index
      %c0_11 = arith.constant 0 : index
      %13 = vector.load %arg8[%c0_10, %c0_11] : memref<2x128xf32, #tpu.memory_space<vmem>>, vector<2x128xf32>
      tpu.vector_store %arg8[%c0_10, %c0_11], %12 {strides = array<i32>} : memref<2x128xf32, #tpu.memory_space<vmem>>, vector<2x128xf32>,
    } else {
    }
    %c0 = arith.constant 0 : index
    %c0_1 = arith.constant 0 : index
    %3 = vector.load %arg8[%c0, %c0_1] : memref<2x128xf32, #tpu.memory_space<vmem>>, vector<2x128xf32>
    %c0_2 = arith.constant 0 : index
    %c0_3 = arith.constant 0 : index
    %4 = vector.load %arg2[%c0_2, %c0_3] : memref<2x7168xbf16, #tpu.memory_space<vmem>>, vector<2x7168xbf16>
    %c0_4 = arith.constant 0 : index
    %c0_5 = arith.constant 0 : index
    %5 = vector.load %arg3[%c0_4, %c0_5] : memref<7168x128xbf16, #tpu.memory_space<vmem>>, vector<7168x128xbf16>
    %cst = arith.constant dense<0.000000e+00> : vector<2x128xf32>
    %6 = tpu.matmul %4, %5, %cst {dimension_numbers = #tpu.dot_dimension_numbers<[1], [0], [0], [1], [0, 0, 1, 1], [], []>} : vector<2x7168xbf16>, vector<7168x128xbf16>, vector<2x128xf32> -> vector<2x128xf32>
    %7 = arith.addf %3, %6 : vector<2x128xf32>
    %c0_6 = arith.constant 0 : index
    %c0_7 = arith.constant 0 : index
    %8 = vector.load %arg8[%c0_6, %c0_7] : memref<2x128xf32, #tpu.memory_space<vmem>>, vector<2x128xf32>
    tpu.vector_store %arg8[%c0_6, %c0_7], %7 {strides = array<i32>} : memref<2x128xf32, #tpu.memory_space<vmem>>, vector<2x128xf32>,
    %c6_i32 = arith.constant 6 : i32
    %9 = arith.cmpi eq, %arg1, %c6_i32 : i32
    %10 = arith.extui %9 : i1 to i32
    %c0_i32_8 = arith.constant 0 : i32
    %11 = arith.cmpi ne, %10, %c0_i32_8 : i32
    scf.if %11 {
      %c0_9 = arith.constant 0 : index
      %c0_10 = arith.constant 0 : index
      %12 = vector.load %arg8[%c0_9, %c0_10] : memref<2x128xf32, #tpu.memory_space<vmem>>, vector<2x128xf32>
      %c0_11 = arith.constant 0 : index
      %c0_12 = arith.constant 0 : index
      %13 = vector.load %arg4[%c0_11, %c0_12] : memref<1x128xf32, #tpu.memory_space<vmem>>, vector<1x128xf32>
      %14 = vector.broadcast %13 : vector<1x128xf32> to vector<2x128xf32>
      %15 = arith.addf %12, %14 : vector<2x128xf32>
      %cst_13 = arith.constant 0.000000e+00 : f32
      %16 = vector.broadcast %cst_13 : f32 to vector<2x128xf32>
      %17 = arith.maximumf %15, %16 : vector<2x128xf32>
      %c0_14 = arith.constant 0 : index
      %c0_15 = arith.constant 0 : index
      %18 = vector.load %arg5[%c0_14, %c0_15] : memref<128x10xf32, #tpu.memory_space<vmem>>, vector<128x10xf32>
      %cst_16 = arith.constant dense<0.000000e+00> : vector<2x10xf32>
      %19 = tpu.matmul %17, %18, %cst_16 {dimension_numbers = #tpu.dot_dimension_numbers<[1], [0], [0], [1], [0, 0, 1, 1], [], []>} : vector<2x128xf32>, vector<128x10xf32>, vector<2x10xf32> -> vector<2x10xf32>
      %c0_17 = arith.constant 0 : index
      %c0_18 = arith.constant 0 : index
      %20 = vector.load %arg6[%c0_17, %c0_18] : memref<1x10xf32, #tpu.memory_space<vmem>>, vector<1x10xf32>
      %21 = vector.broadcast %20 : vector<1x10xf32> to vector<2x10xf32>
      %22 = arith.addf %19, %21 : vector<2x10xf32>
      %c0_19 = arith.constant 0 : index
      %c0_20 = arith.constant 0 : index
      %23 = vector.load %arg7[%c0_19, %c0_20] : memref<2x10xf32, #tpu.memory_space<vmem>>, vector<2x10xf32>
      tpu.vector_store %arg7[%c0_19, %c0_20], %22 {strides = array<i32>} : memref<2x10xf32, #tpu.memory_space<vmem>>, vector<2x10xf32>,
    } else {
    }
    return
  }
  func.func @transform_0(%arg0: i32, %arg1: i32) -> (i32, i32) {
    %c0_i32 = arith.constant 0 : i32
    return %arg0, %arg1 : i32, i32
  }
  func.func @transform_1(%arg0: i32, %arg1: i32) -> (i32, i32) {
    %c0_i32 = arith.constant 0 : i32
    %c0_i32_0 = arith.constant 0 : i32
    return %arg1, %c0_i32 : i32, i32
  }
  func.func @transform_2(%arg0: i32, %arg1: i32) -> (i32, i32) {
    %c0_i32 = arith.constant 0 : i32
    %c0_i32_0 = arith.constant 0 : i32
    %c0_i32_1 = arith.constant 0 : i32
    return %c0_i32, %c0_i32_0 : i32, i32
  }
  func.func @transform_3(%arg0: i32, %arg1: i32) -> (i32, i32) {
    %c0_i32 = arith.constant 0 : i32
    %c0_i32_0 = arith.constant 0 : i32
    %c0_i32_1 = arith.constant 0 : i32
    return %c0_i32, %c0_i32_0 : i32, i32
  }
  func.func @transform_4(%arg0: i32, %arg1: i32) -> (i32, i32) {
    %c0_i32 = arith.constant 0 : i32
    %c0_i32_0 = arith.constant 0 : i32
    %c0_i32_1 = arith.constant 0 : i32
    return %c0_i32, %c0_i32_0 : i32, i32
  }
  func.func @transform_5(%arg0: i32, %arg1: i32) -> (i32, i32) {
    %c0_i32 = arith.constant 0 : i32
    %c0_i32_0 = arith.constant 0 : i32
    return %arg0, %c0_i32 : i32, i32
  }
}

</mosaic_0001>

<bundles_post_ra>
// kernel: simple_cnn_forward.3
= control target key start
LH: loop header
LB: loop body
LE: loop exit
PB: predicated region body
PF: predicated region fallthrough
CT: control target
= control target key end

     0   :  { %8 = vsyncpa [#allocation3], 0  ;;  %s2539_s0 = inlined_call_operand.vmem [shape: f32[1568,9], index: 0, kind: input, shape index: {}]   ;;  %s2540_s1 = inlined_call_operand.hbm [shape: f32[9,32], index: 1, kind: input, shape index: {}]   ;;  %s2541_s2 = inlined_call_operand.hbm [shape: f32[1,32], index: 2, kind: input, shape index: {}]   ;;  %s2542_s3 = inlined_call_operand.vmem [shape: f32[1568,32], index: 3, kind: output, shape index: {}]  }
   0x1   :  { %9 = vsyncpa [#allocation5], 0  ;;  %s1939_s12 = smov 0  }
   0x2 LB: > { %s1438_s13 = sadd.s32 4294967295, %s1912_s12   ;;  %p1440_p0 = scmp.ge.s32.totalorder %s1912_s12, 1  ;;  %s1912_s12 = sphi %s1939_s12, %s15_s12  }
   0x3   : > { %p114_p1 = scmp.lt.s32.totalorder %s1912_s12, 3  ;;  %s1914_s14 = smov [#allocation2]  }
   0x4   : > { %s126_s15 = sshll.u32 %s1914_s14, 4  ;;  %p1953_p3 = scmp.eq.s32.totalorder %s1438_s13, 0  ;;  %s127_s15 = int_to_ptr.vmem [resolvable:$true] %s126_s15 }
   0x5   : > { %p1947_p2 = pnand %p1440_p0, %p114_p1  ;;  %s1915_s18 = smov [#allocation4]  }
   0x6   : > { %s2547_s17 = scalar_select %p1953_p3, 1, 0 }
   0x7   : > { %s2546_s16 = scalar_select %p1947_p2, 1, 0 }
   0x8   : > { %p1818_p4 = pneg %p1947_p2  ;;  %s140_s19 = sshll.u32 %s1915_s18, 4  ;;  %s1965_s19 = int_to_ptr.vmem [resolvable:$true] %s140_s19 }
   0x9   : > { %s1842_s23 = scalar_lea.hbm %s2540_s1, 256 }
   0xa   : > { %p1961_p5 = pnand %p1953_p3, %p1818_p4  ;;  %p1843_p6 = scmp.ne.s32.totalorder %s2540_s1, %s1842_s23 }
   0xb   : > { %p1849_p10 = scmp.lt.u32.totalorder %s1842_s23, %s2540_s1 }
   0xc   : > { %p1844_p7 = pneg %p1961_p5 }
   0xe   : > { %p1845_p8 = pnand %p1844_p7, %p1843_p6 }
  0x10   : > { %p1846_p9 = pneg %p1845_p8 }
  0x12   : > { %p1851_p11 = pnand %p1849_p10, %p1846_p9 }
  0x14   : > { %1854 = shalt.err (!%p1851_p11)
}
  0x15   : > { %s1855_s28 = scalar_lea.vmem %s127_s15, 256  ;;  %p1863_p1 = scmp.lt.s32.totalorder %s127_s15, %s127_s15 }
  0x16   : > { %p1856_p12 = scmp.ne.s32.totalorder %s127_s15, %s1855_s28  ;;  %p1864_p4 = scmp.lt.s32.totalorder %s1855_s28, %s1855_s28 }
  0x18   : > { %p1858_p13 = pnand %p1856_p12, %p1844_p7  ;;  %p1865_p3 = por %p1864_p4, %p1863_p1 }
  0x1a   : > { %p1859_p0 = pneg %p1858_p13 }
  0x1c   : > { %p1866_p2 = pnand %p1865_p3, %p1859_p0 }
  0x1e   : > { %1869 = shalt.err (!%p1866_p2)
}
  0x1f   : > { %s1916_s29 = smov 128   ;;  %s1917_s30 = smov 8  }
  0x20   : > { %1821 = dma.hbm_to_vmem [thread:$0]  (!%p1961_p5), %s2540_s1, 256, %s127_s15, [#allocation3], %s1916_s29, %s1916_s29, %s1917_s30  }
  0x21   : > { %s1870_s8 = scalar_lea.hbm %s2541_s2, 16 }
  0x22   : > { %p1871_p6 = scmp.ne.s32.totalorder %s2541_s2, %s1870_s8  ;;  %p1877_p8 = scmp.lt.u32.totalorder %s1870_s8, %s2541_s2 }
  0x24   : > { %p1873_p2 = pnand %p1871_p6, %p1844_p7 }
  0x26   : > { %p1874_p3 = pneg %p1873_p2 }
  0x28   : > { %p1879_p9 = pnand %p1877_p8, %p1874_p3 }
  0x2a   : > { %1882 = shalt.err (!%p1879_p9)
}
  0x2b   : > { %s1883_s15 = scalar_lea.vmem %s1965_s19, 16  ;;  %s1890_s18 = scalar_lea.vmem %s1965_s19, 32 }
  0x2c   : > { %p1884_p10 = scmp.ne.s32.totalorder %s1965_s19, %s1883_s15  ;;  %p1891_p13 = scmp.lt.s32.totalorder %s1965_s19, %s1965_s19 }
  0x2d   : > { %p1892_p0 = scmp.lt.s32.totalorder %s1890_s18, %s1883_s15 }
  0x2e   : > { %p1886_p11 = pnand %p1884_p10, %p1844_p7 }
  0x2f   : > { %p1893_p1 = por %p1892_p0, %p1891_p13 }
  0x30   : > { %p1887_p12 = pneg %p1886_p11 }
  0x32   : > { %p1894_p4 = pnand %p1893_p1, %p1887_p12 }
  0x34   : > { %1897 = shalt.err (!%p1894_p4)
}
  0x35   : > { %1824 = dma.hbm_to_vmem [thread:$0]  (!%p1961_p5), %s2541_s2, 16, %s1965_s19, [#allocation5]  }
  0x36   : > { %p2549_p6 = scmp.ne.s32.totalorder %s2546_s16, 0 }
  0x37   : > { %p2550_p7 = scmp.ne.s32.totalorder (!%p2549_p6), %s2547_s17, 0 }
  0x38   : > { %162 = sbr.rel (%p2549_p6) target bundleno = 389 (0x185), region = 32 }
  0x3f   : > { %1903 = dma.done.wait (%p2550_p7), [#allocation3], 256  }
  0x40   : > { %1905 = vsyncadd (%p2550_p7), [#allocation3], 4294967040 }
  0x41   : > { %1907 = dma.done.wait (%p2550_p7), [#allocation5], 16  }
  0x42   : > { %1909 = vsyncadd (%p2550_p7), [#allocation5], 4294967280  ;;  %s190_s20 = smul.u32 98, %s1438_s13  ;;  %vm604_vm0 = vcmask 1040384   ;;  %vm309_vm1 = vcmask 72704   ;;  %v300_v0 = vld [vmem:[#allocation2] sm:$0xff] }
  0x43   : > { %v301_v1 = vld [vmem:[#allocation2 + $0x8] sm:$0x1]  ;;  %vm1918_vm2 = vmmov 1   ;;  %vm1261_vm4 = vcmask 261120  }
  0x44   : > { %p191_p2 = scmp.lt.s32.totalorder %s190_s20, 195  ;;  %vm1803_vm3 = vmpackc.low %vm604_vm0, %vm1918_vm2  ;;  %v1802_v2 = vpack.c.bf16 %v301_v1, %v300_v0 }
  0x46   : > { %s2552_s20 = smov (!%p191_p2, %s190_s20), 195  ;;  %1804 = vmatprep.subr.msk.bf16.mxu0 %vm1803_vm3, %v1802_v2  ;;  %1808 = vmatprep.subr.msk.bf16.mxu1 %vm1803_vm3, %v1802_v2 }
  0x47   : > { %s1447_s16 = sshll.u32 %s2552_s20, 3  ;;  %1807 = vmatpush3.bf16.msk.msra.mxu0 %vm1803_vm3, %v1802_v2  ;;  %1809 = vmatpush3.bf16.msk.msra.mxu1 %vm1803_vm3, %v1802_v2 }
  0x48   : > { %s2035_s17 = scalar_lea.vmem %s2539_s0, %s1447_s16  ;;  %s2242_s25 = scalar_lea.vmem %s2542_s3, %s1447_s16 }
  0x49   : > { %v202_v3 = vld [vmem:[%s2035_s17] sm:$0xff]  ;;  %v252_v4 = vld [vmem:[%s2035_s17 + $0x190] sm:$0xff]  ;;  %v203_v5 = vld [vmem:[%s2035_s17 + $0x8] sm:$0xff] }
  0x4a   : > { %1655 = vmatprep.mubr.msk.f32.mxu0 %vm309_vm1, %v202_v3  ;;  %1730 = vmatprep.mubr.msk.f32.mxu1 %vm309_vm1, %v252_v4  ;;  %v253_v6 = vld [vmem:[%s2035_s17 + $0x198] sm:$0xff]  ;;  %v204_v7 = vld [vmem:[%s2035_s17 + $0x10] sm:$0xff]  ;;  %v254_v8 = vld [vmem:[%s2035_s17 + $0x1a0] sm:$0xff] }
  0x4b   : > { %1656 = vmatmul.mubr.msk.f32.vlgmr.msra.gmra.mrb[0].mxu0 %vm309_vm1, %v203_v5  ;;  %1731 = vmatmul.mubr.msk.f32.vlgmr.msra.gmra.mrb[0].mxu1 %vm309_vm1, %v253_v6  ;;  %v205_v9 = vld [vmem:[%s2035_s17 + $0x18] sm:$0xff]  ;;  %v255_v10 = vld [vmem:[%s2035_s17 + $0x1a8] sm:$0xff]  ;;  %v206_v11 = vld [vmem:[%s2035_s17 + $0x20] sm:$0xff] }
  0x4c   : > { %1658 = vmatprep.mubr.msk.f32.mxu0 %vm309_vm1, %v204_v7  ;;  %1733 = vmatprep.mubr.msk.f32.mxu1 %vm309_vm1, %v254_v8  ;;  %v256_v12 = vld [vmem:[%s2035_s17 + $0x1b0] sm:$0xff]  ;;  %v207_v13 = vld [vmem:[%s2035_s17 + $0x28] sm:$0xff]  ;;  %v257_v14 = vld [vmem:[%s2035_s17 + $0x1b8] sm:$0xff] }
  0x4d   : > { %v208_v15 = vld [vmem:[%s2035_s17 + $0x30] sm:$0xff]  ;;  %v258_v16 = vld [vmem:[%s2035_s17 + $0x1c0] sm:$0xff]  ;;  %v209_v17 = vld [vmem:[%s2035_s17 + $0x38] sm:$0xff] }
  0x4e   : > { %v259_v18 = vld [vmem:[%s2035_s17 + $0x1c8] sm:$0xff]  ;;  %v210_v19 = vld [vmem:[%s2035_s17 + $0x40] sm:$0xff]  ;;  %v260_v20 = vld [vmem:[%s2035_s17 + $0x1d0] sm:$0xff] }
  0x4f   : > { %1659 = vmatmul.mubr.msk.f32.gmra.mrb[2].mxu0 %vm309_vm1, %v205_v9  ;;  %1734 = vmatmul.mubr.msk.f32.gmra.mrb[2].mxu1 %vm309_vm1, %v255_v10  ;;  %v211_v21 = vld [vmem:[%s2035_s17 + $0x48] sm:$0xff]  ;;  %v261_v22 = vld [vmem:[%s2035_s17 + $0x1d8] sm:$0xff]  ;;  %v212_v23 = vld [vmem:[%s2035_s17 + $0x50] sm:$0xff] }
  0x50   : > { %1661 = vmatprep.mubr.msk.f32.mxu0 %vm309_vm1, %v206_v11  ;;  %1736 = vmatprep.mubr.msk.f32.mxu1 %vm309_vm1, %v256_v12  ;;  %v262_v24 = vld [vmem:[%s2035_s17 + $0x1e0] sm:$0xff]  ;;  %v213_v25 = vld [vmem:[%s2035_s17 + $0x58] sm:$0xff]  ;;  %v263_v26 = vld [vmem:[%s2035_s17 + $0x1e8] sm:$0xff] }
  0x51   : > { %v214_v27 = vld [vmem:[%s2035_s17 + $0x60] sm:$0xff]  ;;  %v264_v28 = vld [vmem:[%s2035_s17 + $0x1f0] sm:$0xff]  ;;  %v215_v29 = vld [vmem:[%s2035_s17 + $0x68] sm:$0xff] }
  0x52   : > { %v265_v30 = vld [vmem:[%s2035_s17 + $0x1f8] sm:$0xff]  ;;  %v216_v31 = vld [vmem:[%s2035_s17 + $0x70] sm:$0xff]  ;;  %v266_v32 = vld [vmem:[%s2035_s17 + $0x200] sm:$0xff] }
  0x53   : > { %1662 = vmatmul.mubr.msk.f32.gmra.mrb[4].mxu0 %vm309_vm1, %v207_v13  ;;  %1737 = vmatmul.mubr.msk.f32.gmra.mrb[4].mxu1 %vm309_vm1, %v257_v14  ;;  %v217_v33 = vld [vmem:[%s2035_s17 + $0x78] sm:$0xff]  ;;  %v267_v34 = vld [vmem:[%s2035_s17 + $0x208] sm:$0xff]  ;;  %v218_v35 = vld [vmem:[%s2035_s17 + $0x80] sm:$0xff] }
  0x54   : > { %1664 = vmatprep.mubr.msk.f32.mxu0 %vm309_vm1, %v208_v15  ;;  %1739 = vmatprep.mubr.msk.f32.mxu1 %vm309_vm1, %v258_v16  ;;  %v268_v36 = vld [vmem:[%s2035_s17 + $0x210] sm:$0xff]  ;;  %v219_v37 = vld [vmem:[%s2035_s17 + $0x88] sm:$0xff]  ;;  %v269_v38 = vld [vmem:[%s2035_s17 + $0x218] sm:$0xff] }
  0x55   : > { %v220_v39 = vld [vmem:[%s2035_s17 + $0x90] sm:$0xff]  ;;  %v270_v40 = vld [vmem:[%s2035_s17 + $0x220] sm:$0xff]  ;;  %v221_v41 = vld [vmem:[%s2035_s17 + $0x98] sm:$0xff] }
  0x56   : > { %v271_v42 = vld [vmem:[%s2035_s17 + $0x228] sm:$0xff]  ;;  %v222_v43 = vld [vmem:[%s2035_s17 + $0xa0] sm:$0xff]  ;;  %v272_v44 = vld [vmem:[%s2035_s17 + $0x230] sm:$0xff] }
  0x57   : > { %1665 = vmatmul.mubr.msk.f32.gmra.mrb[6].mxu0 %vm309_vm1, %v209_v17  ;;  %1740 = vmatmul.mubr.msk.f32.gmra.mrb[6].mxu1 %vm309_vm1, %v259_v18  ;;  %v223_v45 = vld [vmem:[%s2035_s17 + $0xa8] sm:$0xff]  ;;  %v273_v46 = vld [vmem:[%s2035_s17 + $0x238] sm:$0xff]  ;;  %v224_v47 = vld [vmem:[%s2035_s17 + $0xb0] sm:$0xff] }
  0x58   : > { %1667 = vmatprep.mubr.msk.f32.mxu0 %vm309_vm1, %v210_v19  ;;  %1742 = vmatprep.mubr.msk.f32.mxu1 %vm309_vm1, %v260_v20  ;;  %v274_v48 = vld [vmem:[%s2035_s17 + $0x240] sm:$0xff]  ;;  %v225_v49 = vld [vmem:[%s2035_s17 + $0xb8] sm:$0xff]  ;;  %v275_v50 = vld [vmem:[%s2035_s17 + $0x248] sm:$0xff] }
  0x59   : > { %v226_v51 = vld [vmem:[%s2035_s17 + $0xc0] sm:$0xff]  ;;  %v276_v52 = vld [vmem:[%s2035_s17 + $0x250] sm:$0xff]  ;;  %v227_v53 = vld [vmem:[%s2035_s17 + $0xc8] sm:$0xff] }
  0x5a   : > { %v277_v54 = vld [vmem:[%s2035_s17 + $0x258] sm:$0xff]  ;;  %v228_v55 = vld [vmem:[%s2035_s17 + $0xd0] sm:$0xff]  ;;  %v278_v56 = vld [vmem:[%s2035_s17 + $0x260] sm:$0xff] }
  0x5b   : > { %1668 = vmatmul.mubr.msk.f32.gmra.mrb[8].mxu0 %vm309_vm1, %v211_v21  ;;  %1743 = vmatmul.mubr.msk.f32.gmra.mrb[8].mxu1 %vm309_vm1, %v261_v22  ;;  %v229_v57 = vld [vmem:[%s2035_s17 + $0xd8] sm:$0xff]  ;;  %v279_v58 = vld [vmem:[%s2035_s17 + $0x268] sm:$0xff]  ;;  %v230_v59 = vld [vmem:[%s2035_s17 + $0xe0] sm:$0xff] }
  0x5c   : > { %1670 = vmatprep.mubr.msk.f32.mxu0 %vm309_vm1, %v212_v23  ;;  %1745 = vmatprep.mubr.msk.f32.mxu1 %vm309_vm1, %v262_v24  ;;  %v280_v60 = vld [vmem:[%s2035_s17 + $0x270] sm:$0xff]  ;;  %v231_v61 = vld [vmem:[%s2035_s17 + $0xe8] sm:$0xff]  ;;  %v281_v62 = vld [vmem:[%s2035_s17 + $0x278] sm:$0xff] }
  0x5d   : > { %v232_v63 = vld [vmem:[%s2035_s17 + $0xf0] sm:$0xff]  ;;  %v282_v0 = vld [vmem:[%s2035_s17 + $0x280] sm:$0xff]  ;;  %v233_v1 = vld [vmem:[%s2035_s17 + $0xf8] sm:$0xff] }
  0x5e   : > { %v283_v2 = vld [vmem:[%s2035_s17 + $0x288] sm:$0xff]  ;;  %v234_v3 = vld [vmem:[%s2035_s17 + $0x100] sm:$0xff]  ;;  %v284_v4 = vld [vmem:[%s2035_s17 + $0x290] sm:$0xff] }
  0x5f   : > { %1671 = vmatmul.mubr.msk.f32.gmra.mrb[10].mxu0 %vm309_vm1, %v213_v25  ;;  %1746 = vmatmul.mubr.msk.f32.gmra.mrb[10].mxu1 %vm309_vm1, %v263_v26  ;;  %v235_v5 = vld [vmem:[%s2035_s17 + $0x108] sm:$0xff]  ;;  %v285_v6 = vld [vmem:[%s2035_s17 + $0x298] sm:$0xff]  ;;  %v236_v7 = vld [vmem:[%s2035_s17 + $0x110] sm:$0xff] }
  0x60   : > { %1673 = vmatprep.mubr.msk.f32.mxu0 %vm309_vm1, %v214_v27  ;;  %1748 = vmatprep.mubr.msk.f32.mxu1 %vm309_vm1, %v264_v28  ;;  %v286_v8 = vld [vmem:[%s2035_s17 + $0x2a0] sm:$0xff]  ;;  %v237_v9 = vld [vmem:[%s2035_s17 + $0x118] sm:$0xff]  ;;  %v287_v10 = vld [vmem:[%s2035_s17 + $0x2a8] sm:$0xff] }
  0x61   : > { %v238_v11 = vld [vmem:[%s2035_s17 + $0x120] sm:$0xff]  ;;  %v288_v12 = vld [vmem:[%s2035_s17 + $0x2b0] sm:$0xff]  ;;  %v239_v13 = vld [vmem:[%s2035_s17 + $0x128] sm:$0xff] }
  0x62   : > { %v289_v14 = vld [vmem:[%s2035_s17 + $0x2b8] sm:$0xff]  ;;  %v240_v15 = vld [vmem:[%s2035_s17 + $0x130] sm:$0xff]  ;;  %v290_v16 = vld [vmem:[%s2035_s17 + $0x2c0] sm:$0xff] }
  0x63   : > { %1674 = vmatmul.mubr.msk.f32.gmra.mrb[12].mxu0 %vm309_vm1, %v215_v29  ;;  %1749 = vmatmul.mubr.msk.f32.gmra.mrb[12].mxu1 %vm309_vm1, %v265_v30  ;;  %v241_v17 = vld [vmem:[%s2035_s17 + $0x138] sm:$0xff]  ;;  %v291_v18 = vld [vmem:[%s2035_s17 + $0x2c8] sm:$0xff]  ;;  %v242_v19 = vld [vmem:[%s2035_s17 + $0x140] sm:$0xff] }
  0x64   : > { %1676 = vmatprep.mubr.msk.f32.mxu0 %vm309_vm1, %v216_v31  ;;  %1751 = vmatprep.mubr.msk.f32.mxu1 %vm309_vm1, %v266_v32  ;;  %v292_v20 = vld [vmem:[%s2035_s17 + $0x2d0] sm:$0xff]  ;;  %v243_v21 = vld [vmem:[%s2035_s17 + $0x148] sm:$0xff]  ;;  %v293_v22 = vld [vmem:[%s2035_s17 + $0x2d8] sm:$0xff] }
  0x65   : > { %v244_v23 = vld [vmem:[%s2035_s17 + $0x150] sm:$0xff]  ;;  %v294_v24 = vld [vmem:[%s2035_s17 + $0x2e0] sm:$0xff]  ;;  %v245_v25 = vld [vmem:[%s2035_s17 + $0x158] sm:$0xff] }
  0x66   : > { %v295_v26 = vld [vmem:[%s2035_s17 + $0x2e8] sm:$0xff]  ;;  %v246_v27 = vld [vmem:[%s2035_s17 + $0x160] sm:$0xff]  ;;  %v296_v28 = vld [vmem:[%s2035_s17 + $0x2f0] sm:$0xff] }
  0x67   : > { %1677 = vmatmul.mubr.msk.f32.gmra.mrb[14].mxu0 %vm309_vm1, %v217_v33  ;;  %1752 = vmatmul.mubr.msk.f32.gmra.mrb[14].mxu1 %vm309_vm1, %v267_v34  ;;  %v247_v29 = vld [vmem:[%s2035_s17 + $0x168] sm:$0xff]  ;;  %v297_v30 = vld [vmem:[%s2035_s17 + $0x2f8] sm:$0xff]  ;;  %v248_v31 = vld [vmem:[%s2035_s17 + $0x170] sm:$0xff] }
  0x68   : > { %1679 = vmatprep.mubr.msk.f32.mxu0 %vm309_vm1, %v218_v35  ;;  %1754 = vmatprep.mubr.msk.f32.mxu1 %vm309_vm1, %v268_v36  ;;  %v298_v32 = vld [vmem:[%s2035_s17 + $0x300] sm:$0xff]  ;;  %v249_v33 = vld [vmem:[%s2035_s17 + $0x178] sm:$0xff]  ;;  %v299_v34 = vld [vmem:[%s2035_s17 + $0x308] sm:$0xff] }
  0x69   : > { %v250_v35 = vld [vmem:[%s2035_s17 + $0x180] sm:$0xff]  ;;  %v251_v36 = vld [vmem:[%s2035_s17 + $0x188] sm:$0xff] }
  0x6b   : > { %1680 = vmatmul.mubr.msk.f32.gmra.mrb[16].mxu0 %vm309_vm1, %v219_v37  ;;  %1755 = vmatmul.mubr.msk.f32.gmra.mrb[16].mxu1 %vm309_vm1, %v269_v38  ;;  %v2233_v37 = vld [vmem:[#allocation4] ss:$0 sm:$0xff] }
  0x6c   : > { %1682 = vmatprep.mubr.msk.f32.mxu0 %vm309_vm1, %v220_v39  ;;  %1757 = vmatprep.mubr.msk.f32.mxu1 %vm309_vm1, %v270_v40 }
  0x6f   : > { %1683 = vmatmul.mubr.msk.f32.gmra.mrb[18].mxu0 %vm309_vm1, %v221_v41  ;;  %1758 = vmatmul.mubr.msk.f32.gmra.mrb[18].mxu1 %vm309_vm1, %v271_v42 }
  0x70   : > { %1685 = vmatprep.mubr.msk.f32.mxu0 %vm309_vm1, %v222_v43  ;;  %1760 = vmatprep.mubr.msk.f32.mxu1 %vm309_vm1, %v272_v44 }
  0x73   : > { %1686 = vmatmul.mubr.msk.f32.gmra.mrb[20].mxu0 %vm309_vm1, %v223_v45  ;;  %1761 = vmatmul.mubr.msk.f32.gmra.mrb[20].mxu1 %vm309_vm1, %v273_v46 }
  0x74   : > { %1688 = vmatprep.mubr.msk.f32.mxu0 %vm309_vm1, %v224_v47  ;;  %1763 = vmatprep.mubr.msk.f32.mxu1 %vm309_vm1, %v274_v48 }
  0x77   : > { %1689 = vmatmul.mubr.msk.f32.gmra.mrb[22].mxu0 %vm309_vm1, %v225_v49  ;;  %1764 = vmatmul.mubr.msk.f32.gmra.mrb[22].mxu1 %vm309_vm1, %v275_v50 }
  0x78   : > { %1691 = vmatprep.mubr.msk.f32.mxu0 %vm309_vm1, %v226_v51  ;;  %1766 = vmatprep.mubr.msk.f32.mxu1 %vm309_vm1, %v276_v52 }
  0x7b   : > { %1692 = vmatmul.mubr.msk.f32.gmra.mrb[24].mxu0 %vm309_vm1, %v227_v53  ;;  %1767 = vmatmul.mubr.msk.f32.gmra.mrb[24].mxu1 %vm309_vm1, %v277_v54 }
  0x7c   : > { %1694 = vmatprep.mubr.msk.f32.mxu0 %vm309_vm1, %v228_v55  ;;  %1769 = vmatprep.mubr.msk.f32.mxu1 %vm309_vm1, %v278_v56 }
  0x7f   : > { %1695 = vmatmul.mubr.msk.f32.gmra.mrb[26].mxu0 %vm309_vm1, %v229_v57  ;;  %1770 = vmatmul.mubr.msk.f32.gmra.mrb[26].mxu1 %vm309_vm1, %v279_v58 }
  0x80   : > { %1697 = vmatprep.mubr.msk.f32.mxu0 %vm309_vm1, %v230_v59  ;;  %1772 = vmatprep.mubr.msk.f32.mxu1 %vm309_vm1, %v280_v60 }
  0x83   : > { %1698 = vmatmul.mubr.msk.f32.gmra.mrb[28].mxu0 %vm309_vm1, %v231_v61  ;;  %1773 = vmatmul.mubr.msk.f32.gmra.mrb[28].mxu1 %vm309_vm1, %v281_v62 }
  0x84   : > { %1700 = vmatprep.mubr.msk.f32.mxu0 %vm309_vm1, %v232_v63  ;;  %1775 = vmatprep.mubr.msk.f32.mxu1 %vm309_vm1, %v282_v0 }
  0x87   : > { %1701 = vmatmul.mubr.msk.f32.gmra.mrb[30].mxu0 %vm309_vm1, %v233_v1  ;;  %1776 = vmatmul.mubr.msk.f32.gmra.mrb[30].mxu1 %vm309_vm1, %v283_v2 }
  0x88   : > { %1703 = vmatprep.mubr.msk.f32.mxu0 %vm309_vm1, %v234_v3  ;;  %1778 = vmatprep.mubr.msk.f32.mxu1 %vm309_vm1, %v284_v4 }
  0x8b   : > { %1704 = vmatmul.mubr.msk.f32.gmra.mrb[32].mxu0 %vm309_vm1, %v235_v5  ;;  %1779 = vmatmul.mubr.msk.f32.gmra.mrb[32].mxu1 %vm309_vm1, %v285_v6 }
  0x8c   : > { %1706 = vmatprep.mubr.msk.f32.mxu0 %vm309_vm1, %v236_v7  ;;  %1781 = vmatprep.mubr.msk.f32.mxu1 %vm309_vm1, %v286_v8 }
  0x8f   : > { %1707 = vmatmul.mubr.msk.f32.gmra.mrb[34].mxu0 %vm309_vm1, %v237_v9  ;;  %1782 = vmatmul.mubr.msk.f32.gmra.mrb[34].mxu1 %vm309_vm1, %v287_v10 }
  0x90   : > { %1709 = vmatprep.mubr.msk.f32.mxu0 %vm309_vm1, %v238_v11  ;;  %1784 = vmatprep.mubr.msk.f32.mxu1 %vm309_vm1, %v288_v12 }
  0x93   : > { %1710 = vmatmul.mubr.msk.f32.gmra.mrb[36].mxu0 %vm309_vm1, %v239_v13  ;;  %1785 = vmatmul.mubr.msk.f32.gmra.mrb[36].mxu1 %vm309_vm1, %v289_v14 }
  0x94   : > { %1712 = vmatprep.mubr.msk.f32.mxu0 %vm309_vm1, %v240_v15  ;;  %1787 = vmatprep.mubr.msk.f32.mxu1 %vm309_vm1, %v290_v16 }
  0x97   : > { %1713 = vmatmul.mubr.msk.f32.gmra.mrb[38].mxu0 %vm309_vm1, %v241_v17  ;;  %1788 = vmatmul.mubr.msk.f32.gmra.mrb[38].mxu1 %vm309_vm1, %v291_v18 }
  0x98   : > { %1715 = vmatprep.mubr.msk.f32.mxu0 %vm309_vm1, %v242_v19  ;;  %1790 = vmatprep.mubr.msk.f32.mxu1 %vm309_vm1, %v292_v20 }
  0x9b   : > { %1716 = vmatmul.mubr.msk.f32.gmra.mrb[40].mxu0 %vm309_vm1, %v243_v21  ;;  %1791 = vmatmul.mubr.msk.f32.gmra.mrb[40].mxu1 %vm309_vm1, %v293_v22 }
  0x9c   : > { %1718 = vmatprep.mubr.msk.f32.mxu0 %vm309_vm1, %v244_v23  ;;  %1793 = vmatprep.mubr.msk.f32.mxu1 %vm309_vm1, %v294_v24 }
  0x9f   : > { %1719 = vmatmul.mubr.msk.f32.gmra.mrb[42].mxu0 %vm309_vm1, %v245_v25  ;;  %1794 = vmatmul.mubr.msk.f32.gmra.mrb[42].mxu1 %vm309_vm1, %v295_v26 }
  0xa0   : > { %1721 = vmatprep.mubr.msk.f32.mxu0 %vm309_vm1, %v246_v27  ;;  %1796 = vmatprep.mubr.msk.f32.mxu1 %vm309_vm1, %v296_v28 }
  0xa3   : > { %1722 = vmatmul.mubr.msk.f32.gmra.mrb[44].mxu0 %vm309_vm1, %v247_v29  ;;  %1797 = vmatmul.mubr.msk.f32.gmra.mrb[44].mxu1 %vm309_vm1, %v297_v30 }
  0xa4   : > { %1724 = vmatprep.mubr.msk.f32.mxu0 %vm309_vm1, %v248_v31  ;;  %1799 = vmatprep.mubr.msk.f32.mxu1 %vm309_vm1, %v298_v32 }
  0xa7   : > { %1725 = vmatmul.mubr.msk.f32.gmra.mrb[46].mxu0 %vm309_vm1, %v249_v33  ;;  %1800 = vmatmul.mubr.msk.f32.gmra.mrb[46].mxu1 %vm309_vm1, %v299_v34 }
  0xa8   : > { %1727 = vmatprep.mubr.msk.f32.mxu0 %vm309_vm1, %v250_v35 }
  0xab   : > { %1728 = vmatmul.mubr.msk.f32.gmra.mrb[48].mxu0 %vm309_vm1, %v251_v36 }
 0x11e   : > { %v1657_v38 = vpop.f32.mrb[0].mxu0  ;;  %v1732_v39 = vpop.f32.mrb[0].mxu1 }
 0x11f   : > { %v680_v40 = vadd.f32 %v1657_v38, %v2233_v37  ;;  %v674_v41 = vpop.f32.mrb[1].mxu0  ;;  %v930_v42 = vadd.f32 %v1732_v39, %v2233_v37  ;;  %v924_v43 = vpop.f32.mrb[1].mxu1 }
 0x120   : > { %v675_v44 = vadd.f32 %v2233_v37, %v674_v41  ;;  %v925_v45 = vadd.f32 %v2233_v37, %v924_v43 }
 0x121   : > { %v1164_v46 = vmax.f32 %v680_v40, 0.0  ;;  %v1214_v47 = vmax.f32 %v930_v42, 0.0 }
 0x122   : > { %v1163_v48 = vmax.f32 %v675_v44, 0.0  ;;  %v1660_v49 = vpop.f32.mrb[2].mxu0  ;;  %v1213_v50 = vmax.f32 %v925_v45, 0.0  ;;  %v1735_v51 = vpop.f32.mrb[2].mxu1 }
 0x123   : > { %1263 = vst.msk [vmem:[%s2242_s25 + $0x8] sm:$0xff] %vm1261_vm4, %v1164_v46  ;;  %1313 = vst.msk [vmem:[%s2242_s25 + $0x198] sm:$0xff] %vm1261_vm4, %v1214_v47  ;;  %v690_v52 = vadd.f32 %v1660_v49, %v2233_v37  ;;  %v684_v53 = vpop.f32.mrb[3].mxu0  ;;  %v940_v54 = vadd.f32 %v1735_v51, %v2233_v37  ;;  %v934_v55 = vpop.f32.mrb[3].mxu1 }
 0x124   : > { %1262 = vst.msk [vmem:[%s2242_s25] sm:$0xff] %vm1261_vm4, %v1163_v48  ;;  %1312 = vst.msk [vmem:[%s2242_s25 + $0x190] sm:$0xff] %vm1261_vm4, %v1213_v50  ;;  %v685_v56 = vadd.f32 %v2233_v37, %v684_v53  ;;  %v935_v57 = vadd.f32 %v2233_v37, %v934_v55 }
 0x125   : > { %v1166_v58 = vmax.f32 %v690_v52, 0.0  ;;  %v1216_v59 = vmax.f32 %v940_v54, 0.0 }
 0x126   : > { %v1165_v60 = vmax.f32 %v685_v56, 0.0  ;;  %v1663_v61 = vpop.f32.mrb[4].mxu0  ;;  %v1215_v62 = vmax.f32 %v935_v57, 0.0  ;;  %v1738_v63 = vpop.f32.mrb[4].mxu1 }
 0x127   : > { %1265 = vst.msk [vmem:[%s2242_s25 + $0x18] sm:$0xff] %vm1261_vm4, %v1166_v58  ;;  %1315 = vst.msk [vmem:[%s2242_s25 + $0x1a8] sm:$0xff] %vm1261_vm4, %v1216_v59  ;;  %v700_v0 = vadd.f32 %v1663_v61, %v2233_v37  ;;  %v694_v1 = vpop.f32.mrb[5].mxu0  ;;  %v950_v2 = vadd.f32 %v1738_v63, %v2233_v37  ;;  %v944_v3 = vpop.f32.mrb[5].mxu1 }
 0x128   : > { %1264 = vst.msk [vmem:[%s2242_s25 + $0x10] sm:$0xff] %vm1261_vm4, %v1165_v60  ;;  %1314 = vst.msk [vmem:[%s2242_s25 + $0x1a0] sm:$0xff] %vm1261_vm4, %v1215_v62  ;;  %v695_v4 = vadd.f32 %v2233_v37, %v694_v1  ;;  %v945_v5 = vadd.f32 %v2233_v37, %v944_v3 }
 0x129   : > { %v1168_v6 = vmax.f32 %v700_v0, 0.0  ;;  %v1218_v7 = vmax.f32 %v950_v2, 0.0 }
 0x12a   : > { %v1167_v8 = vmax.f32 %v695_v4, 0.0  ;;  %v1666_v9 = vpop.f32.mrb[6].mxu0  ;;  %v1217_v10 = vmax.f32 %v945_v5, 0.0  ;;  %v1741_v11 = vpop.f32.mrb[6].mxu1 }
 0x12b   : > { %1267 = vst.msk [vmem:[%s2242_s25 + $0x28] sm:$0xff] %vm1261_vm4, %v1168_v6  ;;  %1317 = vst.msk [vmem:[%s2242_s25 + $0x1b8] sm:$0xff] %vm1261_vm4, %v1218_v7  ;;  %v710_v12 = vadd.f32 %v1666_v9, %v2233_v37  ;;  %v704_v13 = vpop.f32.mrb[7].mxu0  ;;  %v960_v14 = vadd.f32 %v1741_v11, %v2233_v37  ;;  %v954_v15 = vpop.f32.mrb[7].mxu1 }
 0x12c   : > { %1266 = vst.msk [vmem:[%s2242_s25 + $0x20] sm:$0xff] %vm1261_vm4, %v1167_v8  ;;  %1316 = vst.msk [vmem:[%s2242_s25 + $0x1b0] sm:$0xff] %vm1261_vm4, %v1217_v10  ;;  %v705_v16 = vadd.f32 %v2233_v37, %v704_v13  ;;  %v955_v17 = vadd.f32 %v2233_v37, %v954_v15 }
 0x12d   : > { %v1170_v18 = vmax.f32 %v710_v12, 0.0  ;;  %v1220_v19 = vmax.f32 %v960_v14, 0.0 }
 0x12e   : > { %v1169_v20 = vmax.f32 %v705_v16, 0.0  ;;  %v1669_v21 = vpop.f32.mrb[8].mxu0  ;;  %v1219_v22 = vmax.f32 %v955_v17, 0.0  ;;  %v1744_v23 = vpop.f32.mrb[8].mxu1 }
 0x12f   : > { %1269 = vst.msk [vmem:[%s2242_s25 + $0x38] sm:$0xff] %vm1261_vm4, %v1170_v18  ;;  %1319 = vst.msk [vmem:[%s2242_s25 + $0x1c8] sm:$0xff] %vm1261_vm4, %v1220_v19  ;;  %v720_v24 = vadd.f32 %v1669_v21, %v2233_v37  ;;  %v714_v25 = vpop.f32.mrb[9].mxu0  ;;  %v970_v26 = vadd.f32 %v1744_v23, %v2233_v37  ;;  %v964_v27 = vpop.f32.mrb[9].mxu1 }
 0x130   : > { %1268 = vst.msk [vmem:[%s2242_s25 + $0x30] sm:$0xff] %vm1261_vm4, %v1169_v20  ;;  %1318 = vst.msk [vmem:[%s2242_s25 + $0x1c0] sm:$0xff] %vm1261_vm4, %v1219_v22  ;;  %v715_v28 = vadd.f32 %v2233_v37, %v714_v25  ;;  %v965_v29 = vadd.f32 %v2233_v37, %v964_v27 }
 0x131   : > { %v1172_v30 = vmax.f32 %v720_v24, 0.0  ;;  %v1222_v31 = vmax.f32 %v970_v26, 0.0 }
 0x132   : > { %v1171_v32 = vmax.f32 %v715_v28, 0.0  ;;  %v1672_v33 = vpop.f32.mrb[10].mxu0  ;;  %v1221_v34 = vmax.f32 %v965_v29, 0.0  ;;  %v1747_v35 = vpop.f32.mrb[10].mxu1 }
 0x133   : > { %1271 = vst.msk [vmem:[%s2242_s25 + $0x48] sm:$0xff] %vm1261_vm4, %v1172_v30  ;;  %1321 = vst.msk [vmem:[%s2242_s25 + $0x1d8] sm:$0xff] %vm1261_vm4, %v1222_v31  ;;  %v730_v36 = vadd.f32 %v1672_v33, %v2233_v37  ;;  %v724_v38 = vpop.f32.mrb[11].mxu0  ;;  %v980_v39 = vadd.f32 %v1747_v35, %v2233_v37  ;;  %v974_v40 = vpop.f32.mrb[11].mxu1 }
 0x134   : > { %1270 = vst.msk [vmem:[%s2242_s25 + $0x40] sm:$0xff] %vm1261_vm4, %v1171_v32  ;;  %1320 = vst.msk [vmem:[%s2242_s25 + $0x1d0] sm:$0xff] %vm1261_vm4, %v1221_v34  ;;  %v725_v41 = vadd.f32 %v2233_v37, %v724_v38  ;;  %v975_v42 = vadd.f32 %v2233_v37, %v974_v40 }
 0x135   : > { %v1174_v43 = vmax.f32 %v730_v36, 0.0  ;;  %v1224_v44 = vmax.f32 %v980_v39, 0.0 }
 0x136   : > { %v1173_v45 = vmax.f32 %v725_v41, 0.0  ;;  %v1675_v46 = vpop.f32.mrb[12].mxu0  ;;  %v1223_v47 = vmax.f32 %v975_v42, 0.0  ;;  %v1750_v48 = vpop.f32.mrb[12].mxu1 }
 0x137   : > { %1273 = vst.msk [vmem:[%s2242_s25 + $0x58] sm:$0xff] %vm1261_vm4, %v1174_v43  ;;  %1323 = vst.msk [vmem:[%s2242_s25 + $0x1e8] sm:$0xff] %vm1261_vm4, %v1224_v44  ;;  %v740_v49 = vadd.f32 %v1675_v46, %v2233_v37  ;;  %v734_v50 = vpop.f32.mrb[13].mxu0  ;;  %v990_v51 = vadd.f32 %v1750_v48, %v2233_v37  ;;  %v984_v52 = vpop.f32.mrb[13].mxu1 }
 0x138   : > { %1272 = vst.msk [vmem:[%s2242_s25 + $0x50] sm:$0xff] %vm1261_vm4, %v1173_v45  ;;  %1322 = vst.msk [vmem:[%s2242_s25 + $0x1e0] sm:$0xff] %vm1261_vm4, %v1223_v47  ;;  %v735_v53 = vadd.f32 %v2233_v37, %v734_v50  ;;  %v985_v54 = vadd.f32 %v2233_v37, %v984_v52 }
 0x139   : > { %v1176_v55 = vmax.f32 %v740_v49, 0.0  ;;  %v1226_v56 = vmax.f32 %v990_v51, 0.0 }
 0x13a   : > { %v1175_v57 = vmax.f32 %v735_v53, 0.0  ;;  %v1678_v58 = vpop.f32.mrb[14].mxu0  ;;  %v1225_v59 = vmax.f32 %v985_v54, 0.0  ;;  %v1753_v60 = vpop.f32.mrb[14].mxu1 }
 0x13b   : > { %1275 = vst.msk [vmem:[%s2242_s25 + $0x68] sm:$0xff] %vm1261_vm4, %v1176_v55  ;;  %1325 = vst.msk [vmem:[%s2242_s25 + $0x1f8] sm:$0xff] %vm1261_vm4, %v1226_v56  ;;  %v750_v61 = vadd.f32 %v1678_v58, %v2233_v37  ;;  %v744_v62 = vpop.f32.mrb[15].mxu0  ;;  %v1000_v63 = vadd.f32 %v1753_v60, %v2233_v37  ;;  %v994_v0 = vpop.f32.mrb[15].mxu1 }
 0x13c   : > { %1274 = vst.msk [vmem:[%s2242_s25 + $0x60] sm:$0xff] %vm1261_vm4, %v1175_v57  ;;  %1324 = vst.msk [vmem:[%s2242_s25 + $0x1f0] sm:$0xff] %vm1261_vm4, %v1225_v59  ;;  %v745_v1 = vadd.f32 %v2233_v37, %v744_v62  ;;  %v995_v2 = vadd.f32 %v2233_v37, %v994_v0 }
 0x13d   : > { %v1178_v3 = vmax.f32 %v750_v61, 0.0  ;;  %v1228_v4 = vmax.f32 %v1000_v63, 0.0 }
 0x13e   : > { %v1177_v5 = vmax.f32 %v745_v1, 0.0  ;;  %v1681_v6 = vpop.f32.mrb[16].mxu0  ;;  %v1227_v7 = vmax.f32 %v995_v2, 0.0  ;;  %v1756_v8 = vpop.f32.mrb[16].mxu1 }
 0x13f   : > { %1277 = vst.msk [vmem:[%s2242_s25 + $0x78] sm:$0xff] %vm1261_vm4, %v1178_v3  ;;  %1327 = vst.msk [vmem:[%s2242_s25 + $0x208] sm:$0xff] %vm1261_vm4, %v1228_v4  ;;  %v760_v9 = vadd.f32 %v1681_v6, %v2233_v37  ;;  %v754_v10 = vpop.f32.mrb[17].mxu0  ;;  %v1010_v11 = vadd.f32 %v1756_v8, %v2233_v37  ;;  %v1004_v12 = vpop.f32.mrb[17].mxu1 }
 0x140   : > { %1276 = vst.msk [vmem:[%s2242_s25 + $0x70] sm:$0xff] %vm1261_vm4, %v1177_v5  ;;  %1326 = vst.msk [vmem:[%s2242_s25 + $0x200] sm:$0xff] %vm1261_vm4, %v1227_v7  ;;  %v755_v13 = vadd.f32 %v2233_v37, %v754_v10  ;;  %v1005_v14 = vadd.f32 %v2233_v37, %v1004_v12 }
 0x141   : > { %v1180_v15 = vmax.f32 %v760_v9, 0.0  ;;  %v1230_v16 = vmax.f32 %v1010_v11, 0.0 }
 0x142   : > { %v1179_v17 = vmax.f32 %v755_v13, 0.0  ;;  %v1684_v18 = vpop.f32.mrb[18].mxu0  ;;  %v1229_v19 = vmax.f32 %v1005_v14, 0.0  ;;  %v1759_v20 = vpop.f32.mrb[18].mxu1 }
 0x143   : > { %1279 = vst.msk [vmem:[%s2242_s25 + $0x88] sm:$0xff] %vm1261_vm4, %v1180_v15  ;;  %1329 = vst.msk [vmem:[%s2242_s25 + $0x218] sm:$0xff] %vm1261_vm4, %v1230_v16  ;;  %v770_v21 = vadd.f32 %v1684_v18, %v2233_v37  ;;  %v764_v22 = vpop.f32.mrb[19].mxu0  ;;  %v1020_v23 = vadd.f32 %v1759_v20, %v2233_v37  ;;  %v1014_v24 = vpop.f32.mrb[19].mxu1 }
 0x144   : > { %1278 = vst.msk [vmem:[%s2242_s25 + $0x80] sm:$0xff] %vm1261_vm4, %v1179_v17  ;;  %1328 = vst.msk [vmem:[%s2242_s25 + $0x210] sm:$0xff] %vm1261_vm4, %v1229_v19  ;;  %v765_v25 = vadd.f32 %v2233_v37, %v764_v22  ;;  %v1015_v26 = vadd.f32 %v2233_v37, %v1014_v24 }
 0x145   : > { %v1182_v27 = vmax.f32 %v770_v21, 0.0  ;;  %v1232_v28 = vmax.f32 %v1020_v23, 0.0 }
 0x146   : > { %v1181_v29 = vmax.f32 %v765_v25, 0.0  ;;  %v1687_v30 = vpop.f32.mrb[20].mxu0  ;;  %v1231_v31 = vmax.f32 %v1015_v26, 0.0  ;;  %v1762_v32 = vpop.f32.mrb[20].mxu1 }
 0x147   : > { %1281 = vst.msk [vmem:[%s2242_s25 + $0x98] sm:$0xff] %vm1261_vm4, %v1182_v27  ;;  %1331 = vst.msk [vmem:[%s2242_s25 + $0x228] sm:$0xff] %vm1261_vm4, %v1232_v28  ;;  %v780_v33 = vadd.f32 %v1687_v30, %v2233_v37  ;;  %v774_v34 = vpop.f32.mrb[21].mxu0  ;;  %v1030_v35 = vadd.f32 %v1762_v32, %v2233_v37  ;;  %v1024_v36 = vpop.f32.mrb[21].mxu1 }
 0x148   : > { %1280 = vst.msk [vmem:[%s2242_s25 + $0x90] sm:$0xff] %vm1261_vm4, %v1181_v29  ;;  %1330 = vst.msk [vmem:[%s2242_s25 + $0x220] sm:$0xff] %vm1261_vm4, %v1231_v31  ;;  %v775_v38 = vadd.f32 %v2233_v37, %v774_v34  ;;  %v1025_v39 = vadd.f32 %v2233_v37, %v1024_v36 }
 0x149   : > { %v1184_v40 = vmax.f32 %v780_v33, 0.0  ;;  %v1234_v41 = vmax.f32 %v1030_v35, 0.0 }
 0x14a   : > { %v1183_v42 = vmax.f32 %v775_v38, 0.0  ;;  %v1690_v43 = vpop.f32.mrb[22].mxu0  ;;  %v1233_v44 = vmax.f32 %v1025_v39, 0.0  ;;  %v1765_v45 = vpop.f32.mrb[22].mxu1 }
 0x14b   : > { %1283 = vst.msk [vmem:[%s2242_s25 + $0xa8] sm:$0xff] %vm1261_vm4, %v1184_v40  ;;  %1333 = vst.msk [vmem:[%s2242_s25 + $0x238] sm:$0xff] %vm1261_vm4, %v1234_v41  ;;  %v790_v46 = vadd.f32 %v1690_v43, %v2233_v37  ;;  %v784_v47 = vpop.f32.mrb[23].mxu0  ;;  %v1040_v48 = vadd.f32 %v1765_v45, %v2233_v37  ;;  %v1034_v49 = vpop.f32.mrb[23].mxu1 }
 0x14c   : > { %1282 = vst.msk [vmem:[%s2242_s25 + $0xa0] sm:$0xff] %vm1261_vm4, %v1183_v42  ;;  %1332 = vst.msk [vmem:[%s2242_s25 + $0x230] sm:$0xff] %vm1261_vm4, %v1233_v44  ;;  %v785_v50 = vadd.f32 %v2233_v37, %v784_v47  ;;  %v1035_v51 = vadd.f32 %v2233_v37, %v1034_v49 }
 0x14d   : > { %v1186_v52 = vmax.f32 %v790_v46, 0.0  ;;  %v1236_v53 = vmax.f32 %v1040_v48, 0.0 }
 0x14e   : > { %v1185_v54 = vmax.f32 %v785_v50, 0.0  ;;  %v1693_v55 = vpop.f32.mrb[24].mxu0  ;;  %v1235_v56 = vmax.f32 %v1035_v51, 0.0  ;;  %v1768_v57 = vpop.f32.mrb[24].mxu1 }
 0x14f   : > { %1285 = vst.msk [vmem:[%s2242_s25 + $0xb8] sm:$0xff] %vm1261_vm4, %v1186_v52  ;;  %1335 = vst.msk [vmem:[%s2242_s25 + $0x248] sm:$0xff] %vm1261_vm4, %v1236_v53  ;;  %v800_v58 = vadd.f32 %v1693_v55, %v2233_v37  ;;  %v794_v59 = vpop.f32.mrb[25].mxu0  ;;  %v1050_v60 = vadd.f32 %v1768_v57, %v2233_v37  ;;  %v1044_v61 = vpop.f32.mrb[25].mxu1 }
 0x150   : > { %1284 = vst.msk [vmem:[%s2242_s25 + $0xb0] sm:$0xff] %vm1261_vm4, %v1185_v54  ;;  %1334 = vst.msk [vmem:[%s2242_s25 + $0x240] sm:$0xff] %vm1261_vm4, %v1235_v56  ;;  %v795_v62 = vadd.f32 %v2233_v37, %v794_v59  ;;  %v1045_v63 = vadd.f32 %v2233_v37, %v1044_v61 }
 0x151   : > { %v1188_v0 = vmax.f32 %v800_v58, 0.0  ;;  %v1238_v1 = vmax.f32 %v1050_v60, 0.0 }
 0x152   : > { %v1187_v2 = vmax.f32 %v795_v62, 0.0  ;;  %v1696_v3 = vpop.f32.mrb[26].mxu0  ;;  %v1237_v4 = vmax.f32 %v1045_v63, 0.0  ;;  %v1771_v5 = vpop.f32.mrb[26].mxu1 }
 0x153   : > { %1287 = vst.msk [vmem:[%s2242_s25 + $0xc8] sm:$0xff] %vm1261_vm4, %v1188_v0  ;;  %1337 = vst.msk [vmem:[%s2242_s25 + $0x258] sm:$0xff] %vm1261_vm4, %v1238_v1  ;;  %v810_v6 = vadd.f32 %v1696_v3, %v2233_v37  ;;  %v804_v7 = vpop.f32.mrb[27].mxu0  ;;  %v1060_v8 = vadd.f32 %v1771_v5, %v2233_v37  ;;  %v1054_v9 = vpop.f32.mrb[27].mxu1 }
 0x154   : > { %1286 = vst.msk [vmem:[%s2242_s25 + $0xc0] sm:$0xff] %vm1261_vm4, %v1187_v2  ;;  %1336 = vst.msk [vmem:[%s2242_s25 + $0x250] sm:$0xff] %vm1261_vm4, %v1237_v4  ;;  %v805_v10 = vadd.f32 %v2233_v37, %v804_v7  ;;  %v1055_v11 = vadd.f32 %v2233_v37, %v1054_v9 }
 0x155   : > { %v1190_v12 = vmax.f32 %v810_v6, 0.0  ;;  %v1240_v13 = vmax.f32 %v1060_v8, 0.0 }
 0x156   : > { %v1189_v14 = vmax.f32 %v805_v10, 0.0  ;;  %v1699_v15 = vpop.f32.mrb[28].mxu0  ;;  %v1239_v16 = vmax.f32 %v1055_v11, 0.0  ;;  %v1774_v17 = vpop.f32.mrb[28].mxu1 }
 0x157   : > { %1289 = vst.msk [vmem:[%s2242_s25 + $0xd8] sm:$0xff] %vm1261_vm4, %v1190_v12  ;;  %1339 = vst.msk [vmem:[%s2242_s25 + $0x268] sm:$0xff] %vm1261_vm4, %v1240_v13  ;;  %v820_v18 = vadd.f32 %v1699_v15, %v2233_v37  ;;  %v814_v19 = vpop.f32.mrb[29].mxu0  ;;  %v1070_v20 = vadd.f32 %v1774_v17, %v2233_v37  ;;  %v1064_v21 = vpop.f32.mrb[29].mxu1 }
 0x158   : > { %1288 = vst.msk [vmem:[%s2242_s25 + $0xd0] sm:$0xff] %vm1261_vm4, %v1189_v14  ;;  %1338 = vst.msk [vmem:[%s2242_s25 + $0x260] sm:$0xff] %vm1261_vm4, %v1239_v16  ;;  %v815_v22 = vadd.f32 %v2233_v37, %v814_v19  ;;  %v1065_v23 = vadd.f32 %v2233_v37, %v1064_v21 }
 0x159   : > { %v1192_v24 = vmax.f32 %v820_v18, 0.0  ;;  %v1242_v25 = vmax.f32 %v1070_v20, 0.0 }
 0x15a   : > { %v1191_v26 = vmax.f32 %v815_v22, 0.0  ;;  %v1702_v27 = vpop.f32.mrb[30].mxu0  ;;  %v1241_v28 = vmax.f32 %v1065_v23, 0.0  ;;  %v1777_v29 = vpop.f32.mrb[30].mxu1 }
 0x15b   : > { %1291 = vst.msk [vmem:[%s2242_s25 + $0xe8] sm:$0xff] %vm1261_vm4, %v1192_v24  ;;  %1341 = vst.msk [vmem:[%s2242_s25 + $0x278] sm:$0xff] %vm1261_vm4, %v1242_v25  ;;  %v830_v30 = vadd.f32 %v1702_v27, %v2233_v37  ;;  %v824_v31 = vpop.f32.mrb[31].mxu0  ;;  %v1080_v32 = vadd.f32 %v1777_v29, %v2233_v37  ;;  %v1074_v33 = vpop.f32.mrb[31].mxu1 }
 0x15c   : > { %1290 = vst.msk [vmem:[%s2242_s25 + $0xe0] sm:$0xff] %vm1261_vm4, %v1191_v26  ;;  %1340 = vst.msk [vmem:[%s2242_s25 + $0x270] sm:$0xff] %vm1261_vm4, %v1241_v28  ;;  %v825_v34 = vadd.f32 %v2233_v37, %v824_v31  ;;  %v1075_v35 = vadd.f32 %v2233_v37, %v1074_v33 }
 0x15d   : > { %v1194_v36 = vmax.f32 %v830_v30, 0.0  ;;  %v1244_v38 = vmax.f32 %v1080_v32, 0.0 }
 0x15e   : > { %v1193_v39 = vmax.f32 %v825_v34, 0.0  ;;  %v1705_v40 = vpop.f32.mrb[32].mxu0  ;;  %v1243_v41 = vmax.f32 %v1075_v35, 0.0  ;;  %v1780_v42 = vpop.f32.mrb[32].mxu1 }
 0x15f   : > { %1293 = vst.msk [vmem:[%s2242_s25 + $0xf8] sm:$0xff] %vm1261_vm4, %v1194_v36  ;;  %1343 = vst.msk [vmem:[%s2242_s25 + $0x288] sm:$0xff] %vm1261_vm4, %v1244_v38  ;;  %v840_v43 = vadd.f32 %v1705_v40, %v2233_v37  ;;  %v834_v44 = vpop.f32.mrb[33].mxu0  ;;  %v1090_v45 = vadd.f32 %v1780_v42, %v2233_v37  ;;  %v1084_v46 = vpop.f32.mrb[33].mxu1 }
 0x160   : > { %1292 = vst.msk [vmem:[%s2242_s25 + $0xf0] sm:$0xff] %vm1261_vm4, %v1193_v39  ;;  %1342 = vst.msk [vmem:[%s2242_s25 + $0x280] sm:$0xff] %vm1261_vm4, %v1243_v41  ;;  %v835_v47 = vadd.f32 %v2233_v37, %v834_v44  ;;  %v1085_v48 = vadd.f32 %v2233_v37, %v1084_v46 }
 0x161   : > { %v1196_v49 = vmax.f32 %v840_v43, 0.0  ;;  %v1246_v50 = vmax.f32 %v1090_v45, 0.0 }
 0x162   : > { %v1195_v51 = vmax.f32 %v835_v47, 0.0  ;;  %v1708_v52 = vpop.f32.mrb[34].mxu0  ;;  %v1245_v53 = vmax.f32 %v1085_v48, 0.0  ;;  %v1783_v54 = vpop.f32.mrb[34].mxu1 }
 0x163   : > { %1295 = vst.msk [vmem:[%s2242_s25 + $0x108] sm:$0xff] %vm1261_vm4, %v1196_v49  ;;  %1345 = vst.msk [vmem:[%s2242_s25 + $0x298] sm:$0xff] %vm1261_vm4, %v1246_v50  ;;  %v850_v55 = vadd.f32 %v1708_v52, %v2233_v37  ;;  %v844_v56 = vpop.f32.mrb[35].mxu0  ;;  %v1100_v57 = vadd.f32 %v1783_v54, %v2233_v37  ;;  %v1094_v58 = vpop.f32.mrb[35].mxu1 }
 0x164   : > { %1294 = vst.msk [vmem:[%s2242_s25 + $0x100] sm:$0xff] %vm1261_vm4, %v1195_v51  ;;  %1344 = vst.msk [vmem:[%s2242_s25 + $0x290] sm:$0xff] %vm1261_vm4, %v1245_v53  ;;  %v845_v59 = vadd.f32 %v2233_v37, %v844_v56  ;;  %v1095_v60 = vadd.f32 %v2233_v37, %v1094_v58 }
 0x165   : > { %v1198_v61 = vmax.f32 %v850_v55, 0.0  ;;  %v1248_v62 = vmax.f32 %v1100_v57, 0.0 }
 0x166   : > { %v1197_v63 = vmax.f32 %v845_v59, 0.0  ;;  %v1711_v0 = vpop.f32.mrb[36].mxu0  ;;  %v1247_v1 = vmax.f32 %v1095_v60, 0.0  ;;  %v1786_v2 = vpop.f32.mrb[36].mxu1 }
 0x167   : > { %1297 = vst.msk [vmem:[%s2242_s25 + $0x118] sm:$0xff] %vm1261_vm4, %v1198_v61  ;;  %1347 = vst.msk [vmem:[%s2242_s25 + $0x2a8] sm:$0xff] %vm1261_vm4, %v1248_v62  ;;  %v860_v3 = vadd.f32 %v1711_v0, %v2233_v37  ;;  %v854_v4 = vpop.f32.mrb[37].mxu0  ;;  %v1110_v5 = vadd.f32 %v1786_v2, %v2233_v37  ;;  %v1104_v6 = vpop.f32.mrb[37].mxu1 }
 0x168   : > { %1296 = vst.msk [vmem:[%s2242_s25 + $0x110] sm:$0xff] %vm1261_vm4, %v1197_v63  ;;  %1346 = vst.msk [vmem:[%s2242_s25 + $0x2a0] sm:$0xff] %vm1261_vm4, %v1247_v1  ;;  %v855_v7 = vadd.f32 %v2233_v37, %v854_v4  ;;  %v1105_v8 = vadd.f32 %v2233_v37, %v1104_v6 }
 0x169   : > { %v1200_v9 = vmax.f32 %v860_v3, 0.0  ;;  %v1250_v10 = vmax.f32 %v1110_v5, 0.0 }
 0x16a   : > { %v1199_v11 = vmax.f32 %v855_v7, 0.0  ;;  %v1714_v12 = vpop.f32.mrb[38].mxu0  ;;  %v1249_v13 = vmax.f32 %v1105_v8, 0.0  ;;  %v1789_v14 = vpop.f32.mrb[38].mxu1 }
 0x16b   : > { %1299 = vst.msk [vmem:[%s2242_s25 + $0x128] sm:$0xff] %vm1261_vm4, %v1200_v9  ;;  %1349 = vst.msk [vmem:[%s2242_s25 + $0x2b8] sm:$0xff] %vm1261_vm4, %v1250_v10  ;;  %v870_v15 = vadd.f32 %v1714_v12, %v2233_v37  ;;  %v864_v16 = vpop.f32.mrb[39].mxu0  ;;  %v1120_v17 = vadd.f32 %v1789_v14, %v2233_v37  ;;  %v1114_v18 = vpop.f32.mrb[39].mxu1 }
 0x16c   : > { %1298 = vst.msk [vmem:[%s2242_s25 + $0x120] sm:$0xff] %vm1261_vm4, %v1199_v11  ;;  %1348 = vst.msk [vmem:[%s2242_s25 + $0x2b0] sm:$0xff] %vm1261_vm4, %v1249_v13  ;;  %v865_v19 = vadd.f32 %v2233_v37, %v864_v16  ;;  %v1115_v20 = vadd.f32 %v2233_v37, %v1114_v18 }
 0x16d   : > { %v1202_v21 = vmax.f32 %v870_v15, 0.0  ;;  %v1252_v22 = vmax.f32 %v1120_v17, 0.0 }
 0x16e   : > { %v1201_v23 = vmax.f32 %v865_v19, 0.0  ;;  %v1717_v24 = vpop.f32.mrb[40].mxu0  ;;  %v1251_v25 = vmax.f32 %v1115_v20, 0.0  ;;  %v1792_v26 = vpop.f32.mrb[40].mxu1 }
 0x16f   : > { %1301 = vst.msk [vmem:[%s2242_s25 + $0x138] sm:$0xff] %vm1261_vm4, %v1202_v21  ;;  %1351 = vst.msk [vmem:[%s2242_s25 + $0x2c8] sm:$0xff] %vm1261_vm4, %v1252_v22  ;;  %v880_v27 = vadd.f32 %v1717_v24, %v2233_v37  ;;  %v874_v28 = vpop.f32.mrb[41].mxu0  ;;  %v1130_v29 = vadd.f32 %v1792_v26, %v2233_v37  ;;  %v1124_v30 = vpop.f32.mrb[41].mxu1 }
 0x170   : > { %1300 = vst.msk [vmem:[%s2242_s25 + $0x130] sm:$0xff] %vm1261_vm4, %v1201_v23  ;;  %1350 = vst.msk [vmem:[%s2242_s25 + $0x2c0] sm:$0xff] %vm1261_vm4, %v1251_v25  ;;  %v875_v31 = vadd.f32 %v2233_v37, %v874_v28  ;;  %v1125_v32 = vadd.f32 %v2233_v37, %v1124_v30 }
 0x171   : > { %v1204_v33 = vmax.f32 %v880_v27, 0.0  ;;  %v1254_v34 = vmax.f32 %v1130_v29, 0.0 }
 0x172   : > { %v1203_v35 = vmax.f32 %v875_v31, 0.0  ;;  %v1720_v36 = vpop.f32.mrb[42].mxu0  ;;  %v1253_v38 = vmax.f32 %v1125_v32, 0.0  ;;  %v1795_v39 = vpop.f32.mrb[42].mxu1 }
 0x173   : > { %1303 = vst.msk [vmem:[%s2242_s25 + $0x148] sm:$0xff] %vm1261_vm4, %v1204_v33  ;;  %1353 = vst.msk [vmem:[%s2242_s25 + $0x2d8] sm:$0xff] %vm1261_vm4, %v1254_v34  ;;  %v890_v40 = vadd.f32 %v1720_v36, %v2233_v37  ;;  %v884_v41 = vpop.f32.mrb[43].mxu0  ;;  %v1140_v42 = vadd.f32 %v1795_v39, %v2233_v37  ;;  %v1134_v43 = vpop.f32.mrb[43].mxu1 }
 0x174   : > { %1302 = vst.msk [vmem:[%s2242_s25 + $0x140] sm:$0xff] %vm1261_vm4, %v1203_v35  ;;  %1352 = vst.msk [vmem:[%s2242_s25 + $0x2d0] sm:$0xff] %vm1261_vm4, %v1253_v38  ;;  %v885_v44 = vadd.f32 %v2233_v37, %v884_v41  ;;  %v1135_v45 = vadd.f32 %v2233_v37, %v1134_v43 }
 0x175   : > { %v1206_v46 = vmax.f32 %v890_v40, 0.0  ;;  %v1256_v47 = vmax.f32 %v1140_v42, 0.0 }
 0x176   : > { %v1205_v48 = vmax.f32 %v885_v44, 0.0  ;;  %v1723_v49 = vpop.f32.mrb[44].mxu0  ;;  %v1255_v50 = vmax.f32 %v1135_v45, 0.0  ;;  %v1798_v51 = vpop.f32.mrb[44].mxu1 }
 0x177   : > { %1305 = vst.msk [vmem:[%s2242_s25 + $0x158] sm:$0xff] %vm1261_vm4, %v1206_v46  ;;  %1355 = vst.msk [vmem:[%s2242_s25 + $0x2e8] sm:$0xff] %vm1261_vm4, %v1256_v47  ;;  %v900_v52 = vadd.f32 %v1723_v49, %v2233_v37  ;;  %v894_v53 = vpop.f32.mrb[45].mxu0  ;;  %v1150_v54 = vadd.f32 %v1798_v51, %v2233_v37  ;;  %v1144_v55 = vpop.f32.mrb[45].mxu1 }
 0x178   : > { %1304 = vst.msk [vmem:[%s2242_s25 + $0x150] sm:$0xff] %vm1261_vm4, %v1205_v48  ;;  %1354 = vst.msk [vmem:[%s2242_s25 + $0x2e0] sm:$0xff] %vm1261_vm4, %v1255_v50  ;;  %v895_v56 = vadd.f32 %v2233_v37, %v894_v53  ;;  %v1145_v57 = vadd.f32 %v2233_v37, %v1144_v55 }
 0x179   : > { %v1208_v58 = vmax.f32 %v900_v52, 0.0  ;;  %v1258_v59 = vmax.f32 %v1150_v54, 0.0 }
 0x17a   : > { %v1207_v60 = vmax.f32 %v895_v56, 0.0  ;;  %v1726_v61 = vpop.f32.mrb[46].mxu0  ;;  %v1257_v62 = vmax.f32 %v1145_v57, 0.0  ;;  %v1801_v63 = vpop.f32.mrb[46].mxu1 }
 0x17b   : > { %1307 = vst.msk [vmem:[%s2242_s25 + $0x168] sm:$0xff] %vm1261_vm4, %v1208_v58  ;;  %1357 = vst.msk [vmem:[%s2242_s25 + $0x2f8] sm:$0xff] %vm1261_vm4, %v1258_v59  ;;  %v910_v0 = vadd.f32 %v1726_v61, %v2233_v37  ;;  %v904_v1 = vpop.f32.mrb[47].mxu0  ;;  %v1160_v2 = vadd.f32 %v1801_v63, %v2233_v37  ;;  %v1154_v3 = vpop.f32.mrb[47].mxu1 }
 0x17c   : > { %1306 = vst.msk [vmem:[%s2242_s25 + $0x160] sm:$0xff] %vm1261_vm4, %v1207_v60  ;;  %1356 = vst.msk [vmem:[%s2242_s25 + $0x2f0] sm:$0xff] %vm1261_vm4, %v1257_v62  ;;  %v905_v4 = vadd.f32 %v2233_v37, %v904_v1  ;;  %v1155_v5 = vadd.f32 %v2233_v37, %v1154_v3 }
 0x17d   : > { %v1210_v6 = vmax.f32 %v910_v0, 0.0  ;;  %v1260_v7 = vmax.f32 %v1160_v2, 0.0 }
 0x17e   : > { %v1209_v8 = vmax.f32 %v905_v4, 0.0  ;;  %v1729_v9 = vpop.f32.mrb[48].mxu0  ;;  %v1259_v10 = vmax.f32 %v1155_v5, 0.0 }
 0x17f   : > { %1309 = vst.msk [vmem:[%s2242_s25 + $0x178] sm:$0xff] %vm1261_vm4, %v1210_v6  ;;  %1359 = vst.msk [vmem:[%s2242_s25 + $0x308] sm:$0xff] %vm1261_vm4, %v1260_v7  ;;  %v920_v11 = vadd.f32 %v1729_v9, %v2233_v37  ;;  %v914_v12 = vpop.f32.mrb[49].mxu0 }
 0x180   : > { %1308 = vst.msk [vmem:[%s2242_s25 + $0x170] sm:$0xff] %vm1261_vm4, %v1209_v8  ;;  %1358 = vst.msk [vmem:[%s2242_s25 + $0x300] sm:$0xff] %vm1261_vm4, %v1259_v10  ;;  %v915_v13 = vadd.f32 %v2233_v37, %v914_v12 }
 0x181   : > { %v1212_v14 = vmax.f32 %v920_v11, 0.0 }
 0x182   : > { %v1211_v15 = vmax.f32 %v915_v13, 0.0 }
 0x183   : > { %1311 = vst.msk [vmem:[%s2242_s25 + $0x188] sm:$0xff] %vm1261_vm4, %v1212_v14 }
 0x184   : > { %1310 = vst.msk [vmem:[%s2242_s25 + $0x180] sm:$0xff] %vm1261_vm4, %v1211_v15 }
 0x185 PF: > { %s15_s12 = sadd.s32 1, %s1912_s12  }
 0x186   : > { %p12_p5 = scmp.ge.s32.totalorder %s15_s12, 4  }
 0x188   :  { %14 = sbr.rel (!%p12_p5) target bundleno = 2 (0x2), region = 71 }
 0x18f   :  { %1382 = vsyncpa [#allocation3], 1 }
 0x190   :  { %1384 = vsyncpa [#allocation3 + $0x1], 1 }
 0x191   :  { %1385 = vsyncpa [#allocation5], 1 }

// kernel: simple_cnn_forward.4
= control target key start
LH: loop header
LB: loop body
LE: loop exit
PB: predicated region body
PF: predicated region fallthrough
CT: control target
= control target key end

     0   :  { %s2665_s12 = smov 0   ;;  %s3748_s0 = inlined_call_operand.vmem [shape: f32[1568,288], index: 0, kind: input, shape index: {}]   ;;  %s3749_s1 = inlined_call_operand.vmem [shape: f32[288,64], index: 1, kind: input, shape index: {}]   ;;  %s3750_s2 = inlined_call_operand.vmem [shape: f32[1,64], index: 2, kind: input, shape index: {}]   ;;  %s3751_s3 = inlined_call_operand.vmem [shape: f32[1568,64], index: 3, kind: output, shape index: {}]  }
   0x1 LB: > { %s2172_s13 = sadd.s32 4294967295, %s2642_s12   ;;  %p2176_p0 = scmp.ge.s32.totalorder %s2642_s12, 1  ;;  %s2642_s12 = sphi %s2665_s12, %s13_s12  }
   0x2   : > { %p139_p1 = scmp.lt.s32.totalorder %s2642_s12, 3 }
   0x4   : > { %p140_p2 = pnand %p2176_p0, %p139_p1 }
   0x5   : > { %v471_v0 = vld [vmem:[%s3749_s1] sm:$0xff] (!%p140_p2)  ;;  %v472_v1 = vld [vmem:[%s3749_s1 + $0x8] sm:$0xff] (!%p140_p2)  ;;  %v473_v2 = vld [vmem:[%s3749_s1 + $0x10] sm:$0xff] (!%p140_p2)  ;;  %s164_s20 = smul.u32 (!%p140_p2), 98, %s2172_s13  ;;  %v2644_v3 = vmov (!%p140_p2), 0.0|0.0   ;;  %vm514_vm0 = vcmask (!%p140_p2), 261120  }
   0x6   : > { %143 = sbr.rel (%p140_p2) target bundleno = 582 (0x246), region = 32  ;;  %2537 = vmatprep.subr.bf16.mxu0 (!%p140_p2), %v2644_v3  ;;  %2593 = vmatprep.subr.bf16.mxu1 (!%p140_p2), %v2644_v3  ;;  %v2538_v4 = vpack.c.bf16 (!%p140_p2), %v472_v1, %v471_v0  ;;  %v474_v5 = vld [vmem:[%s3749_s1 + $0x18] sm:$0xff] (!%p140_p2)  ;;  %v475_v7 = vld [vmem:[%s3749_s1 + $0x20] sm:$0xff] (!%p140_p2)  ;;  %v476_v8 = vld [vmem:[%s3749_s1 + $0x28] sm:$0xff] (!%p140_p2)  ;;  %vm2017_vm1 = vcmask (!%p140_p2), 523264  }
   0x7   : > { %p165_p3 = scmp.lt.s32.totalorder (!%p140_p2), %s164_s20, 195  ;;  %v2541_v6 = vpack.c.bf16 (!%p140_p2), %v474_v5, %v473_v2  ;;  %v2544_v9 = vpack.c.bf16 (!%p140_p2), %v476_v8, %v475_v7  ;;  %v477_v10 = vld [vmem:[%s3749_s1 + $0x30] sm:$0xff] (!%p140_p2)  ;;  %v478_v11 = vld [vmem:[%s3749_s1 + $0x38] sm:$0xff] (!%p140_p2)  ;;  %v479_v15 = vld [vmem:[%s3749_s1 + $0x40] sm:$0xff] (!%p140_p2) }
   0x8   : > { %2539 = vmatpush1.bf16.msra.mxu0 (!%p140_p2), %v2538_v4  ;;  %2609 = vmatpush1.bf16.msra.mxu1 (!%p140_p2), %v2538_v4  ;;  %v2547_v13 = vpack.c.bf16 (!%p140_p2), %v478_v11, %v477_v10  ;;  %v480_v16 = vld [vmem:[%s3749_s1 + $0x48] sm:$0xff] (!%p140_p2)  ;;  %v481_v18 = vld [vmem:[%s3749_s1 + $0x50] sm:$0xff] (!%p140_p2)  ;;  %v482_v19 = vld [vmem:[%s3749_s1 + $0x58] sm:$0xff] (!%p140_p2) }
   0x9   : > { %2540 = vmatprep.subr.bf16.mxu0 (!%p140_p2), %v2644_v3  ;;  %2594 = vmatprep.subr.bf16.mxu1 (!%p140_p2), %v2644_v3  ;;  %v2550_v17 = vpack.c.bf16 (!%p140_p2), %v480_v16, %v479_v15  ;;  %v2553_v20 = vpack.c.bf16 (!%p140_p2), %v482_v19, %v481_v18  ;;  %v483_v21 = vld [vmem:[%s3749_s1 + $0x60] sm:$0xff] (!%p140_p2)  ;;  %v484_v22 = vld [vmem:[%s3749_s1 + $0x68] sm:$0xff] (!%p140_p2)  ;;  %v485_v24 = vld [vmem:[%s3749_s1 + $0x70] sm:$0xff] (!%p140_p2) }
   0xa   : > { %v2556_v23 = vpack.c.bf16 (!%p140_p2), %v484_v22, %v483_v21  ;;  %v486_v25 = vld [vmem:[%s3749_s1 + $0x78] sm:$0xff] (!%p140_p2)  ;;  %v487_v27 = vld [vmem:[%s3749_s1 + $0x80] sm:$0xff] (!%p140_p2)  ;;  %v488_v28 = vld [vmem:[%s3749_s1 + $0x88] sm:$0xff] (!%p140_p2) }
   0xb   : > { %v2559_v26 = vpack.c.bf16 (!%p140_p2), %v486_v25, %v485_v24  ;;  %v2562_v29 = vpack.c.bf16 (!%p140_p2), %v488_v28, %v487_v27  ;;  %v489_v30 = vld [vmem:[%s3749_s1 + $0x90] sm:$0xff] (!%p140_p2)  ;;  %v490_v31 = vld [vmem:[%s3749_s1 + $0x98] sm:$0xff] (!%p140_p2)  ;;  %v491_v33 = vld [vmem:[%s3749_s1 + $0xa0] sm:$0xff] (!%p140_p2) }
   0xc   : > { %2542 = vmatpush1.bf16.msra.mxu0 (!%p140_p2), %v2541_v6  ;;  %2610 = vmatpush1.bf16.msra.mxu1 (!%p140_p2), %v2541_v6  ;;  %v2565_v32 = vpack.c.bf16 (!%p140_p2), %v490_v31, %v489_v30  ;;  %v492_v34 = vld [vmem:[%s3749_s1 + $0xa8] sm:$0xff] (!%p140_p2)  ;;  %v493_v36 = vld [vmem:[%s3749_s1 + $0xb0] sm:$0xff] (!%p140_p2)  ;;  %v494_v37 = vld [vmem:[%s3749_s1 + $0xb8] sm:$0xff] (!%p140_p2) }
   0xd   : > { %s3753_s20 = smov (!%p165_p3, %s164_s20), 195  ;;  %2543 = vmatprep.subr.bf16.mxu0 %v2644_v3  ;;  %2595 = vmatprep.subr.bf16.mxu1 %v2644_v3  ;;  %v2568_v35 = vpack.c.bf16 %v492_v34, %v491_v33  ;;  %v2571_v38 = vpack.c.bf16 %v494_v37, %v493_v36  ;;  %v495_v39 = vld [vmem:[%s3749_s1 + $0xc0] sm:$0xff]  ;;  %v496_v40 = vld [vmem:[%s3749_s1 + $0xc8] sm:$0xff]  ;;  %v497_v42 = vld [vmem:[%s3749_s1 + $0xd0] sm:$0xff] }
   0xe   : > { %s2625_s27 = smul.u32 24, %s3753_s20  ;;  %v2574_v41 = vpack.c.bf16 %v496_v40, %v495_v39  ;;  %v498_v43 = vld [vmem:[%s3749_s1 + $0xd8] sm:$0xff]  ;;  %v499_v45 = vld [vmem:[%s3749_s1 + $0xe0] sm:$0xff]  ;;  %v500_v46 = vld [vmem:[%s3749_s1 + $0xe8] sm:$0xff]  ;;  %s2178_s18 = sshll.u32 %s3753_s20, 3 }
   0xf   : > { %v2577_v44 = vpack.c.bf16 %v498_v43, %v497_v42  ;;  %v2580_v47 = vpack.c.bf16 %v500_v46, %v499_v45  ;;  %v501_v48 = vld [vmem:[%s3749_s1 + $0xf0] sm:$0xff]  ;;  %v502_v49 = vld [vmem:[%s3749_s1 + $0xf8] sm:$0xff]  ;;  %v503_v50 = vld [vmem:[%s3749_s1 + $0x100] sm:$0xff]  ;;  %s3324_s22 = scalar_lea.vmem %s3751_s3, %s2178_s18 }
  0x10   : > { %s2709_s7 = scalar_lea.vmem %s3748_s0, %s2625_s27  ;;  %2545 = vmatpush1.bf16.msra.mxu0 %v2544_v9  ;;  %2611 = vmatpush1.bf16.msra.mxu1 %v2544_v9  ;;  %v504_v51 = vld [vmem:[%s3749_s1 + $0x108] sm:$0xff]  ;;  %v2583_v52 = vpack.c.bf16 %v502_v49, %v501_v48  ;;  %v505_v54 = vld [vmem:[%s3749_s1 + $0x110] sm:$0xff]  ;;  %v506_v55 = vld [vmem:[%s3749_s1 + $0x118] sm:$0xff] }
  0x11   : > { %v178_v12 = vld [vmem:[%s2709_s7 + $0x8] sm:$0xff]  ;;  %v400_v14 = vld [vmem:[%s2709_s7 + $0x6f8] sm:$0xff]  ;;  %2546 = vmatprep.subr.bf16.mxu0 %v2644_v3  ;;  %2596 = vmatprep.subr.bf16.mxu1 %v2644_v3  ;;  %v2585_v53 = vpack.c.bf16 %v504_v51, %v503_v50  ;;  %v177_v56 = vld [vmem:[%s2709_s7] sm:$0xff]  ;;  %v2589_v60 = vpack.c.bf16 %v506_v55, %v505_v54 }
  0x12   : > { %873 = vmatprep.mubr.f32.mxu0 %v178_v12  ;;  %1243 = vmatprep.mubr.f32.mxu1 %v400_v14  ;;  %v399_v57 = vld [vmem:[%s2709_s7 + $0x6f0] sm:$0xff]  ;;  %v181_v58 = vld [vmem:[%s2709_s7 + $0x20] sm:$0xff]  ;;  %v180_v61 = vld [vmem:[%s2709_s7 + $0x18] sm:$0xff] }
  0x13   : > { %v403_v59 = vld [vmem:[%s2709_s7 + $0x710] sm:$0xff]  ;;  %v402_v62 = vld [vmem:[%s2709_s7 + $0x708] sm:$0xff]  ;;  %v184_v63 = vld [vmem:[%s2709_s7 + $0x38] sm:$0xff] }
  0x14   : > { %2548 = vmatpush1.bf16.msra.mxu0 %v2547_v13  ;;  %2612 = vmatpush1.bf16.msra.mxu1 %v2547_v13  ;;  %v406_v0 = vld [vmem:[%s2709_s7 + $0x728] sm:$0xff]  ;;  %v183_v1 = vld [vmem:[%s2709_s7 + $0x30] sm:$0xff]  ;;  %v405_v2 = vld [vmem:[%s2709_s7 + $0x720] sm:$0xff] }
  0x15   : > { %2549 = vmatprep.subr.bf16.mxu0 %v2644_v3  ;;  %2597 = vmatprep.subr.bf16.mxu1 %v2644_v3  ;;  %v409_v4 = vld [vmem:[%s2709_s7 + $0x740] sm:$0xff]  ;;  %v186_v5 = vld [vmem:[%s2709_s7 + $0x48] sm:$0xff]  ;;  %v408_v6 = vld [vmem:[%s2709_s7 + $0x738] sm:$0xff] }
  0x16   : > { %v190_v7 = vld [vmem:[%s2709_s7 + $0x68] sm:$0xff]  ;;  %v412_v8 = vld [vmem:[%s2709_s7 + $0x758] sm:$0xff]  ;;  %v189_v9 = vld [vmem:[%s2709_s7 + $0x60] sm:$0xff] }
  0x17   : > { %v411_v10 = vld [vmem:[%s2709_s7 + $0x750] sm:$0xff]  ;;  %v193_v11 = vld [vmem:[%s2709_s7 + $0x80] sm:$0xff]  ;;  %v192_v13 = vld [vmem:[%s2709_s7 + $0x78] sm:$0xff] }
  0x18   : > { %2551 = vmatpush1.bf16.msra.mxu0 %v2550_v17  ;;  %2613 = vmatpush1.bf16.msra.mxu1 %v2550_v17  ;;  %v415_v12 = vld [vmem:[%s2709_s7 + $0x770] sm:$0xff]  ;;  %v414_v14 = vld [vmem:[%s2709_s7 + $0x768] sm:$0xff]  ;;  %v196_v15 = vld [vmem:[%s2709_s7 + $0x98] sm:$0xff] }
  0x19   : > { %2552 = vmatprep.subr.bf16.mxu0 %v2644_v3  ;;  %2598 = vmatprep.subr.bf16.mxu1 %v2644_v3  ;;  %v418_v16 = vld [vmem:[%s2709_s7 + $0x788] sm:$0xff]  ;;  %v195_v17 = vld [vmem:[%s2709_s7 + $0x90] sm:$0xff]  ;;  %v417_v18 = vld [vmem:[%s2709_s7 + $0x780] sm:$0xff] }
  0x1a   : > { %v199_v19 = vld [vmem:[%s2709_s7 + $0xb0] sm:$0xff]  ;;  %v198_v21 = vld [vmem:[%s2709_s7 + $0xa8] sm:$0xff]  ;;  %v420_v22 = vld [vmem:[%s2709_s7 + $0x798] sm:$0xff] }
  0x1b   : > { %v424_v24 = vld [vmem:[%s2709_s7 + $0x7b8] sm:$0xff]  ;;  %v201_v25 = vld [vmem:[%s2709_s7 + $0xc0] sm:$0xff]  ;;  %v427_v28 = vld [vmem:[%s2709_s7 + $0x7d0] sm:$0xff] }
  0x1c   : > { %2554 = vmatpush1.bf16.msra.mxu0 %v2553_v20  ;;  %2614 = vmatpush1.bf16.msra.mxu1 %v2553_v20  ;;  %v421_v20 = vld [vmem:[%s2709_s7 + $0x7a0] sm:$0xff]  ;;  %v426_v30 = vld [vmem:[%s2709_s7 + $0x7c8] sm:$0xff]  ;;  %v208_v31 = vld [vmem:[%s2709_s7 + $0xf8] sm:$0xff] }
  0x1d   : > { %2555 = vmatprep.subr.bf16.mxu0 %v2644_v3  ;;  %2599 = vmatprep.subr.bf16.mxu1 %v2644_v3  ;;  %v205_v27 = vld [vmem:[%s2709_s7 + $0xe0] sm:$0xff]  ;;  %v207_v33 = vld [vmem:[%s2709_s7 + $0xf0] sm:$0xff]  ;;  %v210_v37 = vld [vmem:[%s2709_s7 + $0x108] sm:$0xff] }
  0x1e   : > { %v429_v34 = vld [vmem:[%s2709_s7 + $0x7e0] sm:$0xff]  ;;  %v214_v39 = vld [vmem:[%s2709_s7 + $0x128] sm:$0xff]  ;;  %v436_v40 = vld [vmem:[%s2709_s7 + $0x818] sm:$0xff] }
  0x1f   : > { %v433_v36 = vld [vmem:[%s2709_s7 + $0x800] sm:$0xff]  ;;  %v435_v42 = vld [vmem:[%s2709_s7 + $0x810] sm:$0xff]  ;;  %v216_v45 = vld [vmem:[%s2709_s7 + $0x138] sm:$0xff] }
  0x20   : > { %2557 = vmatpush1.bf16.msra.mxu0 %v2556_v23  ;;  %2615 = vmatpush1.bf16.msra.mxu1 %v2556_v23  ;;  %v202_v23 = vld [vmem:[%s2709_s7 + $0xc8] sm:$0xff]  ;;  %v217_v43 = vld [vmem:[%s2709_s7 + $0x140] sm:$0xff]  ;;  %v219_v49 = vld [vmem:[%s2709_s7 + $0x150] sm:$0xff] }
  0x21   : > { %2558 = vmatprep.subr.bf16.mxu0 %v2644_v3  ;;  %2600 = vmatprep.subr.bf16.mxu1 %v2644_v3  ;;  %v438_v46 = vld [vmem:[%s2709_s7 + $0x828] sm:$0xff]  ;;  %v441_v50 = vld [vmem:[%s2709_s7 + $0x840] sm:$0xff]  ;;  %v223_v51 = vld [vmem:[%s2709_s7 + $0x170] sm:$0xff] }
  0x22   : > { %v442_v48 = vld [vmem:[%s2709_s7 + $0x848] sm:$0xff]  ;;  %v444_v54 = vld [vmem:[%s2709_s7 + $0x858] sm:$0xff] }
  0x23   : > { %v226_v55 = vld [vmem:[%s2709_s7 + $0x188] sm:$0xff] }
  0x24   : > { %2560 = vmatpush1.bf16.msra.mxu0 %v2559_v26  ;;  %2616 = vmatpush1.bf16.msra.mxu1 %v2559_v26  ;;  %v423_v26 = vld [vmem:[%s2709_s7 + $0x7b0] sm:$0xff] }
  0x25   : > { %2561 = vmatprep.subr.bf16.mxu0 %v2644_v3  ;;  %2601 = vmatprep.subr.bf16.mxu1 %v2644_v3 }
  0x28   : > { %2563 = vmatpush1.bf16.msra.mxu0 %v2562_v29  ;;  %2617 = vmatpush1.bf16.msra.mxu1 %v2562_v29  ;;  %v204_v29 = vld [vmem:[%s2709_s7 + $0xd8] sm:$0xff] }
  0x29   : > { %2564 = vmatprep.subr.bf16.mxu0 %v2644_v3  ;;  %2602 = vmatprep.subr.bf16.mxu1 %v2644_v3 }
  0x2c   : > { %2566 = vmatpush1.bf16.msra.mxu0 %v2565_v32  ;;  %2618 = vmatpush1.bf16.msra.mxu1 %v2565_v32  ;;  %v430_v32 = vld [vmem:[%s2709_s7 + $0x7e8] sm:$0xff] }
  0x2d   : > { %2567 = vmatprep.subr.bf16.mxu0 %v2644_v3  ;;  %2603 = vmatprep.subr.bf16.mxu1 %v2644_v3 }
  0x30   : > { %2569 = vmatpush1.bf16.msra.mxu0 %v2568_v35  ;;  %2619 = vmatpush1.bf16.msra.mxu1 %v2568_v35  ;;  %v211_v35 = vld [vmem:[%s2709_s7 + $0x110] sm:$0xff] }
  0x31   : > { %2570 = vmatprep.subr.bf16.mxu0 %v2644_v3  ;;  %2604 = vmatprep.subr.bf16.mxu1 %v2644_v3 }
  0x34   : > { %2572 = vmatpush1.bf16.msra.mxu0 %v2571_v38  ;;  %2620 = vmatpush1.bf16.msra.mxu1 %v2571_v38  ;;  %v432_v38 = vld [vmem:[%s2709_s7 + $0x7f8] sm:$0xff] }
  0x35   : > { %2573 = vmatprep.subr.bf16.mxu0 %v2644_v3  ;;  %2605 = vmatprep.subr.bf16.mxu1 %v2644_v3 }
  0x38   : > { %2575 = vmatpush1.bf16.msra.mxu0 %v2574_v41  ;;  %2621 = vmatpush1.bf16.msra.mxu1 %v2574_v41  ;;  %v213_v41 = vld [vmem:[%s2709_s7 + $0x120] sm:$0xff] }
  0x39   : > { %2576 = vmatprep.subr.bf16.mxu0 %v2644_v3  ;;  %2606 = vmatprep.subr.bf16.mxu1 %v2644_v3 }
  0x3c   : > { %2578 = vmatpush1.bf16.msra.mxu0 %v2577_v44  ;;  %2622 = vmatpush1.bf16.msra.mxu1 %v2577_v44  ;;  %v439_v44 = vld [vmem:[%s2709_s7 + $0x830] sm:$0xff] }
  0x3d   : > { %2579 = vmatprep.subr.bf16.mxu0 %v2644_v3  ;;  %2607 = vmatprep.subr.bf16.mxu1 %v2644_v3 }
  0x40   : > { %2581 = vmatpush1.bf16.msra.mxu0 %v2580_v47  ;;  %2623 = vmatpush1.bf16.msra.mxu1 %v2580_v47  ;;  %v220_v47 = vld [vmem:[%s2709_s7 + $0x158] sm:$0xff] }
  0x41   : > { %2582 = vmatprep.subr.bf16.mxu0 %v2644_v3  ;;  %2608 = vmatprep.subr.bf16.mxu1 %v2644_v3  ;;  %v187_v3 = vld [vmem:[%s2709_s7 + $0x50] sm:$0xff] }
  0x44   : > { %2584 = vmatpush1.bf16.msra.mxu0 %v2583_v52  ;;  %2624 = vmatpush1.bf16.msra.mxu1 %v2583_v52  ;;  %v445_v52 = vld [vmem:[%s2709_s7 + $0x860] sm:$0xff] }
  0x45   : > { %2586 = vmatprep.subr.bf16.mxu1 %v2585_v53 }
  0x47   : > { %874 = vmatmul.mubr.f32.vlgmr.msra.gmra.mrb[0].mxu0 %v177_v56  ;;  %1244 = vmatmul.mubr.f32.vlgmr.msra.gmra.mrb[0].mxu1 %v399_v57  ;;  %v448_v56 = vld [vmem:[%s2709_s7 + $0x878] sm:$0xff]  ;;  %v225_v57 = vld [vmem:[%s2709_s7 + $0x180] sm:$0xff] }
  0x48   : > { %878 = vmatprep.mubr.f32.mxu0 %v181_v58  ;;  %1248 = vmatprep.mubr.f32.mxu1 %v403_v59  ;;  %v447_v58 = vld [vmem:[%s2709_s7 + $0x870] sm:$0xff]  ;;  %v229_v59 = vld [vmem:[%s2709_s7 + $0x1a0] sm:$0xff] }
  0x49   : > { %2588 = vmatpush3.bf16.msra.mxu1 %v2585_v53  ;;  %v222_v53 = vld [vmem:[%s2709_s7 + $0x168] sm:$0xff] }
  0x4a   : > { %2590 = vmatprep.subr.bf16.mxu1 %v2589_v60 }
  0x4b   : > { %879 = vmatmul.mubr.f32.gmra.mrb[2].mxu0 %v180_v61  ;;  %1249 = vmatmul.mubr.f32.gmra.mrb[2].mxu1 %v402_v62  ;;  %v228_v61 = vld [vmem:[%s2709_s7 + $0x198] sm:$0xff]  ;;  %v450_v62 = vld [vmem:[%s2709_s7 + $0x888] sm:$0xff] }
  0x4c   : > { %883 = vmatprep.mubr.f32.mxu0 %v184_v63  ;;  %1253 = vmatprep.mubr.f32.mxu1 %v406_v0  ;;  %v232_v63 = vld [vmem:[%s2709_s7 + $0x1b8] sm:$0xff]  ;;  %v454_v0 = vld [vmem:[%s2709_s7 + $0x8a8] sm:$0xff] }
  0x4d   : > { %2592 = vmatpush3.bf16.msra.mxu1 %v2589_v60  ;;  %v451_v60 = vld [vmem:[%s2709_s7 + $0x890] sm:$0xff] }
  0x4f   : > { %884 = vmatmul.mubr.f32.gmra.mrb[4].mxu0 %v183_v1  ;;  %1254 = vmatmul.mubr.f32.gmra.mrb[4].mxu1 %v405_v2  ;;  %v231_v1 = vld [vmem:[%s2709_s7 + $0x1b0] sm:$0xff]  ;;  %v453_v2 = vld [vmem:[%s2709_s7 + $0x8a0] sm:$0xff] }
  0x50   : > { %888 = vmatprep.mubr.f32.mxu0 %v187_v3  ;;  %1258 = vmatprep.mubr.f32.mxu1 %v409_v4  ;;  %v235_v3 = vld [vmem:[%s2709_s7 + $0x1d0] sm:$0xff]  ;;  %v457_v4 = vld [vmem:[%s2709_s7 + $0x8c0] sm:$0xff] }
  0x53   : > { %889 = vmatmul.mubr.f32.gmra.mrb[6].mxu0 %v186_v5  ;;  %1259 = vmatmul.mubr.f32.gmra.mrb[6].mxu1 %v408_v6  ;;  %v234_v5 = vld [vmem:[%s2709_s7 + $0x1c8] sm:$0xff]  ;;  %v456_v6 = vld [vmem:[%s2709_s7 + $0x8b8] sm:$0xff] }
  0x54   : > { %893 = vmatprep.mubr.f32.mxu0 %v190_v7  ;;  %1263 = vmatprep.mubr.f32.mxu1 %v412_v8  ;;  %v238_v7 = vld [vmem:[%s2709_s7 + $0x1e8] sm:$0xff]  ;;  %v460_v8 = vld [vmem:[%s2709_s7 + $0x8d8] sm:$0xff] }
  0x57   : > { %894 = vmatmul.mubr.f32.gmra.mrb[8].mxu0 %v189_v9  ;;  %1264 = vmatmul.mubr.f32.gmra.mrb[8].mxu1 %v411_v10  ;;  %v237_v9 = vld [vmem:[%s2709_s7 + $0x1e0] sm:$0xff]  ;;  %v459_v10 = vld [vmem:[%s2709_s7 + $0x8d0] sm:$0xff] }
  0x58   : > { %898 = vmatprep.mubr.f32.mxu0 %v193_v11  ;;  %1268 = vmatprep.mubr.f32.mxu1 %v415_v12  ;;  %v241_v11 = vld [vmem:[%s2709_s7 + $0x200] sm:$0xff]  ;;  %v463_v12 = vld [vmem:[%s2709_s7 + $0x8f0] sm:$0xff] }
  0x5b   : > { %899 = vmatmul.mubr.f32.gmra.mrb[10].mxu0 %v192_v13  ;;  %1269 = vmatmul.mubr.f32.gmra.mrb[10].mxu1 %v414_v14  ;;  %v240_v13 = vld [vmem:[%s2709_s7 + $0x1f8] sm:$0xff]  ;;  %v462_v14 = vld [vmem:[%s2709_s7 + $0x8e8] sm:$0xff] }
  0x5c   : > { %903 = vmatprep.mubr.f32.mxu0 %v196_v15  ;;  %1273 = vmatprep.mubr.f32.mxu1 %v418_v16  ;;  %v244_v15 = vld [vmem:[%s2709_s7 + $0x218] sm:$0xff]  ;;  %v466_v16 = vld [vmem:[%s2709_s7 + $0x908] sm:$0xff] }
  0x5f   : > { %904 = vmatmul.mubr.f32.gmra.mrb[12].mxu0 %v195_v17  ;;  %1274 = vmatmul.mubr.f32.gmra.mrb[12].mxu1 %v417_v18  ;;  %v243_v17 = vld [vmem:[%s2709_s7 + $0x210] sm:$0xff]  ;;  %v465_v18 = vld [vmem:[%s2709_s7 + $0x900] sm:$0xff] }
  0x60   : > { %908 = vmatprep.mubr.f32.mxu0 %v199_v19  ;;  %1278 = vmatprep.mubr.f32.mxu1 %v421_v20  ;;  %v247_v19 = vld [vmem:[%s2709_s7 + $0x230] sm:$0xff]  ;;  %v469_v20 = vld [vmem:[%s2709_s7 + $0x920] sm:$0xff] }
  0x63   : > { %909 = vmatmul.mubr.f32.gmra.mrb[14].mxu0 %v198_v21  ;;  %1279 = vmatmul.mubr.f32.gmra.mrb[14].mxu1 %v420_v22  ;;  %v246_v21 = vld [vmem:[%s2709_s7 + $0x228] sm:$0xff]  ;;  %v468_v22 = vld [vmem:[%s2709_s7 + $0x918] sm:$0xff] }
  0x64   : > { %913 = vmatprep.mubr.f32.mxu0 %v202_v23  ;;  %1283 = vmatprep.mubr.f32.mxu1 %v424_v24  ;;  %v250_v23 = vld [vmem:[%s2709_s7 + $0x248] sm:$0xff]  ;;  %v179_v24 = vld [vmem:[%s2709_s7 + $0x10] sm:$0xff] }
  0x67   : > { %914 = vmatmul.mubr.f32.gmra.mrb[16].mxu0 %v201_v25  ;;  %1284 = vmatmul.mubr.f32.gmra.mrb[16].mxu1 %v423_v26  ;;  %v249_v25 = vld [vmem:[%s2709_s7 + $0x240] sm:$0xff]  ;;  %v182_v26 = vld [vmem:[%s2709_s7 + $0x28] sm:$0xff] }
  0x68   : > { %918 = vmatprep.mubr.f32.mxu0 %v205_v27  ;;  %1288 = vmatprep.mubr.f32.mxu1 %v427_v28  ;;  %v253_v27 = vld [vmem:[%s2709_s7 + $0x260] sm:$0xff] }
  0x69   : > { %v185_v28 = vld [vmem:[%s2709_s7 + $0x40] sm:$0xff] }
  0x6b   : > { %919 = vmatmul.mubr.f32.gmra.mrb[18].mxu0 %v204_v29  ;;  %1289 = vmatmul.mubr.f32.gmra.mrb[18].mxu1 %v426_v30  ;;  %v252_v29 = vld [vmem:[%s2709_s7 + $0x258] sm:$0xff] }
  0x6c   : > { %923 = vmatprep.mubr.f32.mxu0 %v208_v31  ;;  %1293 = vmatprep.mubr.f32.mxu1 %v430_v32  ;;  %v188_v30 = vld [vmem:[%s2709_s7 + $0x58] sm:$0xff]  ;;  %v191_v32 = vld [vmem:[%s2709_s7 + $0x70] sm:$0xff] }
  0x6d   : > { %v256_v31 = vld [vmem:[%s2709_s7 + $0x278] sm:$0xff] }
  0x6f   : > { %924 = vmatmul.mubr.f32.gmra.mrb[20].mxu0 %v207_v33  ;;  %1294 = vmatmul.mubr.f32.gmra.mrb[20].mxu1 %v429_v34  ;;  %v255_v33 = vld [vmem:[%s2709_s7 + $0x270] sm:$0xff]  ;;  %v194_v34 = vld [vmem:[%s2709_s7 + $0x88] sm:$0xff] }
  0x70   : > { %928 = vmatprep.mubr.f32.mxu0 %v211_v35  ;;  %1298 = vmatprep.mubr.f32.mxu1 %v433_v36  ;;  %v259_v35 = vld [vmem:[%s2709_s7 + $0x290] sm:$0xff]  ;;  %v197_v36 = vld [vmem:[%s2709_s7 + $0xa0] sm:$0xff] }
  0x73   : > { %929 = vmatmul.mubr.f32.gmra.mrb[22].mxu0 %v210_v37  ;;  %1299 = vmatmul.mubr.f32.gmra.mrb[22].mxu1 %v432_v38  ;;  %v258_v37 = vld [vmem:[%s2709_s7 + $0x288] sm:$0xff]  ;;  %v200_v38 = vld [vmem:[%s2709_s7 + $0xb8] sm:$0xff] }
  0x74   : > { %933 = vmatprep.mubr.f32.mxu0 %v214_v39  ;;  %1303 = vmatprep.mubr.f32.mxu1 %v436_v40  ;;  %v262_v39 = vld [vmem:[%s2709_s7 + $0x2a8] sm:$0xff]  ;;  %v203_v40 = vld [vmem:[%s2709_s7 + $0xd0] sm:$0xff] }
  0x77   : > { %934 = vmatmul.mubr.f32.gmra.mrb[24].mxu0 %v213_v41  ;;  %1304 = vmatmul.mubr.f32.gmra.mrb[24].mxu1 %v435_v42  ;;  %v261_v41 = vld [vmem:[%s2709_s7 + $0x2a0] sm:$0xff]  ;;  %v206_v42 = vld [vmem:[%s2709_s7 + $0xe8] sm:$0xff] }
  0x78   : > { %938 = vmatprep.mubr.f32.mxu0 %v217_v43  ;;  %1308 = vmatprep.mubr.f32.mxu1 %v439_v44  ;;  %v265_v43 = vld [vmem:[%s2709_s7 + $0x2c0] sm:$0xff] }
  0x79   : > { %v209_v44 = vld [vmem:[%s2709_s7 + $0x100] sm:$0xff] }
  0x7b   : > { %939 = vmatmul.mubr.f32.gmra.mrb[26].mxu0 %v216_v45  ;;  %1309 = vmatmul.mubr.f32.gmra.mrb[26].mxu1 %v438_v46  ;;  %v264_v45 = vld [vmem:[%s2709_s7 + $0x2b8] sm:$0xff] }
  0x7c   : > { %943 = vmatprep.mubr.f32.mxu0 %v220_v47  ;;  %1313 = vmatprep.mubr.f32.mxu1 %v442_v48  ;;  %v212_v46 = vld [vmem:[%s2709_s7 + $0x118] sm:$0xff]  ;;  %v215_v48 = vld [vmem:[%s2709_s7 + $0x130] sm:$0xff] }
  0x7d   : > { %v268_v47 = vld [vmem:[%s2709_s7 + $0x2d8] sm:$0xff] }
  0x7f   : > { %944 = vmatmul.mubr.f32.gmra.mrb[28].mxu0 %v219_v49  ;;  %1314 = vmatmul.mubr.f32.gmra.mrb[28].mxu1 %v441_v50  ;;  %v267_v49 = vld [vmem:[%s2709_s7 + $0x2d0] sm:$0xff]  ;;  %v218_v50 = vld [vmem:[%s2709_s7 + $0x148] sm:$0xff] }
  0x80   : > { %948 = vmatprep.mubr.f32.mxu0 %v223_v51  ;;  %1318 = vmatprep.mubr.f32.mxu1 %v445_v52  ;;  %v271_v51 = vld [vmem:[%s2709_s7 + $0x2f0] sm:$0xff]  ;;  %v221_v52 = vld [vmem:[%s2709_s7 + $0x160] sm:$0xff] }
  0x83   : > { %949 = vmatmul.mubr.f32.gmra.mrb[30].mxu0 %v222_v53  ;;  %1319 = vmatmul.mubr.f32.gmra.mrb[30].mxu1 %v444_v54  ;;  %v270_v53 = vld [vmem:[%s2709_s7 + $0x2e8] sm:$0xff]  ;;  %v224_v54 = vld [vmem:[%s2709_s7 + $0x178] sm:$0xff] }
  0x84   : > { %953 = vmatprep.mubr.f32.mxu0 %v226_v55  ;;  %1323 = vmatprep.mubr.f32.mxu1 %v448_v56  ;;  %v274_v55 = vld [vmem:[%s2709_s7 + $0x308] sm:$0xff]  ;;  %v227_v56 = vld [vmem:[%s2709_s7 + $0x190] sm:$0xff] }
  0x87   : > { %954 = vmatmul.mubr.f32.gmra.mrb[32].mxu0 %v225_v57  ;;  %1324 = vmatmul.mubr.f32.gmra.mrb[32].mxu1 %v447_v58  ;;  %v273_v57 = vld [vmem:[%s2709_s7 + $0x300] sm:$0xff]  ;;  %v230_v58 = vld [vmem:[%s2709_s7 + $0x1a8] sm:$0xff] }
  0x88   : > { %958 = vmatprep.mubr.f32.mxu0 %v229_v59  ;;  %1328 = vmatprep.mubr.f32.mxu1 %v451_v60  ;;  %v277_v59 = vld [vmem:[%s2709_s7 + $0x320] sm:$0xff] }
  0x89   : > { %v233_v60 = vld [vmem:[%s2709_s7 + $0x1c0] sm:$0xff] }
  0x8b   : > { %959 = vmatmul.mubr.f32.gmra.mrb[34].mxu0 %v228_v61  ;;  %1329 = vmatmul.mubr.f32.gmra.mrb[34].mxu1 %v450_v62  ;;  %v276_v61 = vld [vmem:[%s2709_s7 + $0x318] sm:$0xff] }
  0x8c   : > { %963 = vmatprep.mubr.f32.mxu0 %v232_v63  ;;  %1333 = vmatprep.mubr.f32.mxu1 %v454_v0  ;;  %v236_v62 = vld [vmem:[%s2709_s7 + $0x1d8] sm:$0xff]  ;;  %v239_v0 = vld [vmem:[%s2709_s7 + $0x1f0] sm:$0xff] }
  0x8d   : > { %v280_v63 = vld [vmem:[%s2709_s7 + $0x338] sm:$0xff] }
  0x8f   : > { %964 = vmatmul.mubr.f32.gmra.mrb[36].mxu0 %v231_v1  ;;  %1334 = vmatmul.mubr.f32.gmra.mrb[36].mxu1 %v453_v2  ;;  %v279_v1 = vld [vmem:[%s2709_s7 + $0x330] sm:$0xff]  ;;  %v242_v2 = vld [vmem:[%s2709_s7 + $0x208] sm:$0xff] }
  0x90   : > { %968 = vmatprep.mubr.f32.mxu0 %v235_v3  ;;  %1338 = vmatprep.mubr.f32.mxu1 %v457_v4  ;;  %v283_v3 = vld [vmem:[%s2709_s7 + $0x350] sm:$0xff]  ;;  %v245_v4 = vld [vmem:[%s2709_s7 + $0x220] sm:$0xff] }
  0x93   : > { %969 = vmatmul.mubr.f32.gmra.mrb[38].mxu0 %v234_v5  ;;  %1339 = vmatmul.mubr.f32.gmra.mrb[38].mxu1 %v456_v6  ;;  %v282_v5 = vld [vmem:[%s2709_s7 + $0x348] sm:$0xff]  ;;  %v248_v6 = vld [vmem:[%s2709_s7 + $0x238] sm:$0xff] }
  0x94   : > { %973 = vmatprep.mubr.f32.mxu0 %v238_v7  ;;  %1343 = vmatprep.mubr.f32.mxu1 %v460_v8  ;;  %v286_v7 = vld [vmem:[%s2709_s7 + $0x368] sm:$0xff]  ;;  %v251_v8 = vld [vmem:[%s2709_s7 + $0x250] sm:$0xff] }
  0x97   : > { %974 = vmatmul.mubr.f32.gmra.mrb[40].mxu0 %v237_v9  ;;  %1344 = vmatmul.mubr.f32.gmra.mrb[40].mxu1 %v459_v10  ;;  %v285_v9 = vld [vmem:[%s2709_s7 + $0x360] sm:$0xff]  ;;  %v254_v10 = vld [vmem:[%s2709_s7 + $0x268] sm:$0xff] }
  0x98   : > { %978 = vmatprep.mubr.f32.mxu0 %v241_v11  ;;  %1348 = vmatprep.mubr.f32.mxu1 %v463_v12  ;;  %v289_v11 = vld [vmem:[%s2709_s7 + $0x380] sm:$0xff] }
  0x99   : > { %v257_v12 = vld [vmem:[%s2709_s7 + $0x280] sm:$0xff] }
  0x9b   : > { %979 = vmatmul.mubr.f32.gmra.mrb[42].mxu0 %v240_v13  ;;  %1349 = vmatmul.mubr.f32.gmra.mrb[42].mxu1 %v462_v14  ;;  %v288_v13 = vld [vmem:[%s2709_s7 + $0x378] sm:$0xff] }
  0x9c   : > { %983 = vmatprep.mubr.f32.mxu0 %v244_v15  ;;  %1353 = vmatprep.mubr.f32.mxu1 %v466_v16  ;;  %v260_v14 = vld [vmem:[%s2709_s7 + $0x298] sm:$0xff]  ;;  %v263_v16 = vld [vmem:[%s2709_s7 + $0x2b0] sm:$0xff] }
  0x9d   : > { %v292_v15 = vld [vmem:[%s2709_s7 + $0x398] sm:$0xff] }
  0x9f   : > { %984 = vmatmul.mubr.f32.gmra.mrb[44].mxu0 %v243_v17  ;;  %1354 = vmatmul.mubr.f32.gmra.mrb[44].mxu1 %v465_v18  ;;  %v291_v17 = vld [vmem:[%s2709_s7 + $0x390] sm:$0xff]  ;;  %v266_v18 = vld [vmem:[%s2709_s7 + $0x2c8] sm:$0xff] }
  0xa0   : > { %988 = vmatprep.mubr.f32.mxu0 %v247_v19  ;;  %1358 = vmatprep.mubr.f32.mxu1 %v469_v20  ;;  %v295_v19 = vld [vmem:[%s2709_s7 + $0x3b0] sm:$0xff]  ;;  %v269_v20 = vld [vmem:[%s2709_s7 + $0x2e0] sm:$0xff] }
  0xa3   : > { %989 = vmatmul.mubr.f32.gmra.mrb[46].mxu0 %v246_v21  ;;  %1359 = vmatmul.mubr.f32.gmra.mrb[46].mxu1 %v468_v22  ;;  %v294_v21 = vld [vmem:[%s2709_s7 + $0x3a8] sm:$0xff]  ;;  %v272_v22 = vld [vmem:[%s2709_s7 + $0x2f8] sm:$0xff] }
  0xa4   : > { %993 = vmatprep.mubr.f32.mxu0 %v250_v23  ;;  %2390 = vmatprep.mubr.msk.f32.mxu1 %vm514_vm0, %v179_v24  ;;  %v298_v23 = vld [vmem:[%s2709_s7 + $0x3c8] sm:$0xff]  ;;  %v275_v24 = vld [vmem:[%s2709_s7 + $0x310] sm:$0xff] }
  0xa7   : > { %994 = vmatmul.mubr.f32.gmra.mrb[48].mxu0 %v249_v25  ;;  %2391 = vmatmul.mubr.msk.f32.vlgmr.msra.gmra.mrb[48].mxu1 %vm514_vm0, %v182_v26  ;;  %v297_v25 = vld [vmem:[%s2709_s7 + $0x3c0] sm:$0xff]  ;;  %v278_v26 = vld [vmem:[%s2709_s7 + $0x328] sm:$0xff] }
  0xa8   : > { %998 = vmatprep.mubr.f32.mxu0 %v253_v27  ;;  %2393 = vmatprep.mubr.msk.f32.mxu1 %vm514_vm0, %v185_v28  ;;  %v301_v27 = vld [vmem:[%s2709_s7 + $0x3e0] sm:$0xff] }
  0xa9   : > { %v281_v28 = vld [vmem:[%s2709_s7 + $0x340] sm:$0xff] }
  0xab   : > { %999 = vmatmul.mubr.f32.gmra.mrb[50].mxu0 %v252_v29  ;;  %2394 = vmatmul.mubr.msk.f32.gmra.mrb[50].mxu1 %vm514_vm0, %v188_v30  ;;  %v300_v29 = vld [vmem:[%s2709_s7 + $0x3d8] sm:$0xff] }
  0xac   : > { %1003 = vmatprep.mubr.f32.mxu0 %v256_v31  ;;  %2396 = vmatprep.mubr.msk.f32.mxu1 %vm514_vm0, %v191_v32  ;;  %v284_v30 = vld [vmem:[%s2709_s7 + $0x358] sm:$0xff]  ;;  %v287_v32 = vld [vmem:[%s2709_s7 + $0x370] sm:$0xff] }
  0xad   : > { %v304_v31 = vld [vmem:[%s2709_s7 + $0x3f8] sm:$0xff] }
  0xaf   : > { %1004 = vmatmul.mubr.f32.gmra.mrb[52].mxu0 %v255_v33  ;;  %2397 = vmatmul.mubr.msk.f32.gmra.mrb[52].mxu1 %vm514_vm0, %v194_v34  ;;  %v303_v33 = vld [vmem:[%s2709_s7 + $0x3f0] sm:$0xff]  ;;  %v290_v34 = vld [vmem:[%s2709_s7 + $0x388] sm:$0xff] }
  0xb0   : > { %1008 = vmatprep.mubr.f32.mxu0 %v259_v35  ;;  %2399 = vmatprep.mubr.msk.f32.mxu1 %vm514_vm0, %v197_v36  ;;  %v307_v35 = vld [vmem:[%s2709_s7 + $0x410] sm:$0xff]  ;;  %v293_v36 = vld [vmem:[%s2709_s7 + $0x3a0] sm:$0xff] }
  0xb3   : > { %1009 = vmatmul.mubr.f32.gmra.mrb[54].mxu0 %v258_v37  ;;  %2400 = vmatmul.mubr.msk.f32.gmra.mrb[54].mxu1 %vm514_vm0, %v200_v38  ;;  %v306_v37 = vld [vmem:[%s2709_s7 + $0x408] sm:$0xff]  ;;  %v296_v38 = vld [vmem:[%s2709_s7 + $0x3b8] sm:$0xff] }
  0xb4   : > { %1013 = vmatprep.mubr.f32.mxu0 %v262_v39  ;;  %2402 = vmatprep.mubr.msk.f32.mxu1 %vm514_vm0, %v203_v40  ;;  %v310_v39 = vld [vmem:[%s2709_s7 + $0x428] sm:$0xff]  ;;  %v299_v40 = vld [vmem:[%s2709_s7 + $0x3d0] sm:$0xff] }
  0xb7   : > { %1014 = vmatmul.mubr.f32.gmra.mrb[56].mxu0 %v261_v41  ;;  %2403 = vmatmul.mubr.msk.f32.gmra.mrb[56].mxu1 %vm514_vm0, %v206_v42  ;;  %v309_v41 = vld [vmem:[%s2709_s7 + $0x420] sm:$0xff]  ;;  %v302_v42 = vld [vmem:[%s2709_s7 + $0x3e8] sm:$0xff] }
  0xb8   : > { %1018 = vmatprep.mubr.f32.mxu0 %v265_v43  ;;  %2405 = vmatprep.mubr.msk.f32.mxu1 %vm514_vm0, %v209_v44  ;;  %v313_v43 = vld [vmem:[%s2709_s7 + $0x440] sm:$0xff] }
  0xb9   : > { %v305_v44 = vld [vmem:[%s2709_s7 + $0x400] sm:$0xff] }
  0xbb   : > { %1019 = vmatmul.mubr.f32.gmra.mrb[58].mxu0 %v264_v45  ;;  %2406 = vmatmul.mubr.msk.f32.gmra.mrb[58].mxu1 %vm514_vm0, %v212_v46  ;;  %v312_v45 = vld [vmem:[%s2709_s7 + $0x438] sm:$0xff] }
  0xbc   : > { %1023 = vmatprep.mubr.f32.mxu0 %v268_v47  ;;  %2408 = vmatprep.mubr.msk.f32.mxu1 %vm514_vm0, %v215_v48  ;;  %v308_v46 = vld [vmem:[%s2709_s7 + $0x418] sm:$0xff]  ;;  %v311_v48 = vld [vmem:[%s2709_s7 + $0x430] sm:$0xff] }
  0xbd   : > { %v316_v47 = vld [vmem:[%s2709_s7 + $0x458] sm:$0xff] }
  0xbf   : > { %1024 = vmatmul.mubr.f32.gmra.mrb[60].mxu0 %v267_v49  ;;  %2409 = vmatmul.mubr.msk.f32.gmra.mrb[60].mxu1 %vm514_vm0, %v218_v50  ;;  %v315_v49 = vld [vmem:[%s2709_s7 + $0x450] sm:$0xff]  ;;  %v314_v50 = vld [vmem:[%s2709_s7 + $0x448] sm:$0xff] }
  0xc0   : > { %1028 = vmatprep.mubr.f32.mxu0 %v271_v51  ;;  %2411 = vmatprep.mubr.msk.f32.mxu1 %vm514_vm0, %v221_v52  ;;  %v319_v51 = vld [vmem:[%s2709_s7 + $0x470] sm:$0xff]  ;;  %v317_v52 = vld [vmem:[%s2709_s7 + $0x460] sm:$0xff] }
  0xc3   : > { %1029 = vmatmul.mubr.f32.gmra.mrb[62].mxu0 %v270_v53  ;;  %2412 = vmatmul.mubr.msk.f32.gmra.mrb[62].mxu1 %vm514_vm0, %v224_v54  ;;  %v318_v53 = vld [vmem:[%s2709_s7 + $0x468] sm:$0xff]  ;;  %v320_v54 = vld [vmem:[%s2709_s7 + $0x478] sm:$0xff] }
  0xc4   : > { %1033 = vmatprep.mubr.f32.mxu0 %v274_v55  ;;  %2414 = vmatprep.mubr.msk.f32.mxu1 %vm514_vm0, %v227_v56  ;;  %v322_v55 = vld [vmem:[%s2709_s7 + $0x488] sm:$0xff]  ;;  %v323_v56 = vld [vmem:[%s2709_s7 + $0x490] sm:$0xff] }
  0xc7   : > { %1034 = vmatmul.mubr.f32.gmra.mrb[64].mxu0 %v273_v57  ;;  %2415 = vmatmul.mubr.msk.f32.gmra.mrb[64].mxu1 %vm514_vm0, %v230_v58  ;;  %v321_v57 = vld [vmem:[%s2709_s7 + $0x480] sm:$0xff]  ;;  %v326_v58 = vld [vmem:[%s2709_s7 + $0x4a8] sm:$0xff] }
  0xc8   : > { %1038 = vmatprep.mubr.f32.mxu0 %v277_v59  ;;  %2417 = vmatprep.mubr.msk.f32.mxu1 %vm514_vm0, %v233_v60  ;;  %v325_v59 = vld [vmem:[%s2709_s7 + $0x4a0] sm:$0xff] }
  0xc9   : > { %v329_v60 = vld [vmem:[%s2709_s7 + $0x4c0] sm:$0xff] }
  0xcb   : > { %1039 = vmatmul.mubr.f32.gmra.mrb[66].mxu0 %v276_v61  ;;  %2418 = vmatmul.mubr.msk.f32.gmra.mrb[66].mxu1 %vm514_vm0, %v236_v62  ;;  %v324_v61 = vld [vmem:[%s2709_s7 + $0x498] sm:$0xff] }
  0xcc   : > { %1043 = vmatprep.mubr.f32.mxu0 %v280_v63  ;;  %2420 = vmatprep.mubr.msk.f32.mxu1 %vm514_vm0, %v239_v0  ;;  %v332_v62 = vld [vmem:[%s2709_s7 + $0x4d8] sm:$0xff]  ;;  %v335_v0 = vld [vmem:[%s2709_s7 + $0x4f0] sm:$0xff] }
  0xcd   : > { %v328_v63 = vld [vmem:[%s2709_s7 + $0x4b8] sm:$0xff] }
  0xcf   : > { %1044 = vmatmul.mubr.f32.gmra.mrb[68].mxu0 %v279_v1  ;;  %2421 = vmatmul.mubr.msk.f32.gmra.mrb[68].mxu1 %vm514_vm0, %v242_v2  ;;  %v327_v1 = vld [vmem:[%s2709_s7 + $0x4b0] sm:$0xff]  ;;  %v338_v2 = vld [vmem:[%s2709_s7 + $0x508] sm:$0xff] }
  0xd0   : > { %1048 = vmatprep.mubr.f32.mxu0 %v283_v3  ;;  %2423 = vmatprep.mubr.msk.f32.mxu1 %vm514_vm0, %v245_v4  ;;  %v331_v3 = vld [vmem:[%s2709_s7 + $0x4d0] sm:$0xff]  ;;  %v341_v4 = vld [vmem:[%s2709_s7 + $0x520] sm:$0xff] }
  0xd3   : > { %1049 = vmatmul.mubr.f32.gmra.mrb[70].mxu0 %v282_v5  ;;  %2424 = vmatmul.mubr.msk.f32.gmra.mrb[70].mxu1 %vm514_vm0, %v248_v6  ;;  %v330_v5 = vld [vmem:[%s2709_s7 + $0x4c8] sm:$0xff]  ;;  %v344_v6 = vld [vmem:[%s2709_s7 + $0x538] sm:$0xff] }
  0xd4   : > { %1053 = vmatprep.mubr.f32.mxu0 %v286_v7  ;;  %2426 = vmatprep.mubr.msk.f32.mxu1 %vm514_vm0, %v251_v8  ;;  %v334_v7 = vld [vmem:[%s2709_s7 + $0x4e8] sm:$0xff]  ;;  %v347_v8 = vld [vmem:[%s2709_s7 + $0x550] sm:$0xff] }
  0xd7   : > { %1054 = vmatmul.mubr.f32.gmra.mrb[72].mxu0 %v285_v9  ;;  %2427 = vmatmul.mubr.msk.f32.gmra.mrb[72].mxu1 %vm514_vm0, %v254_v10  ;;  %v333_v9 = vld [vmem:[%s2709_s7 + $0x4e0] sm:$0xff]  ;;  %v350_v10 = vld [vmem:[%s2709_s7 + $0x568] sm:$0xff] }
  0xd8   : > { %1058 = vmatprep.mubr.f32.mxu0 %v289_v11  ;;  %2429 = vmatprep.mubr.msk.f32.mxu1 %vm514_vm0, %v257_v12  ;;  %v337_v11 = vld [vmem:[%s2709_s7 + $0x500] sm:$0xff] }
  0xd9   : > { %v353_v12 = vld [vmem:[%s2709_s7 + $0x580] sm:$0xff] }
  0xdb   : > { %1059 = vmatmul.mubr.f32.gmra.mrb[74].mxu0 %v288_v13  ;;  %2430 = vmatmul.mubr.msk.f32.gmra.mrb[74].mxu1 %vm514_vm0, %v260_v14  ;;  %v336_v13 = vld [vmem:[%s2709_s7 + $0x4f8] sm:$0xff] }
  0xdc   : > { %1063 = vmatprep.mubr.f32.mxu0 %v292_v15  ;;  %2432 = vmatprep.mubr.msk.f32.mxu1 %vm514_vm0, %v263_v16  ;;  %v356_v14 = vld [vmem:[%s2709_s7 + $0x598] sm:$0xff]  ;;  %v359_v16 = vld [vmem:[%s2709_s7 + $0x5b0] sm:$0xff] }
  0xdd   : > { %v340_v15 = vld [vmem:[%s2709_s7 + $0x518] sm:$0xff] }
  0xdf   : > { %1064 = vmatmul.mubr.f32.gmra.mrb[76].mxu0 %v291_v17  ;;  %2433 = vmatmul.mubr.msk.f32.gmra.mrb[76].mxu1 %vm514_vm0, %v266_v18 }
  0xe0   : > { %1068 = vmatprep.mubr.f32.mxu0 %v295_v19  ;;  %2435 = vmatprep.mubr.msk.f32.mxu1 %vm514_vm0, %v269_v20 }
  0xe3   : > { %1069 = vmatmul.mubr.f32.gmra.mrb[78].mxu0 %v294_v21  ;;  %2436 = vmatmul.mubr.msk.f32.gmra.mrb[78].mxu1 %vm514_vm0, %v272_v22  ;;  %v339_v21 = vld [vmem:[%s2709_s7 + $0x510] sm:$0xff]  ;;  %v362_v22 = vld [vmem:[%s2709_s7 + $0x5c8] sm:$0xff] }
  0xe4   : > { %1073 = vmatprep.mubr.f32.mxu0 %v298_v23  ;;  %2438 = vmatprep.mubr.msk.f32.mxu1 %vm514_vm0, %v275_v24  ;;  %v343_v23 = vld [vmem:[%s2709_s7 + $0x530] sm:$0xff]  ;;  %v365_v24 = vld [vmem:[%s2709_s7 + $0x5e0] sm:$0xff] }
  0xe7   : > { %1074 = vmatmul.mubr.f32.gmra.mrb[80].mxu0 %v297_v25  ;;  %2439 = vmatmul.mubr.msk.f32.gmra.mrb[80].mxu1 %vm514_vm0, %v278_v26 }
  0xe8   : > { %1078 = vmatprep.mubr.f32.mxu0 %v301_v27  ;;  %2441 = vmatprep.mubr.msk.f32.mxu1 %vm514_vm0, %v281_v28 }
  0xeb   : > { %1079 = vmatmul.mubr.f32.gmra.mrb[82].mxu0 %v300_v29  ;;  %2442 = vmatmul.mubr.msk.f32.gmra.mrb[82].mxu1 %vm514_vm0, %v284_v30  ;;  %v342_v29 = vld [vmem:[%s2709_s7 + $0x528] sm:$0xff]  ;;  %v368_v30 = vld [vmem:[%s2709_s7 + $0x5f8] sm:$0xff] }
  0xec   : > { %1083 = vmatprep.mubr.f32.mxu0 %v304_v31  ;;  %2444 = vmatprep.mubr.msk.f32.mxu1 %vm514_vm0, %v287_v32  ;;  %v346_v31 = vld [vmem:[%s2709_s7 + $0x548] sm:$0xff]  ;;  %v371_v32 = vld [vmem:[%s2709_s7 + $0x610] sm:$0xff] }
  0xef   : > { %1084 = vmatmul.mubr.f32.gmra.mrb[84].mxu0 %v303_v33  ;;  %2445 = vmatmul.mubr.msk.f32.gmra.mrb[84].mxu1 %vm514_vm0, %v290_v34 }
  0xf0   : > { %1088 = vmatprep.mubr.f32.mxu0 %v307_v35  ;;  %2447 = vmatprep.mubr.msk.f32.mxu1 %vm514_vm0, %v293_v36 }
  0xf3   : > { %1089 = vmatmul.mubr.f32.gmra.mrb[86].mxu0 %v306_v37  ;;  %2448 = vmatmul.mubr.msk.f32.gmra.mrb[86].mxu1 %vm514_vm0, %v296_v38  ;;  %v345_v37 = vld [vmem:[%s2709_s7 + $0x540] sm:$0xff]  ;;  %v374_v38 = vld [vmem:[%s2709_s7 + $0x628] sm:$0xff] }
  0xf4   : > { %1093 = vmatprep.mubr.f32.mxu0 %v310_v39  ;;  %2450 = vmatprep.mubr.msk.f32.mxu1 %vm514_vm0, %v299_v40  ;;  %v349_v39 = vld [vmem:[%s2709_s7 + $0x560] sm:$0xff] }
  0xf5   : > { %v377_v40 = vld [vmem:[%s2709_s7 + $0x640] sm:$0xff] }
  0xf7   : > { %1094 = vmatmul.mubr.f32.gmra.mrb[88].mxu0 %v309_v41  ;;  %2451 = vmatmul.mubr.msk.f32.gmra.mrb[88].mxu1 %vm514_vm0, %v302_v42 }
  0xf8   : > { %1098 = vmatprep.mubr.f32.mxu0 %v313_v43  ;;  %2453 = vmatprep.mubr.msk.f32.mxu1 %vm514_vm0, %v305_v44 }
  0xfb   : > { %1099 = vmatmul.mubr.f32.gmra.mrb[90].mxu0 %v312_v45  ;;  %2454 = vmatmul.mubr.msk.f32.gmra.mrb[90].mxu1 %vm514_vm0, %v308_v46  ;;  %v348_v45 = vld [vmem:[%s2709_s7 + $0x558] sm:$0xff] }
  0xfc   : > { %1103 = vmatprep.mubr.f32.mxu0 %v316_v47  ;;  %2456 = vmatprep.mubr.msk.f32.mxu1 %vm514_vm0, %v311_v48  ;;  %v380_v46 = vld [vmem:[%s2709_s7 + $0x658] sm:$0xff]  ;;  %v383_v48 = vld [vmem:[%s2709_s7 + $0x670] sm:$0xff] }
  0xfd   : > { %v352_v47 = vld [vmem:[%s2709_s7 + $0x578] sm:$0xff] }
  0xff   : > { %1104 = vmatmul.mubr.f32.gmra.mrb[92].mxu0 %v315_v49  ;;  %2457 = vmatmul.mubr.msk.f32.gmra.mrb[92].mxu1 %vm514_vm0, %v314_v50 }
 0x100   : > { %1108 = vmatprep.mubr.f32.mxu0 %v319_v51  ;;  %2459 = vmatprep.mubr.msk.f32.mxu1 %vm514_vm0, %v317_v52 }
 0x103   : > { %1109 = vmatmul.mubr.f32.gmra.mrb[94].mxu0 %v318_v53  ;;  %2460 = vmatmul.mubr.msk.f32.gmra.mrb[94].mxu1 %vm514_vm0, %v320_v54  ;;  %v351_v53 = vld [vmem:[%s2709_s7 + $0x570] sm:$0xff]  ;;  %v386_v54 = vld [vmem:[%s2709_s7 + $0x688] sm:$0xff] }
 0x104   : > { %1113 = vmatprep.mubr.f32.mxu0 %v322_v55  ;;  %2462 = vmatprep.mubr.msk.f32.mxu1 %vm514_vm0, %v323_v56  ;;  %v355_v55 = vld [vmem:[%s2709_s7 + $0x590] sm:$0xff]  ;;  %v389_v56 = vld [vmem:[%s2709_s7 + $0x6a0] sm:$0xff] }
 0x107   : > { %1114 = vmatmul.mubr.f32.gmra.mrb[96].mxu0 %v321_v57  ;;  %2463 = vmatmul.mubr.msk.f32.gmra.mrb[96].mxu1 %vm514_vm0, %v326_v58 }
 0x108   : > { %1118 = vmatprep.mubr.f32.mxu0 %v325_v59  ;;  %2465 = vmatprep.mubr.msk.f32.mxu1 %vm514_vm0, %v329_v60 }
 0x10b   : > { %1119 = vmatmul.mubr.f32.gmra.mrb[98].mxu0 %v324_v61  ;;  %2466 = vmatmul.mubr.msk.f32.gmra.mrb[98].mxu1 %vm514_vm0, %v332_v62  ;;  %v354_v61 = vld [vmem:[%s2709_s7 + $0x588] sm:$0xff]  ;;  %v392_v62 = vld [vmem:[%s2709_s7 + $0x6b8] sm:$0xff] }
 0x10c   : > { %1123 = vmatprep.mubr.f32.mxu0 %v328_v63  ;;  %2468 = vmatprep.mubr.msk.f32.mxu1 %vm514_vm0, %v335_v0  ;;  %v358_v63 = vld [vmem:[%s2709_s7 + $0x5a8] sm:$0xff]  ;;  %v395_v0 = vld [vmem:[%s2709_s7 + $0x6d0] sm:$0xff] }
 0x10f   : > { %1124 = vmatmul.mubr.f32.gmra.mrb[100].mxu0 %v327_v1  ;;  %2469 = vmatmul.mubr.msk.f32.gmra.mrb[100].mxu1 %vm514_vm0, %v338_v2 }
 0x110   : > { %1128 = vmatprep.mubr.f32.mxu0 %v331_v3  ;;  %2471 = vmatprep.mubr.msk.f32.mxu1 %vm514_vm0, %v341_v4 }
 0x113   : > { %1129 = vmatmul.mubr.f32.gmra.mrb[102].mxu0 %v330_v5  ;;  %2472 = vmatmul.mubr.msk.f32.gmra.mrb[102].mxu1 %vm514_vm0, %v344_v6  ;;  %v357_v5 = vld [vmem:[%s2709_s7 + $0x5a0] sm:$0xff]  ;;  %v398_v6 = vld [vmem:[%s2709_s7 + $0x6e8] sm:$0xff] }
 0x114   : > { %1133 = vmatprep.mubr.f32.mxu0 %v334_v7  ;;  %2474 = vmatprep.mubr.msk.f32.mxu1 %vm514_vm0, %v347_v8  ;;  %v361_v7 = vld [vmem:[%s2709_s7 + $0x5c0] sm:$0xff] }
 0x115   : > { %v401_v8 = vld [vmem:[%s2709_s7 + $0x700] sm:$0xff] }
 0x117   : > { %1134 = vmatmul.mubr.f32.gmra.mrb[104].mxu0 %v333_v9  ;;  %2475 = vmatmul.mubr.msk.f32.gmra.mrb[104].mxu1 %vm514_vm0, %v350_v10 }
 0x118   : > { %1138 = vmatprep.mubr.f32.mxu0 %v337_v11  ;;  %2477 = vmatprep.mubr.msk.f32.mxu1 %vm514_vm0, %v353_v12 }
 0x11a   : > { %v3098_v17 = vpop.f32.mrb[0].mxu0  ;;  %v3100_v18 = vpop.f32.mrb[0].mxu1 }
 0x11b   : > { %v877_v19 = vpop.f32.mrb[1].mxu0  ;;  %1139 = vmatmul.mubr.f32.gmra.mrb[106].mxu0 %v336_v13  ;;  %2478 = vmatmul.mubr.msk.f32.gmra.mrb[106].mxu1 %vm514_vm0, %v356_v14  ;;  %v1247_v20 = vpop.f32.mrb[1].mxu1  ;;  %v360_v13 = vld [vmem:[%s2709_s7 + $0x5b8] sm:$0xff] }
 0x11c   : > { %1143 = vmatprep.mubr.f32.mxu0 %v340_v15  ;;  %2480 = vmatprep.mubr.msk.f32.mxu1 %vm514_vm0, %v359_v16  ;;  %v404_v14 = vld [vmem:[%s2709_s7 + $0x718] sm:$0xff]  ;;  %v407_v16 = vld [vmem:[%s2709_s7 + $0x730] sm:$0xff] }
 0x11d   : > { %v364_v15 = vld [vmem:[%s2709_s7 + $0x5d8] sm:$0xff] }
 0x11e   : > { %v3108_v25 = vpop.f32.mrb[2].mxu0  ;;  %v3110_v26 = vpop.f32.mrb[2].mxu1 }
 0x11f   : > { %v882_v27 = vpop.f32.mrb[3].mxu0  ;;  %1144 = vmatmul.mubr.f32.gmra.mrb[108].mxu0 %v339_v21  ;;  %2481 = vmatmul.mubr.msk.f32.gmra.mrb[108].mxu1 %vm514_vm0, %v362_v22  ;;  %v1252_v28 = vpop.f32.mrb[3].mxu1 }
 0x120   : > { %1148 = vmatprep.mubr.f32.mxu0 %v343_v23  ;;  %2483 = vmatprep.mubr.msk.f32.mxu1 %vm514_vm0, %v365_v24  ;;  %v363_v23 = vld [vmem:[%s2709_s7 + $0x5d0] sm:$0xff]  ;;  %v410_v24 = vld [vmem:[%s2709_s7 + $0x748] sm:$0xff]  ;;  %v413_v28 = vld [vmem:[%s2709_s7 + $0x760] sm:$0xff] }
 0x121   : > { %v367_v27 = vld [vmem:[%s2709_s7 + $0x5f0] sm:$0xff] }
 0x122   : > { %v3118_v33 = vpop.f32.mrb[4].mxu0  ;;  %v3120_v34 = vpop.f32.mrb[4].mxu1 }
 0x123   : > { %v887_v35 = vpop.f32.mrb[5].mxu0  ;;  %1149 = vmatmul.mubr.f32.gmra.mrb[110].mxu0 %v342_v29  ;;  %2484 = vmatmul.mubr.msk.f32.gmra.mrb[110].mxu1 %vm514_vm0, %v368_v30  ;;  %v1257_v36 = vpop.f32.mrb[5].mxu1 }
 0x124   : > { %1153 = vmatprep.mubr.f32.mxu0 %v346_v31  ;;  %2486 = vmatprep.mubr.msk.f32.mxu1 %vm514_vm0, %v371_v32  ;;  %v366_v35 = vld [vmem:[%s2709_s7 + $0x5e8] sm:$0xff]  ;;  %v416_v36 = vld [vmem:[%s2709_s7 + $0x778] sm:$0xff] }
 0x126   : > { %v3128_v41 = vpop.f32.mrb[6].mxu0  ;;  %v3130_v42 = vpop.f32.mrb[6].mxu1 }
 0x127   : > { %v892_v43 = vpop.f32.mrb[7].mxu0  ;;  %1154 = vmatmul.mubr.f32.gmra.mrb[112].mxu0 %v345_v37  ;;  %2487 = vmatmul.mubr.msk.f32.gmra.mrb[112].mxu1 %vm514_vm0, %v374_v38  ;;  %v1262_v44 = vpop.f32.mrb[7].mxu1  ;;  %v370_v37 = vld [vmem:[%s2709_s7 + $0x608] sm:$0xff]  ;;  %v419_v38 = vld [vmem:[%s2709_s7 + $0x790] sm:$0xff] }
 0x128   : > { %1158 = vmatprep.mubr.f32.mxu0 %v349_v39  ;;  %2489 = vmatprep.mubr.msk.f32.mxu1 %vm514_vm0, %v377_v40 }
 0x12a   : > { %v3138_v49 = vpop.f32.mrb[8].mxu0  ;;  %v3140_v50 = vpop.f32.mrb[8].mxu1 }
 0x12b   : > { %v897_v51 = vpop.f32.mrb[9].mxu0  ;;  %1159 = vmatmul.mubr.f32.gmra.mrb[114].mxu0 %v348_v45  ;;  %2490 = vmatmul.mubr.msk.f32.gmra.mrb[114].mxu1 %vm514_vm0, %v380_v46  ;;  %v1267_v52 = vpop.f32.mrb[9].mxu1  ;;  %v369_v45 = vld [vmem:[%s2709_s7 + $0x600] sm:$0xff]  ;;  %v422_v46 = vld [vmem:[%s2709_s7 + $0x7a8] sm:$0xff] }
 0x12c   : > { %1163 = vmatprep.mubr.f32.mxu0 %v352_v47  ;;  %2492 = vmatprep.mubr.msk.f32.mxu1 %vm514_vm0, %v383_v48  ;;  %v373_v47 = vld [vmem:[%s2709_s7 + $0x620] sm:$0xff] }
 0x12d   : > { %v425_v48 = vld [vmem:[%s2709_s7 + $0x7c0] sm:$0xff] }
 0x12e   : > { %v3148_v57 = vpop.f32.mrb[10].mxu0  ;;  %v3150_v58 = vpop.f32.mrb[10].mxu1 }
 0x12f   : > { %v902_v59 = vpop.f32.mrb[11].mxu0  ;;  %1164 = vmatmul.mubr.f32.gmra.mrb[116].mxu0 %v351_v53  ;;  %2493 = vmatmul.mubr.msk.f32.gmra.mrb[116].mxu1 %vm514_vm0, %v386_v54  ;;  %v1272_v60 = vpop.f32.mrb[11].mxu1 }
 0x130   : > { %1168 = vmatprep.mubr.f32.mxu0 %v355_v55  ;;  %2495 = vmatprep.mubr.msk.f32.mxu1 %vm514_vm0, %v389_v56  ;;  %v372_v55 = vld [vmem:[%s2709_s7 + $0x618] sm:$0xff]  ;;  %v431_v60 = vld [vmem:[%s2709_s7 + $0x7f0] sm:$0xff] }
 0x131   : > { %v428_v56 = vld [vmem:[%s2709_s7 + $0x7d8] sm:$0xff] }
 0x132   : > { %v3158_v1 = vpop.f32.mrb[12].mxu0  ;;  %v3160_v2 = vpop.f32.mrb[12].mxu1  ;;  %v376_v59 = vld [vmem:[%s2709_s7 + $0x638] sm:$0xff] }
 0x133   : > { %v907_v3 = vpop.f32.mrb[13].mxu0  ;;  %1169 = vmatmul.mubr.f32.gmra.mrb[118].mxu0 %v354_v61  ;;  %2496 = vmatmul.mubr.msk.f32.gmra.mrb[118].mxu1 %vm514_vm0, %v392_v62  ;;  %v1277_v4 = vpop.f32.mrb[13].mxu1 }
 0x134   : > { %1173 = vmatprep.mubr.f32.mxu0 %v358_v63  ;;  %2498 = vmatprep.mubr.msk.f32.mxu1 %vm514_vm0, %v395_v0  ;;  %v375_v3 = vld [vmem:[%s2709_s7 + $0x630] sm:$0xff]  ;;  %v434_v4 = vld [vmem:[%s2709_s7 + $0x808] sm:$0xff] }
 0x136   : > { %v3168_v9 = vpop.f32.mrb[14].mxu0  ;;  %v3170_v10 = vpop.f32.mrb[14].mxu1 }
 0x137   : > { %v912_v11 = vpop.f32.mrb[15].mxu0  ;;  %1174 = vmatmul.mubr.f32.gmra.mrb[120].mxu0 %v357_v5  ;;  %2499 = vmatmul.mubr.msk.f32.gmra.mrb[120].mxu1 %vm514_vm0, %v398_v6  ;;  %v1282_v12 = vpop.f32.mrb[15].mxu1  ;;  %v379_v5 = vld [vmem:[%s2709_s7 + $0x650] sm:$0xff]  ;;  %v437_v6 = vld [vmem:[%s2709_s7 + $0x820] sm:$0xff] }
 0x138   : > { %1178 = vmatprep.mubr.f32.mxu0 %v361_v7  ;;  %2501 = vmatprep.mubr.msk.f32.mxu1 %vm514_vm0, %v401_v8 }
 0x13a   : > { %v3178_v19 = vpop.f32.mrb[16].mxu0  ;;  %v3180_v20 = vpop.f32.mrb[16].mxu1 }
 0x13b   : > { %v917_v21 = vpop.f32.mrb[17].mxu0  ;;  %1179 = vmatmul.mubr.f32.gmra.mrb[122].mxu0 %v360_v13  ;;  %2502 = vmatmul.mubr.msk.f32.gmra.mrb[122].mxu1 %vm514_vm0, %v404_v14  ;;  %v1287_v22 = vpop.f32.mrb[17].mxu1  ;;  %v378_v13 = vld [vmem:[%s2709_s7 + $0x648] sm:$0xff]  ;;  %v440_v14 = vld [vmem:[%s2709_s7 + $0x838] sm:$0xff] }
 0x13c   : > { %1183 = vmatprep.mubr.f32.mxu0 %v364_v15  ;;  %2504 = vmatprep.mubr.msk.f32.mxu1 %vm514_vm0, %v407_v16  ;;  %v382_v15 = vld [vmem:[%s2709_s7 + $0x668] sm:$0xff]  ;;  %v443_v16 = vld [vmem:[%s2709_s7 + $0x850] sm:$0xff] }
 0x13e   : > { %v3188_v29 = vpop.f32.mrb[18].mxu0  ;;  %v3190_v30 = vpop.f32.mrb[18].mxu1 }
 0x13f   : > { %v922_v31 = vpop.f32.mrb[19].mxu0  ;;  %1184 = vmatmul.mubr.f32.gmra.mrb[124].mxu0 %v363_v23  ;;  %2505 = vmatmul.mubr.msk.f32.gmra.mrb[124].mxu1 %vm514_vm0, %v410_v24  ;;  %v1292_v32 = vpop.f32.mrb[19].mxu1 }
 0x140   : > { %1188 = vmatprep.mubr.f32.mxu0 %v367_v27  ;;  %2507 = vmatprep.mubr.msk.f32.mxu1 %vm514_vm0, %v413_v28  ;;  %v381_v27 = vld [vmem:[%s2709_s7 + $0x660] sm:$0xff]  ;;  %v446_v28 = vld [vmem:[%s2709_s7 + $0x868] sm:$0xff] }
 0x141   : > { %v385_v31 = vld [vmem:[%s2709_s7 + $0x680] sm:$0xff] }
 0x142   : > { %v3198_v39 = vpop.f32.mrb[20].mxu0  ;;  %v3200_v40 = vpop.f32.mrb[20].mxu1  ;;  %v449_v32 = vld [vmem:[%s2709_s7 + $0x880] sm:$0xff] }
 0x143   : > { %v927_v43 = vpop.f32.mrb[21].mxu0  ;;  %1189 = vmatmul.mubr.f32.gmra.mrb[126].mxu0 %v366_v35  ;;  %2508 = vmatmul.mubr.msk.f32.gmra.mrb[126].mxu1 %vm514_vm0, %v416_v36  ;;  %v1297_v44 = vpop.f32.mrb[21].mxu1 }
 0x144   : > { %1193 = vmatprep.mubr.f32.mxu0 %v370_v37  ;;  %2510 = vmatprep.mubr.msk.f32.mxu1 %vm514_vm0, %v419_v38  ;;  %v384_v43 = vld [vmem:[%s2709_s7 + $0x678] sm:$0xff] }
 0x145   : > { %v452_v44 = vld [vmem:[%s2709_s7 + $0x898] sm:$0xff] }
 0x146   : > { %v3208_v51 = vpop.f32.mrb[22].mxu0  ;;  %v3210_v52 = vpop.f32.mrb[22].mxu1 }
 0x147   : > { %v932_v53 = vpop.f32.mrb[23].mxu0  ;;  %1194 = vmatmul.mubr.f32.gmra.mrb[128].mxu0 %v369_v45  ;;  %2511 = vmatmul.mubr.msk.f32.gmra.mrb[128].mxu1 %vm514_vm0, %v422_v46  ;;  %v1302_v54 = vpop.f32.mrb[23].mxu1  ;;  %v388_v45 = vld [vmem:[%s2709_s7 + $0x698] sm:$0xff]  ;;  %v455_v46 = vld [vmem:[%s2709_s7 + $0x8b0] sm:$0xff] }
 0x148   : > { %1198 = vmatprep.mubr.f32.mxu0 %v373_v47  ;;  %2513 = vmatprep.mubr.msk.f32.mxu1 %vm514_vm0, %v425_v48 }
 0x14a   : > { %v3218_v61 = vpop.f32.mrb[24].mxu0  ;;  %v3220_v62 = vpop.f32.mrb[24].mxu1 }
 0x14b   : > { %v937_v63 = vpop.f32.mrb[25].mxu0  ;;  %1199 = vmatmul.mubr.f32.gmra.mrb[130].mxu0 %v372_v55  ;;  %2514 = vmatmul.mubr.msk.f32.gmra.mrb[130].mxu1 %vm514_vm0, %v428_v56  ;;  %v1307_v0 = vpop.f32.mrb[25].mxu1  ;;  %v387_v55 = vld [vmem:[%s2709_s7 + $0x690] sm:$0xff]  ;;  %v458_v56 = vld [vmem:[%s2709_s7 + $0x8c8] sm:$0xff] }
 0x14c   : > { %1203 = vmatprep.mubr.f32.mxu0 %v376_v59  ;;  %2516 = vmatprep.mubr.msk.f32.mxu1 %vm514_vm0, %v431_v60  ;;  %v391_v59 = vld [vmem:[%s2709_s7 + $0x6b0] sm:$0xff]  ;;  %v461_v60 = vld [vmem:[%s2709_s7 + $0x8e0] sm:$0xff] }
 0x14e   : > { %v3228_v7 = vpop.f32.mrb[26].mxu0  ;;  %v3230_v8 = vpop.f32.mrb[26].mxu1 }
 0x14f   : > { %v942_v11 = vpop.f32.mrb[27].mxu0  ;;  %1204 = vmatmul.mubr.f32.gmra.mrb[132].mxu0 %v375_v3  ;;  %2517 = vmatmul.mubr.msk.f32.gmra.mrb[132].mxu1 %vm514_vm0, %v434_v4  ;;  %v1312_v12 = vpop.f32.mrb[27].mxu1 }
 0x150   : > { %1208 = vmatprep.mubr.f32.mxu0 %v379_v5  ;;  %2519 = vmatprep.mubr.msk.f32.mxu1 %vm514_vm0, %v437_v6  ;;  %v390_v5 = vld [vmem:[%s2709_s7 + $0x6a8] sm:$0xff]  ;;  %v464_v6 = vld [vmem:[%s2709_s7 + $0x8f8] sm:$0xff]  ;;  %v467_v12 = vld [vmem:[%s2709_s7 + $0x910] sm:$0xff] }
 0x151   : > { %v394_v11 = vld [vmem:[%s2709_s7 + $0x6c8] sm:$0xff] }
 0x152   : > { %v3238_v21 = vpop.f32.mrb[28].mxu0  ;;  %v3240_v22 = vpop.f32.mrb[28].mxu1 }
 0x153   : > { %v947_v23 = vpop.f32.mrb[29].mxu0  ;;  %1209 = vmatmul.mubr.f32.gmra.mrb[134].mxu0 %v378_v13  ;;  %2520 = vmatmul.mubr.msk.f32.gmra.mrb[134].mxu1 %vm514_vm0, %v440_v14  ;;  %v1317_v24 = vpop.f32.mrb[29].mxu1 }
 0x154   : > { %1213 = vmatprep.mubr.f32.mxu0 %v382_v15  ;;  %2522 = vmatprep.mubr.msk.f32.mxu1 %vm514_vm0, %v443_v16  ;;  %v393_v23 = vld [vmem:[%s2709_s7 + $0x6c0] sm:$0xff]  ;;  %v470_v24 = vld [vmem:[%s2709_s7 + $0x928] sm:$0xff] }
 0x156   : > { %v3248_v35 = vpop.f32.mrb[30].mxu0  ;;  %v3250_v36 = vpop.f32.mrb[30].mxu1 }
 0x157   : > { %v952_v37 = vpop.f32.mrb[31].mxu0  ;;  %1214 = vmatmul.mubr.f32.gmra.mrb[136].mxu0 %v381_v27  ;;  %2523 = vmatmul.mubr.msk.f32.gmra.mrb[136].mxu1 %vm514_vm0, %v446_v28  ;;  %v1322_v38 = vpop.f32.mrb[31].mxu1  ;;  %v397_v27 = vld [vmem:[%s2709_s7 + $0x6e0] sm:$0xff] }
 0x158   : > { %1218 = vmatprep.mubr.f32.mxu0 %v385_v31  ;;  %2525 = vmatprep.mubr.msk.f32.mxu1 %vm514_vm0, %v449_v32  ;;  %v396_v38 = vld [vmem:[%s2709_s7 + $0x6d8] sm:$0xff] }
 0x15a   : > { %v3258_v47 = vpop.f32.mrb[32].mxu0  ;;  %v3260_v48 = vpop.f32.mrb[32].mxu1 }
 0x15b   : > { %v957_v53 = vpop.f32.mrb[33].mxu0  ;;  %1219 = vmatmul.mubr.f32.gmra.mrb[138].mxu0 %v384_v43  ;;  %2526 = vmatmul.mubr.msk.f32.gmra.mrb[138].mxu1 %vm514_vm0, %v452_v44  ;;  %v1327_v54 = vpop.f32.mrb[33].mxu1 }
 0x15c   : > { %1223 = vmatprep.mubr.f32.mxu0 %v388_v45  ;;  %2528 = vmatprep.mubr.msk.f32.mxu1 %vm514_vm0, %v455_v46 }
 0x15e   : > { %v3268_v63 = vpop.f32.mrb[34].mxu0  ;;  %v3270_v0 = vpop.f32.mrb[34].mxu1 }
 0x15f   : > { %v962_v3 = vpop.f32.mrb[35].mxu0  ;;  %1224 = vmatmul.mubr.f32.gmra.mrb[140].mxu0 %v387_v55  ;;  %2529 = vmatmul.mubr.msk.f32.gmra.mrb[140].mxu1 %vm514_vm0, %v458_v56  ;;  %v1332_v4 = vpop.f32.mrb[35].mxu1 }
 0x160   : > { %1228 = vmatprep.mubr.f32.mxu0 %v391_v59  ;;  %2531 = vmatprep.mubr.msk.f32.mxu1 %vm514_vm0, %v461_v60 }
 0x162   : > { %v3278_v13 = vpop.f32.mrb[36].mxu0  ;;  %v3280_v14 = vpop.f32.mrb[36].mxu1 }
 0x163   : > { %v967_v15 = vpop.f32.mrb[37].mxu0  ;;  %1229 = vmatmul.mubr.f32.gmra.mrb[142].mxu0 %v390_v5  ;;  %2532 = vmatmul.mubr.msk.f32.gmra.mrb[142].mxu1 %vm514_vm0, %v464_v6  ;;  %v1337_v16 = vpop.f32.mrb[37].mxu1 }
 0x164   : > { %1233 = vmatprep.mubr.f32.mxu0 %v394_v11  ;;  %2534 = vmatprep.mubr.msk.f32.mxu1 %vm514_vm0, %v467_v12  ;;  %v3312_v11 = vld [vmem:[%s3750_s2] ss:$0 sm:$0xff] }
 0x165   : > { %v881_v16 = vadd.f32 %v3312_v11, %v3108_v25  ;;  %v891_v25 = vadd.f32 %v3312_v11, %v3128_v41  ;;  %v901_v41 = vadd.f32 %v3312_v11, %v3148_v57  ;;  %v911_v57 = vadd.f32 %v3312_v11, %v3168_v9 }
 0x166   : > { %v3287_v28 = vpop.f32.mrb[38].mxu0  ;;  %v3289_v31 = vpop.f32.mrb[38].mxu1  ;;  %v921_v9 = vadd.f32 %v3312_v11, %v3188_v29  ;;  %v931_v29 = vadd.f32 %v3312_v11, %v3208_v51  ;;  %v941_v51 = vadd.f32 %v3312_v11, %v3228_v7  ;;  %v951_v7 = vadd.f32 %v3312_v11, %v3248_v35 }
 0x167   : > { %v972_v32 = vpop.f32.mrb[39].mxu0  ;;  %1234 = vmatmul.mubr.f32.gmra.mrb[144].mxu0 %v393_v23  ;;  %2535 = vmatmul.mubr.msk.f32.gmra.mrb[144].mxu1 %vm514_vm0, %v470_v24  ;;  %v1342_v37 = vpop.f32.mrb[39].mxu1  ;;  %v876_v23 = vadd.f32 %v3312_v11, %v3098_v17  ;;  %v886_v17 = vadd.f32 %v3312_v11, %v3118_v33  ;;  %v896_v33 = vadd.f32 %v3312_v11, %v3138_v49 }
 0x168   : > { %1238 = vmatprep.mubr.f32.mxu0 %v397_v27  ;;  %v906_v49 = vadd.f32 %v3312_v11, %v3158_v1  ;;  %v916_v1 = vadd.f32 %v3312_v11, %v3178_v19  ;;  %v926_v19 = vadd.f32 %v3312_v11, %v3198_v39  ;;  %v936_v39 = vadd.f32 %v3312_v11, %v3218_v61 }
 0x169   : > { %v946_v61 = vadd.f32 %v3312_v11, %v3238_v21  ;;  %v961_v35 = vadd.f32 %v3312_v11, %v3268_v63  ;;  %v956_v21 = vadd.f32 %v3312_v11, %v3258_v47  ;;  %v971_v63 = vadd.f32 %v3312_v11, %v3287_v28 }
 0x16a   : > { %v3293_v43 = vpop.f32.mrb[40].mxu0  ;;  %v3295_v44 = vpop.f32.mrb[40].mxu1  ;;  %v966_v47 = vadd.f32 %v3312_v11, %v3278_v13 }
 0x16b   : > { %v977_v45 = vpop.f32.mrb[41].mxu0  ;;  %1239 = vmatmul.mubr.f32.gmra.mrb[146].mxu0 %v396_v38  ;;  %v1347_v46 = vpop.f32.mrb[41].mxu1  ;;  %v976_v13 = vadd.f32 %v3312_v11, %v3293_v43 }
 0x16e   : > { %v3297_v53 = vpop.f32.mrb[42].mxu0  ;;  %v3299_v54 = vpop.f32.mrb[42].mxu1 }
 0x16f   : > { %v982_v55 = vpop.f32.mrb[43].mxu0  ;;  %v1352_v56 = vpop.f32.mrb[43].mxu1  ;;  %v981_v28 = vadd.f32 %v3312_v11, %v3297_v53 }
 0x172   : > { %v3301_v59 = vpop.f32.mrb[44].mxu0  ;;  %v3303_v60 = vpop.f32.mrb[44].mxu1 }
 0x173   : > { %v987_v3 = vpop.f32.mrb[45].mxu0  ;;  %v1357_v4 = vpop.f32.mrb[45].mxu1  ;;  %v986_v43 = vadd.f32 %v3312_v11, %v3301_v59 }
 0x176   : > { %v3305_v5 = vpop.f32.mrb[46].mxu0  ;;  %v3307_v6 = vpop.f32.mrb[46].mxu1 }
 0x177   : > { %v992_v12 = vpop.f32.mrb[47].mxu0  ;;  %v1362_v15 = vpop.f32.mrb[47].mxu1  ;;  %v991_v53 = vadd.f32 %v3312_v11, %v3305_v5 }
 0x17a   : > { %v3319_v24 = vpop.f32.mrb[48].mxu0  ;;  %v2392_v27 = vpop.f32.mrb[48].mxu1 }
 0x17b   : > { %v1436_v32 = vadd.f32 %v2392_v27, %v881_v16  ;;  %v997_v37 = vpop.f32.mrb[49].mxu0  ;;  %v1430_v38 = vpop.f32.mrb[49].mxu1  ;;  %v996_v59 = vadd.f32 %v3312_v11, %v3319_v24 }
 0x17c   : > { %v1431_v45 = vadd.f32 %v1430_v38, %v876_v23 }
 0x17d   : > { %v1920_v46 = vmax.f32 %v1436_v32, 0.0 }
 0x17e   : > { %v1919_v55 = vmax.f32 %v1431_v45, 0.0  ;;  %v3330_v56 = vpop.f32.mrb[50].mxu0  ;;  %v2395_v3 = vpop.f32.mrb[50].mxu1 }
 0x17f   : > { %2019 = vst.msk [vmem:[%s3324_s22 + $0x8] sm:$0xff] %vm2017_vm1, %v1920_v46  ;;  %v1446_v4 = vadd.f32 %v2395_v3, %v891_v25  ;;  %v1002_v12 = vpop.f32.mrb[51].mxu0  ;;  %v1440_v15 = vpop.f32.mrb[51].mxu1  ;;  %v1001_v5 = vadd.f32 %v3312_v11, %v3330_v56 }
 0x180   : > { %2018 = vst.msk [vmem:[%s3324_s22] sm:$0xff] %vm2017_vm1, %v1919_v55  ;;  %v1441_v16 = vadd.f32 %v1440_v15, %v886_v17 }
 0x181   : > { %v1922_v23 = vmax.f32 %v1446_v4, 0.0 }
 0x182   : > { %v1921_v27 = vmax.f32 %v1441_v16, 0.0  ;;  %v3340_v32 = vpop.f32.mrb[52].mxu0  ;;  %v2398_v37 = vpop.f32.mrb[52].mxu1 }
 0x183   : > { %2021 = vst.msk [vmem:[%s3324_s22 + $0x18] sm:$0xff] %vm2017_vm1, %v1922_v23  ;;  %v1456_v38 = vadd.f32 %v2398_v37, %v901_v41  ;;  %v1007_v45 = vpop.f32.mrb[53].mxu0  ;;  %v1450_v25 = vpop.f32.mrb[53].mxu1  ;;  %v1006_v24 = vadd.f32 %v3312_v11, %v3340_v32 }
 0x184   : > { %2020 = vst.msk [vmem:[%s3324_s22 + $0x10] sm:$0xff] %vm2017_vm1, %v1921_v27  ;;  %v1451_v46 = vadd.f32 %v1450_v25, %v896_v33 }
 0x185   : > { %v1924_v17 = vmax.f32 %v1456_v38, 0.0 }
 0x186   : > { %v1923_v55 = vmax.f32 %v1451_v46, 0.0  ;;  %v3350_v3 = vpop.f32.mrb[54].mxu0  ;;  %v2401_v4 = vpop.f32.mrb[54].mxu1 }
 0x187   : > { %2023 = vst.msk [vmem:[%s3324_s22 + $0x28] sm:$0xff] %vm2017_vm1, %v1924_v17  ;;  %v1466_v12 = vadd.f32 %v2401_v4, %v911_v57  ;;  %v1012_v15 = vpop.f32.mrb[55].mxu0  ;;  %v1460_v16 = vpop.f32.mrb[55].mxu1  ;;  %v1011_v56 = vadd.f32 %v3312_v11, %v3350_v3 }
 0x188   : > { %2022 = vst.msk [vmem:[%s3324_s22 + $0x20] sm:$0xff] %vm2017_vm1, %v1923_v55  ;;  %v1461_v41 = vadd.f32 %v1460_v16, %v906_v49 }
 0x189   : > { %v1926_v23 = vmax.f32 %v1466_v12, 0.0 }
 0x18a   : > { %v1925_v33 = vmax.f32 %v1461_v41, 0.0  ;;  %v3360_v27 = vpop.f32.mrb[56].mxu0  ;;  %v2404_v37 = vpop.f32.mrb[56].mxu1 }
 0x18b   : > { %2025 = vst.msk [vmem:[%s3324_s22 + $0x38] sm:$0xff] %vm2017_vm1, %v1926_v23  ;;  %v1476_v38 = vadd.f32 %v2404_v37, %v921_v9  ;;  %v1017_v45 = vpop.f32.mrb[57].mxu0  ;;  %v1470_v25 = vpop.f32.mrb[57].mxu1  ;;  %v1016_v32 = vadd.f32 %v3312_v11, %v3360_v27 }
 0x18c   : > { %2024 = vst.msk [vmem:[%s3324_s22 + $0x30] sm:$0xff] %vm2017_vm1, %v1925_v33  ;;  %v1471_v46 = vadd.f32 %v1470_v25, %v916_v1 }
 0x18d   : > { %v1928_v57 = vmax.f32 %v1476_v38, 0.0 }
 0x18e   : > { %v1927_v17 = vmax.f32 %v1471_v46, 0.0  ;;  %v3370_v49 = vpop.f32.mrb[58].mxu0  ;;  %v2407_v55 = vpop.f32.mrb[58].mxu1 }
 0x18f   : > { %2027 = vst.msk [vmem:[%s3324_s22 + $0x48] sm:$0xff] %vm2017_vm1, %v1928_v57  ;;  %v1486_v4 = vadd.f32 %v2407_v55, %v931_v29  ;;  %v1022_v12 = vpop.f32.mrb[59].mxu0  ;;  %v1480_v15 = vpop.f32.mrb[59].mxu1  ;;  %v1021_v3 = vadd.f32 %v3312_v11, %v3370_v49 }
 0x190   : > { %2026 = vst.msk [vmem:[%s3324_s22 + $0x40] sm:$0xff] %vm2017_vm1, %v1927_v17  ;;  %v1481_v16 = vadd.f32 %v1480_v15, %v926_v19 }
 0x191   : > { %v1930_v41 = vmax.f32 %v1486_v4, 0.0 }
 0x192   : > { %v1929_v9 = vmax.f32 %v1481_v16, 0.0  ;;  %v3380_v23 = vpop.f32.mrb[60].mxu0  ;;  %v2410_v1 = vpop.f32.mrb[60].mxu1 }
 0x193   : > { %2029 = vst.msk [vmem:[%s3324_s22 + $0x58] sm:$0xff] %vm2017_vm1, %v1930_v41  ;;  %v1496_v33 = vadd.f32 %v2410_v1, %v941_v51  ;;  %v1027_v37 = vpop.f32.mrb[61].mxu0  ;;  %v1490_v38 = vpop.f32.mrb[61].mxu1  ;;  %v1026_v27 = vadd.f32 %v3312_v11, %v3380_v23 }
 0x194   : > { %2028 = vst.msk [vmem:[%s3324_s22 + $0x50] sm:$0xff] %vm2017_vm1, %v1929_v9  ;;  %v1491_v45 = vadd.f32 %v1490_v38, %v936_v39 }
 0x195   : > { %v1932_v25 = vmax.f32 %v1496_v33, 0.0 }
 0x196   : > { %v1931_v46 = vmax.f32 %v1491_v45, 0.0  ;;  %v3390_v29 = vpop.f32.mrb[62].mxu0  ;;  %v2413_v57 = vpop.f32.mrb[62].mxu1 }
 0x197   : > { %2031 = vst.msk [vmem:[%s3324_s22 + $0x68] sm:$0xff] %vm2017_vm1, %v1932_v25  ;;  %v1506_v19 = vadd.f32 %v2413_v57, %v951_v7  ;;  %v1032_v17 = vpop.f32.mrb[63].mxu0  ;;  %v1500_v55 = vpop.f32.mrb[63].mxu1  ;;  %v1031_v49 = vadd.f32 %v3312_v11, %v3390_v29 }
 0x198   : > { %2030 = vst.msk [vmem:[%s3324_s22 + $0x60] sm:$0xff] %vm2017_vm1, %v1931_v46  ;;  %v1501_v4 = vadd.f32 %v1500_v55, %v946_v61 }
 0x199   : > { %v1934_v12 = vmax.f32 %v1506_v19, 0.0 }
 0x19a   : > { %v1933_v15 = vmax.f32 %v1501_v4, 0.0  ;;  %v3400_v16 = vpop.f32.mrb[64].mxu0  ;;  %v2416_v51 = vpop.f32.mrb[64].mxu1 }
 0x19b   : > { %2033 = vst.msk [vmem:[%s3324_s22 + $0x78] sm:$0xff] %vm2017_vm1, %v1934_v12  ;;  %v1516_v41 = vadd.f32 %v2416_v51, %v961_v35  ;;  %v1037_v39 = vpop.f32.mrb[65].mxu0  ;;  %v1510_v9 = vpop.f32.mrb[65].mxu1  ;;  %v1036_v23 = vadd.f32 %v3312_v11, %v3400_v16 }
 0x19c   : > { %2032 = vst.msk [vmem:[%s3324_s22 + $0x70] sm:$0xff] %vm2017_vm1, %v1933_v15  ;;  %v1511_v1 = vadd.f32 %v1510_v9, %v956_v21 }
 0x19d   : > { %v1936_v33 = vmax.f32 %v1516_v41, 0.0 }
 0x19e   : > { %v1935_v37 = vmax.f32 %v1511_v1, 0.0  ;;  %v3410_v38 = vpop.f32.mrb[66].mxu0  ;;  %v2419_v45 = vpop.f32.mrb[66].mxu1 }
 0x19f   : > { %2035 = vst.msk [vmem:[%s3324_s22 + $0x88] sm:$0xff] %vm2017_vm1, %v1936_v33  ;;  %v1526_v7 = vadd.f32 %v2419_v45, %v971_v63  ;;  %v1042_v25 = vpop.f32.mrb[67].mxu0  ;;  %v1520_v61 = vpop.f32.mrb[67].mxu1  ;;  %v1041_v29 = vadd.f32 %v3312_v11, %v3410_v38 }
 0x1a0   : > { %2034 = vst.msk [vmem:[%s3324_s22 + $0x80] sm:$0xff] %vm2017_vm1, %v1935_v37  ;;  %v1521_v46 = vadd.f32 %v1520_v61, %v966_v47 }
 0x1a1   : > { %v1938_v57 = vmax.f32 %v1526_v7, 0.0 }
 0x1a2   : > { %v1937_v19 = vmax.f32 %v1521_v46, 0.0  ;;  %v3420_v17 = vpop.f32.mrb[68].mxu0  ;;  %v2422_v55 = vpop.f32.mrb[68].mxu1 }
 0x1a3   : > { %2037 = vst.msk [vmem:[%s3324_s22 + $0x98] sm:$0xff] %vm2017_vm1, %v1938_v57  ;;  %v1536_v4 = vadd.f32 %v2422_v55, %v981_v28  ;;  %v1047_v35 = vpop.f32.mrb[69].mxu0  ;;  %v1530_v12 = vpop.f32.mrb[69].mxu1  ;;  %v1046_v16 = vadd.f32 %v3312_v11, %v3420_v17 }
 0x1a4   : > { %2036 = vst.msk [vmem:[%s3324_s22 + $0x90] sm:$0xff] %vm2017_vm1, %v1937_v19  ;;  %v1531_v21 = vadd.f32 %v1530_v12, %v976_v13 }
 0x1a5   : > { %v1940_v15 = vmax.f32 %v1536_v4, 0.0 }
 0x1a6   : > { %v1939_v51 = vmax.f32 %v1531_v21, 0.0  ;;  %v3430_v41 = vpop.f32.mrb[70].mxu0  ;;  %v2425_v39 = vpop.f32.mrb[70].mxu1 }
 0x1a7   : > { %2039 = vst.msk [vmem:[%s3324_s22 + $0xa8] sm:$0xff] %vm2017_vm1, %v1940_v15  ;;  %v1546_v9 = vadd.f32 %v2425_v39, %v991_v53  ;;  %v1052_v1 = vpop.f32.mrb[71].mxu0  ;;  %v1540_v63 = vpop.f32.mrb[71].mxu1  ;;  %v1051_v38 = vadd.f32 %v3312_v11, %v3430_v41 }
 0x1a8   : > { %2038 = vst.msk [vmem:[%s3324_s22 + $0xa0] sm:$0xff] %vm2017_vm1, %v1939_v51  ;;  %v1541_v33 = vadd.f32 %v1540_v63, %v986_v43 }
 0x1a9   : > { %v1942_v47 = vmax.f32 %v1546_v9, 0.0 }
 0x1aa   : > { %v1941_v37 = vmax.f32 %v1541_v33, 0.0  ;;  %v3440_v45 = vpop.f32.mrb[72].mxu0  ;;  %v2428_v7 = vpop.f32.mrb[72].mxu1 }
 0x1ab   : > { %2041 = vst.msk [vmem:[%s3324_s22 + $0xb8] sm:$0xff] %vm2017_vm1, %v1942_v47  ;;  %v1556_v25 = vadd.f32 %v2428_v7, %v1001_v5  ;;  %v1057_v61 = vpop.f32.mrb[73].mxu0  ;;  %v1550_v46 = vpop.f32.mrb[73].mxu1 }
 0x1ac   : > { %2040 = vst.msk [vmem:[%s3324_s22 + $0xb0] sm:$0xff] %vm2017_vm1, %v1941_v37  ;;  %v1551_v28 = vadd.f32 %v1550_v46, %v996_v59 }
 0x1ad   : > { %v1944_v57 = vmax.f32 %v1556_v25, 0.0 }
 0x1ae   : > { %v1943_v13 = vmax.f32 %v1551_v28, 0.0  ;;  %v1060_v19 = vpop.f32.mrb[74].mxu0  ;;  %v2431_v55 = vpop.f32.mrb[74].mxu1 }
 0x1af   : > { %2043 = vst.msk [vmem:[%s3324_s22 + $0xc8] sm:$0xff] %vm2017_vm1, %v1944_v57  ;;  %v1566_v4 = vadd.f32 %v2431_v55, %v1011_v56  ;;  %v1062_v35 = vpop.f32.mrb[75].mxu0  ;;  %v1560_v12 = vpop.f32.mrb[75].mxu1 }
 0x1b0   : > { %2042 = vst.msk [vmem:[%s3324_s22 + $0xc0] sm:$0xff] %vm2017_vm1, %v1943_v13  ;;  %v1561_v21 = vadd.f32 %v1560_v12, %v1006_v24 }
 0x1b1   : > { %v1946_v53 = vmax.f32 %v1566_v4, 0.0 }
 0x1b2   : > { %v1945_v15 = vmax.f32 %v1561_v21, 0.0  ;;  %v1065_v43 = vpop.f32.mrb[76].mxu0  ;;  %v2434_v51 = vpop.f32.mrb[76].mxu1 }
 0x1b3   : > { %2045 = vst.msk [vmem:[%s3324_s22 + $0xd8] sm:$0xff] %vm2017_vm1, %v1946_v53  ;;  %v1576_v39 = vadd.f32 %v2434_v51, %v1021_v3  ;;  %v1067_v9 = vpop.f32.mrb[77].mxu0  ;;  %v1570_v1 = vpop.f32.mrb[77].mxu1 }
 0x1b4   : > { %2044 = vst.msk [vmem:[%s3324_s22 + $0xd0] sm:$0xff] %vm2017_vm1, %v1945_v15  ;;  %v1571_v63 = vadd.f32 %v1570_v1, %v1016_v32  ;;  %v1056_v9 = vadd.f32 %v3312_v11, %v3440_v45 }
 0x1b5   : > { %v1948_v33 = vmax.f32 %v1576_v39, 0.0  ;;  %v1061_v39 = vadd.f32 %v3312_v11, %v1060_v19 }
 0x1b6   : > { %v1947_v5 = vmax.f32 %v1571_v63, 0.0  ;;  %v1070_v47 = vpop.f32.mrb[78].mxu0  ;;  %v2437_v59 = vpop.f32.mrb[78].mxu1 }
 0x1b7   : > { %2047 = vst.msk [vmem:[%s3324_s22 + $0xe8] sm:$0xff] %vm2017_vm1, %v1948_v33  ;;  %v1586_v37 = vadd.f32 %v2437_v59, %v1031_v49  ;;  %v1072_v7 = vpop.f32.mrb[79].mxu0  ;;  %v1580_v25 = vpop.f32.mrb[79].mxu1  ;;  %v1071_v59 = vadd.f32 %v3312_v11, %v1070_v47 }
 0x1b8   : > { %2046 = vst.msk [vmem:[%s3324_s22 + $0xe0] sm:$0xff] %vm2017_vm1, %v1947_v5  ;;  %v1581_v61 = vadd.f32 %v1580_v25, %v1026_v27 }
 0x1b9   : > { %v1950_v46 = vmax.f32 %v1586_v37, 0.0  ;;  %v1066_v37 = vadd.f32 %v3312_v11, %v1065_v43 }
 0x1ba   : > { %v1949_v28 = vmax.f32 %v1581_v61, 0.0  ;;  %v1075_v56 = vpop.f32.mrb[80].mxu0  ;;  %v2440_v57 = vpop.f32.mrb[80].mxu1 }
 0x1bb   : > { %2049 = vst.msk [vmem:[%s3324_s22 + $0xf8] sm:$0xff] %vm2017_vm1, %v1950_v46  ;;  %v1596_v24 = vadd.f32 %v2440_v57, %v1041_v29  ;;  %v1077_v13 = vpop.f32.mrb[81].mxu0  ;;  %v1590_v55 = vpop.f32.mrb[81].mxu1  ;;  %v1076_v47 = vadd.f32 %v3312_v11, %v1075_v56 }
 0x1bc   : > { %2048 = vst.msk [vmem:[%s3324_s22 + $0xf0] sm:$0xff] %vm2017_vm1, %v1949_v28  ;;  %v1591_v4 = vadd.f32 %v1590_v55, %v1036_v23 }
 0x1bd   : > { %v1952_v35 = vmax.f32 %v1596_v24, 0.0 }
 0x1be   : > { %v1951_v12 = vmax.f32 %v1591_v4, 0.0  ;;  %v1080_v21 = vpop.f32.mrb[82].mxu0  ;;  %v2443_v3 = vpop.f32.mrb[82].mxu1 }
 0x1bf   : > { %2051 = vst.msk [vmem:[%s3324_s22 + $0x108] sm:$0xff] %vm2017_vm1, %v1952_v35  ;;  %v1606_v53 = vadd.f32 %v2443_v3, %v1051_v38  ;;  %v1082_v32 = vpop.f32.mrb[83].mxu0  ;;  %v1600_v15 = vpop.f32.mrb[83].mxu1  ;;  %v1081_v28 = vadd.f32 %v3312_v11, %v1080_v21 }
 0x1c0   : > { %2050 = vst.msk [vmem:[%s3324_s22 + $0x100] sm:$0xff] %vm2017_vm1, %v1951_v12  ;;  %v1601_v51 = vadd.f32 %v1600_v15, %v1046_v16 }
 0x1c1   : > { %v1954_v41 = vmax.f32 %v1606_v53, 0.0 }
 0x1c2   : > { %v1953_v17 = vmax.f32 %v1601_v51, 0.0  ;;  %v1085_v1 = vpop.f32.mrb[84].mxu0  ;;  %v2446_v63 = vpop.f32.mrb[84].mxu1 }
 0x1c3   : > { %2053 = vst.msk [vmem:[%s3324_s22 + $0x118] sm:$0xff] %vm2017_vm1, %v1954_v41  ;;  %v1616_v49 = vadd.f32 %v2446_v63, %v1061_v39  ;;  %v1087_v33 = vpop.f32.mrb[85].mxu0  ;;  %v1610_v27 = vpop.f32.mrb[85].mxu1  ;;  %v1086_v21 = vadd.f32 %v3312_v11, %v1085_v1 }
 0x1c4   : > { %2052 = vst.msk [vmem:[%s3324_s22 + $0x110] sm:$0xff] %vm2017_vm1, %v1953_v17  ;;  %v1611_v5 = vadd.f32 %v1610_v27, %v1056_v9 }
 0x1c5   : > { %v1956_v19 = vmax.f32 %v1616_v49, 0.0 }
 0x1c6   : > { %v1955_v45 = vmax.f32 %v1611_v5, 0.0  ;;  %v1090_v7 = vpop.f32.mrb[86].mxu0  ;;  %v2449_v25 = vpop.f32.mrb[86].mxu1 }
 0x1c7   : > { %2055 = vst.msk [vmem:[%s3324_s22 + $0x128] sm:$0xff] %vm2017_vm1, %v1956_v19  ;;  %v1626_v61 = vadd.f32 %v2449_v25, %v1071_v59  ;;  %v1092_v29 = vpop.f32.mrb[87].mxu0  ;;  %v1620_v46 = vpop.f32.mrb[87].mxu1  ;;  %v1091_v16 = vadd.f32 %v3312_v11, %v1090_v7 }
 0x1c8   : > { %2054 = vst.msk [vmem:[%s3324_s22 + $0x120] sm:$0xff] %vm2017_vm1, %v1955_v45  ;;  %v1621_v23 = vadd.f32 %v1620_v46, %v1066_v37 }
 0x1c9   : > { %v1958_v57 = vmax.f32 %v1626_v61, 0.0 }
 0x1ca   : > { %v1957_v43 = vmax.f32 %v1621_v23, 0.0  ;;  %v1095_v24 = vpop.f32.mrb[88].mxu0  ;;  %v2452_v13 = vpop.f32.mrb[88].mxu1 }
 0x1cb   : > { %2057 = vst.msk [vmem:[%s3324_s22 + $0x138] sm:$0xff] %vm2017_vm1, %v1958_v57  ;;  %v1636_v55 = vadd.f32 %v2452_v13, %v1081_v28  ;;  %v1097_v4 = vpop.f32.mrb[89].mxu0  ;;  %v1630_v38 = vpop.f32.mrb[89].mxu1  ;;  %v1096_v17 = vadd.f32 %v3312_v11, %v1095_v24 }
 0x1cc   : > { %2056 = vst.msk [vmem:[%s3324_s22 + $0x130] sm:$0xff] %vm2017_vm1, %v1957_v43  ;;  %v1631_v35 = vadd.f32 %v1630_v38, %v1076_v47 }
 0x1cd   : > { %v1960_v12 = vmax.f32 %v1636_v55, 0.0 }
 0x1ce   : > { %v1959_v56 = vmax.f32 %v1631_v35, 0.0  ;;  %v1100_v3 = vpop.f32.mrb[90].mxu0  ;;  %v2455_v53 = vpop.f32.mrb[90].mxu1 }
 0x1cf   : > { %2059 = vst.msk [vmem:[%s3324_s22 + $0x148] sm:$0xff] %vm2017_vm1, %v1960_v12  ;;  %v1646_v32 = vadd.f32 %v2455_v53, %v1091_v16  ;;  %v1102_v15 = vpop.f32.mrb[91].mxu0  ;;  %v1640_v51 = vpop.f32.mrb[91].mxu1  ;;  %v1101_v41 = vadd.f32 %v3312_v11, %v1100_v3 }
 0x1d0   : > { %2058 = vst.msk [vmem:[%s3324_s22 + $0x140] sm:$0xff] %vm2017_vm1, %v1959_v56  ;;  %v1641_v39 = vadd.f32 %v1640_v51, %v1086_v21 }
 0x1d1   : > { %v1962_v9 = vmax.f32 %v1646_v32, 0.0 }
 0x1d2   : > { %v1961_v1 = vmax.f32 %v1641_v39, 0.0  ;;  %v1105_v63 = vpop.f32.mrb[92].mxu0  ;;  %v2458_v49 = vpop.f32.mrb[92].mxu1 }
 0x1d3   : > { %2061 = vst.msk [vmem:[%s3324_s22 + $0x158] sm:$0xff] %vm2017_vm1, %v1962_v9  ;;  %v1656_v33 = vadd.f32 %v2458_v49, %v1101_v41  ;;  %v1107_v27 = vpop.f32.mrb[93].mxu0  ;;  %v1650_v5 = vpop.f32.mrb[93].mxu1  ;;  %v1106_v37 = vadd.f32 %v3312_v11, %v1105_v63 }
 0x1d4   : > { %2060 = vst.msk [vmem:[%s3324_s22 + $0x150] sm:$0xff] %vm2017_vm1, %v1961_v1  ;;  %v1651_v59 = vadd.f32 %v1650_v5, %v1096_v17 }
 0x1d5   : > { %v1964_v19 = vmax.f32 %v1656_v33, 0.0 }
 0x1d6   : > { %v1963_v45 = vmax.f32 %v1651_v59, 0.0  ;;  %v1110_v7 = vpop.f32.mrb[94].mxu0  ;;  %v2461_v25 = vpop.f32.mrb[94].mxu1 }
 0x1d7   : > { %2063 = vst.msk [vmem:[%s3324_s22 + $0x168] sm:$0xff] %vm2017_vm1, %v1964_v19  ;;  %v1111_v61 = vadd.f32 %v3312_v11, %v1110_v7  ;;  %v1112_v29 = vpop.f32.mrb[95].mxu0  ;;  %v1660_v46 = vpop.f32.mrb[95].mxu1 }
 0x1d8   : > { %2062 = vst.msk [vmem:[%s3324_s22 + $0x160] sm:$0xff] %vm2017_vm1, %v1963_v45  ;;  %v1661_v23 = vadd.f32 %v1660_v46, %v1106_v37 }
 0x1d9   : > { %v1666_v28 = vadd.f32 %v2461_v25, %v1111_v61 }
 0x1da   : > { %v1965_v57 = vmax.f32 %v1661_v23, 0.0  ;;  %v1115_v47 = vpop.f32.mrb[96].mxu0  ;;  %v2464_v43 = vpop.f32.mrb[96].mxu1 }
 0x1db   : > { %v1966_v24 = vmax.f32 %v1666_v28, 0.0  ;;  %v1116_v13 = vadd.f32 %v3312_v11, %v1115_v47  ;;  %v1117_v55 = vpop.f32.mrb[97].mxu0  ;;  %v1670_v4 = vpop.f32.mrb[97].mxu1 }
 0x1dc   : > { %2064 = vst.msk [vmem:[%s3324_s22 + $0x170] sm:$0xff] %vm2017_vm1, %v1965_v57 }
 0x1dd   : > { %2065 = vst.msk [vmem:[%s3324_s22 + $0x178] sm:$0xff] %vm2017_vm1, %v1966_v24  ;;  %v1671_v38 = vadd.f32 %v1670_v4, %v1116_v13 }
 0x1de   : > { %v1120_v35 = vpop.f32.mrb[98].mxu0  ;;  %v2467_v16 = vpop.f32.mrb[98].mxu1 }
 0x1df   : > { %v1967_v12 = vmax.f32 %v1671_v38, 0.0  ;;  %v1121_v21 = vadd.f32 %v3312_v11, %v1120_v35  ;;  %v1122_v56 = vpop.f32.mrb[99].mxu0  ;;  %v1680_v3 = vpop.f32.mrb[99].mxu1 }
 0x1e1   : > { %2066 = vst.msk [vmem:[%s3324_s22 + $0x180] sm:$0xff] %vm2017_vm1, %v1967_v12  ;;  %v1676_v53 = vadd.f32 %v2464_v43, %v1121_v21 }
 0x1e2   : > { %v1125_v32 = vpop.f32.mrb[100].mxu0  ;;  %v2470_v15 = vpop.f32.mrb[100].mxu1 }
 0x1e3   : > { %v1968_v51 = vmax.f32 %v1676_v53, 0.0  ;;  %v1126_v39 = vadd.f32 %v3312_v11, %v1125_v32  ;;  %v1127_v41 = vpop.f32.mrb[101].mxu0  ;;  %v1690_v9 = vpop.f32.mrb[101].mxu1 }
 0x1e5   : > { %2067 = vst.msk [vmem:[%s3324_s22 + $0x188] sm:$0xff] %vm2017_vm1, %v1968_v51  ;;  %v1681_v17 = vadd.f32 %v1680_v3, %v1126_v39 }
 0x1e6   : > { %v1130_v1 = vpop.f32.mrb[102].mxu0  ;;  %v2473_v63 = vpop.f32.mrb[102].mxu1 }
 0x1e7   : > { %v1969_v49 = vmax.f32 %v1681_v17, 0.0  ;;  %v1131_v33 = vadd.f32 %v3312_v11, %v1130_v1  ;;  %v1132_v27 = vpop.f32.mrb[103].mxu0  ;;  %v1700_v5 = vpop.f32.mrb[103].mxu1 }
 0x1e9   : > { %2068 = vst.msk [vmem:[%s3324_s22 + $0x190] sm:$0xff] %vm2017_vm1, %v1969_v49  ;;  %v1686_v59 = vadd.f32 %v2467_v16, %v1131_v33 }
 0x1ea   : > { %v1135_v19 = vpop.f32.mrb[104].mxu0  ;;  %v2476_v37 = vpop.f32.mrb[104].mxu1 }
 0x1eb   : > { %v1970_v45 = vmax.f32 %v1686_v59, 0.0  ;;  %v1136_v7 = vadd.f32 %v3312_v11, %v1135_v19  ;;  %v1137_v25 = vpop.f32.mrb[105].mxu0  ;;  %v1710_v61 = vpop.f32.mrb[105].mxu1 }
 0x1ed   : > { %2069 = vst.msk [vmem:[%s3324_s22 + $0x198] sm:$0xff] %vm2017_vm1, %v1970_v45  ;;  %v1691_v29 = vadd.f32 %v1690_v9, %v1136_v7 }
 0x1ee   : > { %v1140_v46 = vpop.f32.mrb[106].mxu0  ;;  %v2479_v23 = vpop.f32.mrb[106].mxu1 }
 0x1ef   : > { %v1971_v28 = vmax.f32 %v1691_v29, 0.0  ;;  %v1141_v57 = vadd.f32 %v3312_v11, %v1140_v46  ;;  %v1142_v47 = vpop.f32.mrb[107].mxu0  ;;  %v1720_v43 = vpop.f32.mrb[107].mxu1 }
 0x1f1   : > { %2070 = vst.msk [vmem:[%s3324_s22 + $0x1a0] sm:$0xff] %vm2017_vm1, %v1971_v28  ;;  %v1696_v24 = vadd.f32 %v2470_v15, %v1141_v57 }
 0x1f2   : > { %v1145_v13 = vpop.f32.mrb[108].mxu0  ;;  %v3543_v55 = vpop.f32.mrb[108].mxu1 }
 0x1f3   : > { %v1972_v4 = vmax.f32 %v1696_v24, 0.0  ;;  %v1146_v38 = vadd.f32 %v3312_v11, %v1145_v13  ;;  %v1147_v35 = vpop.f32.mrb[109].mxu0  ;;  %v1730_v16 = vpop.f32.mrb[109].mxu1 }
 0x1f5   : > { %2071 = vst.msk [vmem:[%s3324_s22 + $0x1a8] sm:$0xff] %vm2017_vm1, %v1972_v4  ;;  %v1701_v12 = vadd.f32 %v1700_v5, %v1146_v38 }
 0x1f6   : > { %v1150_v21 = vpop.f32.mrb[110].mxu0  ;;  %v3548_v56 = vpop.f32.mrb[110].mxu1 }
 0x1f7   : > { %v1973_v3 = vmax.f32 %v1701_v12, 0.0  ;;  %v1151_v53 = vadd.f32 %v3312_v11, %v1150_v21  ;;  %v1152_v32 = vpop.f32.mrb[111].mxu0  ;;  %v3551_v15 = vpop.f32.mrb[111].mxu1 }
 0x1f9   : > { %2072 = vst.msk [vmem:[%s3324_s22 + $0x1b0] sm:$0xff] %vm2017_vm1, %v1973_v3  ;;  %v1706_v51 = vadd.f32 %v2473_v63, %v1151_v53 }
 0x1fa   : > { %v1155_v39 = vpop.f32.mrb[112].mxu0  ;;  %v3555_v41 = vpop.f32.mrb[112].mxu1 }
 0x1fb   : > { %v1974_v9 = vmax.f32 %v1706_v51, 0.0  ;;  %v1156_v17 = vadd.f32 %v3312_v11, %v1155_v39  ;;  %v1157_v1 = vpop.f32.mrb[113].mxu0  ;;  %v3558_v49 = vpop.f32.mrb[113].mxu1  ;;  %v1251_v39 = vadd.f32 %v3312_v11, %v3110_v26  ;;  %v1261_v26 = vadd.f32 %v3312_v11, %v3130_v42 }
 0x1fd   : > { %2073 = vst.msk [vmem:[%s3324_s22 + $0x1b8] sm:$0xff] %vm2017_vm1, %v1974_v9  ;;  %v1711_v33 = vadd.f32 %v1710_v61, %v1156_v17  ;;  %v1246_v17 = vadd.f32 %v3312_v11, %v3100_v18 }
 0x1fe   : > { %v1160_v27 = vpop.f32.mrb[114].mxu0  ;;  %v3562_v5 = vpop.f32.mrb[114].mxu1 }
 0x1ff   : > { %v1975_v59 = vmax.f32 %v1711_v33, 0.0  ;;  %v1161_v19 = vadd.f32 %v3312_v11, %v1160_v27  ;;  %v1162_v63 = vpop.f32.mrb[115].mxu0  ;;  %v3565_v45 = vpop.f32.mrb[115].mxu1 }
 0x201   : > { %2074 = vst.msk [vmem:[%s3324_s22 + $0x1c0] sm:$0xff] %vm2017_vm1, %v1975_v59  ;;  %v1716_v7 = vadd.f32 %v2476_v37, %v1161_v19 }
 0x202   : > { %v1165_v25 = vpop.f32.mrb[116].mxu0  ;;  %v3569_v29 = vpop.f32.mrb[116].mxu1 }
 0x203   : > { %v1976_v46 = vmax.f32 %v1716_v7, 0.0  ;;  %v1166_v28 = vadd.f32 %v3312_v11, %v1165_v25  ;;  %v1167_v61 = vpop.f32.mrb[117].mxu0  ;;  %v3572_v57 = vpop.f32.mrb[117].mxu1  ;;  %v1256_v25 = vadd.f32 %v3312_v11, %v3120_v34 }
 0x205   : > { %2075 = vst.msk [vmem:[%s3324_s22 + $0x1c8] sm:$0xff] %vm2017_vm1, %v1976_v46  ;;  %v1721_v47 = vadd.f32 %v1720_v43, %v1166_v28 }
 0x206   : > { %v1170_v24 = vpop.f32.mrb[118].mxu0  ;;  %v3576_v13 = vpop.f32.mrb[118].mxu1 }
 0x207   : > { %v1977_v4 = vmax.f32 %v1721_v47, 0.0  ;;  %v1171_v38 = vadd.f32 %v3312_v11, %v1170_v24  ;;  %v1172_v37 = vpop.f32.mrb[119].mxu0  ;;  %v3579_v35 = vpop.f32.mrb[119].mxu1 }
 0x208   : > { %v1271_v37 = vadd.f32 %v3312_v11, %v3150_v58 }
 0x209   : > { %2076 = vst.msk [vmem:[%s3324_s22 + $0x1d0] sm:$0xff] %vm2017_vm1, %v1977_v4  ;;  %v1726_v12 = vadd.f32 %v2479_v23, %v1171_v38 }
 0x20a   : > { %v1175_v21 = vpop.f32.mrb[120].mxu0  ;;  %v3583_v3 = vpop.f32.mrb[120].mxu1 }
 0x20b   : > { %v1978_v53 = vmax.f32 %v1726_v12, 0.0  ;;  %v1176_v32 = vadd.f32 %v3312_v11, %v1175_v21  ;;  %v1177_v43 = vpop.f32.mrb[121].mxu0  ;;  %v3586_v51 = vpop.f32.mrb[121].mxu1  ;;  %v1266_v21 = vadd.f32 %v3312_v11, %v3140_v50 }
 0x20d   : > { %2077 = vst.msk [vmem:[%s3324_s22 + $0x1d8] sm:$0xff] %vm2017_vm1, %v1978_v53  ;;  %v1731_v9 = vadd.f32 %v1730_v16, %v1176_v32 }
 0x20e   : > { %v1180_v23 = vpop.f32.mrb[122].mxu0  ;;  %v2503_v1 = vpop.f32.mrb[122].mxu1 }
 0x20f   : > { %v1979_v33 = vmax.f32 %v1731_v9, 0.0  ;;  %v1181_v27 = vadd.f32 %v3312_v11, %v1180_v23  ;;  %v1806_v59 = vadd.f32 %v2503_v1, %v1251_v39  ;;  %v1182_v19 = vpop.f32.mrb[123].mxu0  ;;  %v1800_v63 = vpop.f32.mrb[123].mxu1  ;;  %v1281_v1 = vadd.f32 %v3312_v11, %v3170_v10 }
 0x210   : > { %v1801_v7 = vadd.f32 %v1800_v63, %v1246_v17 }
 0x211   : > { %2078 = vst.msk [vmem:[%s3324_s22 + $0x1e0] sm:$0xff] %vm2017_vm1, %v1979_v33  ;;  %v1736_v16 = vadd.f32 %v3543_v55, %v1181_v27  ;;  %v1994_v18 = vmax.f32 %v1806_v59, 0.0  ;;  %v1276_v27 = vadd.f32 %v3312_v11, %v3160_v2 }
 0x212   : > { %v1993_v46 = vmax.f32 %v1801_v7, 0.0  ;;  %v1185_v28 = vpop.f32.mrb[124].mxu0  ;;  %v2506_v61 = vpop.f32.mrb[124].mxu1 }
 0x213   : > { %v1980_v47 = vmax.f32 %v1736_v16, 0.0  ;;  %2093 = vst.msk [vmem:[%s3324_s22 + $0x258] sm:$0xff] %vm2017_vm1, %v1994_v18  ;;  %v1186_v24 = vadd.f32 %v3312_v11, %v1185_v28  ;;  %v1816_v4 = vadd.f32 %v2506_v61, %v1261_v26  ;;  %v1187_v42 = vpop.f32.mrb[125].mxu0  ;;  %v1810_v38 = vpop.f32.mrb[125].mxu1  ;;  %v1286_v28 = vadd.f32 %v3312_v11, %v3180_v20 }
 0x214   : > { %2092 = vst.msk [vmem:[%s3324_s22 + $0x250] sm:$0xff] %vm2017_vm1, %v1993_v46  ;;  %v1811_v55 = vadd.f32 %v1810_v38, %v1256_v25  ;;  %v1291_v25 = vadd.f32 %v3312_v11, %v3190_v30 }
 0x215   : > { %2079 = vst.msk [vmem:[%s3324_s22 + $0x1e8] sm:$0xff] %vm2017_vm1, %v1980_v47  ;;  %v1741_v34 = vadd.f32 %v3551_v15, %v1186_v24  ;;  %v1996_v12 = vmax.f32 %v1816_v4, 0.0 }
 0x216   : > { %v1995_v53 = vmax.f32 %v1811_v55, 0.0  ;;  %v1190_v32 = vpop.f32.mrb[126].mxu0  ;;  %v2509_v43 = vpop.f32.mrb[126].mxu1 }
 0x217   : > { %v1981_v39 = vmax.f32 %v1741_v34, 0.0  ;;  %2095 = vst.msk [vmem:[%s3324_s22 + $0x268] sm:$0xff] %vm2017_vm1, %v1996_v12  ;;  %v1191_v9 = vadd.f32 %v3312_v11, %v1190_v32  ;;  %v1826_v17 = vadd.f32 %v2509_v43, %v1271_v37  ;;  %v1192_v58 = vpop.f32.mrb[127].mxu0  ;;  %v1820_v23 = vpop.f32.mrb[127].mxu1  ;;  %v1301_v37 = vadd.f32 %v3312_v11, %v3210_v52 }
 0x218   : > { %2094 = vst.msk [vmem:[%s3324_s22 + $0x260] sm:$0xff] %vm2017_vm1, %v1995_v53  ;;  %v1821_v15 = vadd.f32 %v1820_v23, %v1266_v21  ;;  %v1296_v12 = vadd.f32 %v3312_v11, %v3200_v40  ;;  %v1311_v58 = vadd.f32 %v3312_v11, %v3230_v8 }
 0x219   : > { %2080 = vst.msk [vmem:[%s3324_s22 + $0x1f0] sm:$0xff] %vm2017_vm1, %v1981_v39  ;;  %v1746_v50 = vadd.f32 %v3548_v56, %v1191_v9  ;;  %v1998_v33 = vmax.f32 %v1826_v17, 0.0 }
 0x21a   : > { %v1997_v59 = vmax.f32 %v1821_v15, 0.0  ;;  %v1195_v19 = vpop.f32.mrb[128].mxu0  ;;  %v2512_v63 = vpop.f32.mrb[128].mxu1  ;;  %v1306_v15 = vadd.f32 %v3312_v11, %v3220_v62 }
 0x21b   : > { %v1982_v7 = vmax.f32 %v1746_v50, 0.0  ;;  %2097 = vst.msk [vmem:[%s3324_s22 + $0x278] sm:$0xff] %vm2017_vm1, %v1998_v33  ;;  %v1196_v26 = vadd.f32 %v3312_v11, %v1195_v19  ;;  %v1836_v16 = vadd.f32 %v2512_v63, %v1281_v1  ;;  %v1197_v10 = vpop.f32.mrb[129].mxu0  ;;  %v1830_v18 = vpop.f32.mrb[129].mxu1 }
 0x21c   : > { %2096 = vst.msk [vmem:[%s3324_s22 + $0x270] sm:$0xff] %vm2017_vm1, %v1997_v59  ;;  %v1831_v56 = vadd.f32 %v1830_v18, %v1276_v27 }
 0x21d   : > { %2081 = vst.msk [vmem:[%s3324_s22 + $0x1f8] sm:$0xff] %vm2017_vm1, %v1982_v7  ;;  %v1751_v2 = vadd.f32 %v3558_v49, %v1196_v26  ;;  %v2000_v46 = vmax.f32 %v1836_v16, 0.0  ;;  %v1316_v16 = vadd.f32 %v3312_v11, %v3240_v22 }
 0x21e   : > { %v1999_v61 = vmax.f32 %v1831_v56, 0.0  ;;  %v1200_v47 = vpop.f32.mrb[130].mxu0  ;;  %v2515_v24 = vpop.f32.mrb[130].mxu1 }
 0x21f   : > { %v1983_v4 = vmax.f32 %v1751_v2, 0.0  ;;  %2099 = vst.msk [vmem:[%s3324_s22 + $0x288] sm:$0xff] %vm2017_vm1, %v2000_v46  ;;  %v1201_v42 = vadd.f32 %v3312_v11, %v1200_v47  ;;  %v1846_v38 = vadd.f32 %v2515_v24, %v1291_v25  ;;  %v1202_v30 = vpop.f32.mrb[131].mxu0  ;;  %v1840_v55 = vpop.f32.mrb[131].mxu1  ;;  %v3679_v2 = vld [vmem:[%s3750_s2] ss:$0 sm:$0xff] }
 0x220   : > { %2098 = vst.msk [vmem:[%s3324_s22 + $0x280] sm:$0xff] %vm2017_vm1, %v1999_v61  ;;  %v1841_v49 = vadd.f32 %v1840_v55, %v1286_v28  ;;  %v1326_v24 = vadd.f32 %v3679_v2, %v3260_v48 }
 0x221   : > { %2082 = vst.msk [vmem:[%s3324_s22 + $0x200] sm:$0xff] %vm2017_vm1, %v1983_v4  ;;  %v1756_v20 = vadd.f32 %v3555_v41, %v1201_v42  ;;  %v2002_v34 = vmax.f32 %v1846_v38, 0.0 }
 0x222   : > { %v2001_v21 = vmax.f32 %v1841_v49, 0.0  ;;  %v1205_v53 = vpop.f32.mrb[132].mxu0  ;;  %v2518_v32 = vpop.f32.mrb[132].mxu1 }
 0x223   : > { %v1984_v43 = vmax.f32 %v1756_v20, 0.0  ;;  %2101 = vst.msk [vmem:[%s3324_s22 + $0x298] sm:$0xff] %vm2017_vm1, %v2002_v34  ;;  %v1206_v39 = vadd.f32 %v3312_v11, %v1205_v53  ;;  %v1856_v9 = vadd.f32 %v2518_v32, %v1301_v37  ;;  %v1207_v52 = vpop.f32.mrb[133].mxu0  ;;  %v1850_v17 = vpop.f32.mrb[133].mxu1  ;;  %v1341_v20 = vadd.f32 %v3679_v2, %v3289_v31 }
 0x224   : > { %2100 = vst.msk [vmem:[%s3324_s22 + $0x290] sm:$0xff] %vm2017_vm1, %v2001_v21  ;;  %v1851_v41 = vadd.f32 %v1850_v17, %v1296_v12  ;;  %v1336_v12 = vadd.f32 %v3679_v2, %v3280_v14  ;;  %v1351_v17 = vadd.f32 %v3679_v2, %v3299_v54 }
 0x225   : > { %2083 = vst.msk [vmem:[%s3324_s22 + $0x208] sm:$0xff] %vm2017_vm1, %v1984_v43  ;;  %v1761_v40 = vadd.f32 %v3565_v45, %v1206_v39  ;;  %v2004_v23 = vmax.f32 %v1856_v9, 0.0  ;;  %v1321_v45 = vadd.f32 %v3312_v11, %v3250_v36 }
 0x226   : > { %v2003_v1 = vmax.f32 %v1851_v41, 0.0  ;;  %v1210_v50 = vpop.f32.mrb[134].mxu0  ;;  %v2521_v33 = vpop.f32.mrb[134].mxu1 }
 0x227   : > { %v1985_v27 = vmax.f32 %v1761_v40, 0.0  ;;  %2103 = vst.msk [vmem:[%s3324_s22 + $0x2a8] sm:$0xff] %vm2017_vm1, %v2004_v23  ;;  %v1211_v59 = vadd.f32 %v3312_v11, %v1210_v50  ;;  %v1866_v19 = vadd.f32 %v2521_v33, %v1311_v58  ;;  %v1212_v8 = vpop.f32.mrb[135].mxu0  ;;  %v1860_v63 = vpop.f32.mrb[135].mxu1  ;;  %v1331_v11 = vadd.f32 %v3679_v2, %v3270_v0 }
 0x228   : > { %2102 = vst.msk [vmem:[%s3324_s22 + $0x2a0] sm:$0xff] %vm2017_vm1, %v2003_v1  ;;  %v1861_v7 = vadd.f32 %v1860_v63, %v1306_v15  ;;  %v1346_v58 = vadd.f32 %v3679_v2, %v3295_v44  ;;  %v1356_v8 = vadd.f32 %v3679_v2, %v3303_v60 }
 0x229   : > { %2084 = vst.msk [vmem:[%s3324_s22 + $0x210] sm:$0xff] %vm2017_vm1, %v1985_v27  ;;  %v1766_v62 = vadd.f32 %v3562_v5, %v1211_v59  ;;  %v2006_v26 = vmax.f32 %v1866_v19, 0.0  ;;  %v1361_v59 = vadd.f32 %v3679_v2, %v3307_v6 }
 0x22a   : > { %v2005_v10 = vmax.f32 %v1861_v7, 0.0  ;;  %v1215_v18 = vpop.f32.mrb[136].mxu0  ;;  %v2524_v56 = vpop.f32.mrb[136].mxu1 }
 0x22b   : > { %v1986_v25 = vmax.f32 %v1766_v62, 0.0  ;;  %2105 = vst.msk [vmem:[%s3324_s22 + $0x2b8] sm:$0xff] %vm2017_vm1, %v2006_v26  ;;  %v1216_v36 = vadd.f32 %v3679_v2, %v1215_v18  ;;  %v1876_v5 = vadd.f32 %v2524_v56, %v1321_v45  ;;  %v1217_v46 = vpop.f32.mrb[137].mxu0  ;;  %v1870_v28 = vpop.f32.mrb[137].mxu1 }
 0x22c   : > { %2104 = vst.msk [vmem:[%s3324_s22 + $0x2b0] sm:$0xff] %vm2017_vm1, %v2005_v10  ;;  %v1871_v22 = vadd.f32 %v1870_v28, %v1316_v16 }
 0x22d   : > { %2085 = vst.msk [vmem:[%s3324_s22 + $0x218] sm:$0xff] %vm2017_vm1, %v1986_v25  ;;  %v1771_v61 = vadd.f32 %v3572_v57, %v1216_v36  ;;  %v2008_v47 = vmax.f32 %v1876_v5, 0.0 }
 0x22e   : > { %v2007_v4 = vmax.f32 %v1871_v22, 0.0  ;;  %v1220_v42 = vpop.f32.mrb[138].mxu0  ;;  %v2527_v38 = vpop.f32.mrb[138].mxu1 }
 0x22f   : > { %v1987_v30 = vmax.f32 %v1771_v61, 0.0  ;;  %2107 = vst.msk [vmem:[%s3324_s22 + $0x2c8] sm:$0xff] %vm2017_vm1, %v2008_v47  ;;  %v1221_v55 = vadd.f32 %v3679_v2, %v1220_v42  ;;  %v1886_v49 = vadd.f32 %v2527_v38, %v1331_v11  ;;  %v1222_v0 = vpop.f32.mrb[139].mxu0  ;;  %v1880_v37 = vpop.f32.mrb[139].mxu1 }
 0x230   : > { %2106 = vst.msk [vmem:[%s3324_s22 + $0x2c0] sm:$0xff] %vm2017_vm1, %v2007_v4  ;;  %v1881_v57 = vadd.f32 %v1880_v37, %v1326_v24 }
 0x231   : > { %2086 = vst.msk [vmem:[%s3324_s22 + $0x220] sm:$0xff] %vm2017_vm1, %v1987_v30  ;;  %v1776_v48 = vadd.f32 %v3569_v29, %v1221_v55  ;;  %v2010_v34 = vmax.f32 %v1886_v49, 0.0 }
 0x232   : > { %v2009_v21 = vmax.f32 %v1881_v57, 0.0  ;;  %v1225_v53 = vpop.f32.mrb[140].mxu0  ;;  %v2530_v32 = vpop.f32.mrb[140].mxu1 }
 0x233   : > { %v1988_v43 = vmax.f32 %v1776_v48, 0.0  ;;  %2109 = vst.msk [vmem:[%s3324_s22 + $0x2d8] sm:$0xff] %vm2017_vm1, %v2010_v34  ;;  %v1226_v39 = vadd.f32 %v3679_v2, %v1225_v53  ;;  %v1896_v9 = vadd.f32 %v2530_v32, %v1341_v20  ;;  %v1227_v31 = vpop.f32.mrb[141].mxu0  ;;  %v1890_v52 = vpop.f32.mrb[141].mxu1 }
 0x234   : > { %2108 = vst.msk [vmem:[%s3324_s22 + $0x2d0] sm:$0xff] %vm2017_vm1, %v2009_v21  ;;  %v1891_v29 = vadd.f32 %v1890_v52, %v1336_v12 }
 0x235   : > { %2087 = vst.msk [vmem:[%s3324_s22 + $0x228] sm:$0xff] %vm2017_vm1, %v1988_v43  ;;  %v1781_v14 = vadd.f32 %v3579_v35, %v1226_v39  ;;  %v2012_v41 = vmax.f32 %v1896_v9, 0.0 }
 0x236   : > { %v2011_v40 = vmax.f32 %v1891_v29, 0.0  ;;  %v1230_v23 = vpop.f32.mrb[142].mxu0  ;;  %v2533_v15 = vpop.f32.mrb[142].mxu1 }
 0x237   : > { %v1989_v1 = vmax.f32 %v1781_v14, 0.0  ;;  %2111 = vst.msk [vmem:[%s3324_s22 + $0x2e8] sm:$0xff] %vm2017_vm1, %v2012_v41  ;;  %v1231_v50 = vadd.f32 %v3679_v2, %v1230_v23  ;;  %v1906_v33 = vadd.f32 %v2533_v15, %v1351_v17  ;;  %v1232_v54 = vpop.f32.mrb[143].mxu0  ;;  %v1900_v27 = vpop.f32.mrb[143].mxu1 }
 0x238   : > { %2110 = vst.msk [vmem:[%s3324_s22 + $0x2e0] sm:$0xff] %vm2017_vm1, %v2011_v40  ;;  %v1901_v35 = vadd.f32 %v1900_v27, %v1346_v58 }
 0x239   : > { %2088 = vst.msk [vmem:[%s3324_s22 + $0x230] sm:$0xff] %vm2017_vm1, %v1989_v1  ;;  %v1786_v44 = vadd.f32 %v3576_v13, %v1231_v50  ;;  %v2014_v19 = vmax.f32 %v1906_v33, 0.0 }
 0x23a   : > { %v2013_v63 = vmax.f32 %v1901_v35, 0.0  ;;  %v1235_v7 = vpop.f32.mrb[144].mxu0  ;;  %v2536_v45 = vpop.f32.mrb[144].mxu1 }
 0x23b   : > { %v1990_v62 = vmax.f32 %v1786_v44, 0.0  ;;  %2113 = vst.msk [vmem:[%s3324_s22 + $0x2f8] sm:$0xff] %vm2017_vm1, %v2014_v19  ;;  %v1236_v26 = vadd.f32 %v3679_v2, %v1235_v7  ;;  %v1916_v6 = vadd.f32 %v2536_v45, %v1361_v59  ;;  %v1237_v16 = vpop.f32.mrb[145].mxu0  ;;  %v1910_v10 = vpop.f32.mrb[145].mxu1 }
 0x23c   : > { %2112 = vst.msk [vmem:[%s3324_s22 + $0x2f0] sm:$0xff] %vm2017_vm1, %v2013_v63  ;;  %v1911_v13 = vadd.f32 %v1910_v10, %v1356_v8 }
 0x23d   : > { %2089 = vst.msk [vmem:[%s3324_s22 + $0x238] sm:$0xff] %vm2017_vm1, %v1990_v62  ;;  %v1791_v60 = vadd.f32 %v3586_v51, %v1236_v26  ;;  %v2016_v18 = vmax.f32 %v1916_v6, 0.0 }
 0x23e   : > { %v2015_v56 = vmax.f32 %v1911_v13, 0.0  ;;  %v1240_v25 = vpop.f32.mrb[146].mxu0 }
 0x23f   : > { %v1991_v36 = vmax.f32 %v1791_v60, 0.0  ;;  %2115 = vst.msk [vmem:[%s3324_s22 + $0x308] sm:$0xff] %vm2017_vm1, %v2016_v18  ;;  %v1241_v5 = vadd.f32 %v3679_v2, %v1240_v25  ;;  %v1242_v46 = vpop.f32.mrb[147].mxu0 }
 0x240   : > { %2114 = vst.msk [vmem:[%s3324_s22 + $0x300] sm:$0xff] %vm2017_vm1, %v2015_v56 }
 0x241   : > { %2090 = vst.msk [vmem:[%s3324_s22 + $0x240] sm:$0xff] %vm2017_vm1, %v1991_v36  ;;  %v1796_v28 = vadd.f32 %v3583_v3, %v1241_v5 }
 0x243   : > { %v1992_v22 = vmax.f32 %v1796_v28, 0.0 }
 0x245   : > { %2091 = vst.msk [vmem:[%s3324_s22 + $0x248] sm:$0xff] %vm2017_vm1, %v1992_v22 }
 0x246 PF: > { %s13_s12 = sadd.s32 1, %s2642_s12  }
 0x247   : > { %p10_p4 = scmp.ge.s32.totalorder %s13_s12, 4  }
 0x249   :  { %12 = sbr.rel (!%p10_p4) target bundleno = 1 (0x1), region = 62 }

// kernel: simple_cnn_forward.5
= control target key start
LH: loop header
LB: loop body
LE: loop exit
PB: predicated region body
PF: predicated region fallthrough
CT: control target
= control target key end

     0   :  { %10 = vsyncpa [#allocation4], 0  ;;  %s7306_s18 = smov 0   ;;  %s7308_s19 = smov 0   ;;  %s7984_s0 = inlined_call_operand.vmem [shape: bf16[2,50176], index: 0, kind: input, shape index: {}]   ;;  %s7985_s1 = inlined_call_operand.vmem [shape: bf16[50176,128], index: 1, kind: input, shape index: {}]   ;;  %s7986_s2 = inlined_call_operand.vmem [shape: f32[1,128], index: 2, kind: input, shape index: {}]   ;;  %s7987_s3 = inlined_call_operand.vmem [shape: f32[128,10], index: 3, kind: input, shape index: {}]   ;;  %s7988_s4 = inlined_call_operand.vmem [shape: f32[1,10], index: 4, kind: input, shape index: {}]   ;;  %s7989_s5 = inlined_call_operand.hbm [shape: f32[2,10], index: 5, kind: output, shape index: {}]  }
   0x1   :  { %s7310_s20 = smov 0  }
   0x2 LB: > { %s5572_s21 = sadd.s32 4294967295, %s7268_s20   ;;  %s25_s22 = sadd.s32 1, %s7264_s19  ;;  %s7268_s20 = sphi %s7310_s20, %s16_s20   ;;  %s7264_s19 = sphi %s7308_s19, %s7992_s19   ;;  %s7260_s18 = sphi %s7306_s18, %s7991_s18  }
   0x3   : > { %p26_p0 = scmp.ge.s32.totalorder %s25_s22, 7  ;;  %p5575_p1 = scmp.ge.s32.totalorder %s7268_s20, 1 }
   0x4   : > { %p217_p2 = scmp.lt.s32.totalorder %s7268_s20, 8 }
   0x5   : > { %s7994_s22 = smov (%p26_p0, %s25_s22), 0 }
   0x6   : > { %p218_p3 = pnand %p5575_p1, %p217_p2 }
   0x7   : > { %s248_s23 = smul.u32 (!%p218_p3), 56, %s7260_s18  ;;  %p5577_p6 = scmp.ne.s32.totalorder (!%p218_p3), %s7260_s18, 0 }
   0x8   : > { %221 = sbr.rel (%p218_p3) target bundleno = 947 (0x3b3), region = 40 }
   0x9   : > { %s257_s24 = smul.u32 (!%p218_p3), 896, %s7260_s18  ;;  %p251_p4 = scmp.lt.s32.totalorder (!%p218_p3), %s248_s23, 391 }
   0xb   : > { %p258_p5 = scmp.lt.s32.totalorder (!%p218_p3), %s257_s24, 6271 }
   0xf   : > { %s7996_s23 = smov (!%p251_p4, %s248_s23), 391  ;;  %s7998_s24 = smov (!%p258_p5, %s257_s24), 6271 }
  0x10   : > { %s7332_s27 = scalar_lea.vmem %s7984_s0, %s7996_s23  ;;  %s5576_s28 = sshll.u32 %s7998_s24, 2  ;;  %v7270_v0 = vmov (!%p5577_p6), 0.0  }
  0x11   : > { %s7337_s6 = scalar_lea.vmem %s7985_s1, %s5576_s28  ;;  %267 = sbr.rel (%p5577_p6) target bundleno = 24 (0x18), region = 44  ;;  %268 = vst [vmem:[#allocation2] sm:$0x3] (!%p5577_p6), %v7270_v0 }
  0x18 PF: > { %v6761_v1 = vld [vmem:[%s7337_s6 + $0x40] sm:$0xff]   ;;  %v6765_v5 = vld [vmem:[%s7337_s6 + $0x48] sm:$0xff]   ;;  %v6769_v9 = vld [vmem:[%s7337_s6 + $0x50] sm:$0xff]   ;;  %v1184_v29 = vlaneseq  ;;  %v7271_v37 = vmov 1966171168   ;;  %p6026_p7 = scmp.ne.s32.totalorder %s7260_s18, 6 }
  0x19   : > { %v6762_v2 = vld [vmem:[%s7337_s6 + $0xc0] sm:$0xff]   ;;  %6033 = vmatprep.subr.bf16.mxu0 %v6761_v1  ;;  %v6766_v6 = vld [vmem:[%s7337_s6 + $0xc8] sm:$0xff]   ;;  %v6770_v10 = vld [vmem:[%s7337_s6 + $0xd0] sm:$0xff]   ;;  %v1182_v38 = vunpack.c.l.s4 %v7271_v37  ;;  %vm7273_vm0 = vmmov (!%p6026_p7), 0   ;;  %vm5496_vm1 = vcmask (!%p6026_p7), 74752  }
  0x1a   : > { %v6763_v3 = vld [vmem:[%s7337_s6] sm:$0xff]   ;;  %6055 = vmatprep.subr.bf16.mxu1 %v6762_v2  ;;  %v6767_v7 = vld [vmem:[%s7337_s6 + $0x8] sm:$0xff]   ;;  %v6771_v11 = vld [vmem:[%s7337_s6 + $0x10] sm:$0xff]   ;;  %v1185_v34 = vshrl.u32 %v1184_v29, 7 }
  0x1b   : > { %v6764_v4 = vld [vmem:[%s7337_s6 + $0x80] sm:$0xff]   ;;  %6034 = vmatpush3.bf16.msra.mxu0 %v6763_v3  ;;  %v6768_v8 = vld [vmem:[%s7337_s6 + $0x88] sm:$0xff]   ;;  %v6772_v12 = vld [vmem:[%s7337_s6 + $0x90] sm:$0xff]   ;;  %v1183_v41 = vunpack.c.0.s8 %v1182_v38 }
  0x1c   : > { %6056 = vmatpush3.bf16.msra.mxu1 %v6764_v4  ;;  %6035 = vmatprep.subr.bf16.mxu0 %v6765_v5  ;;  %v6773_v13 = vld [vmem:[%s7337_s6 + $0x58] sm:$0xff]   ;;  %v6777_v17 = vld [vmem:[%s7337_s6 + $0x60] sm:$0xff]   ;;  %v6781_v21 = vld [vmem:[%s7337_s6 + $0x68] sm:$0xff]  }
  0x1d   : > { %6057 = vmatprep.subr.bf16.mxu1 %v6766_v6  ;;  %v6774_v14 = vld [vmem:[%s7337_s6 + $0xd8] sm:$0xff]   ;;  %v6778_v18 = vld [vmem:[%s7337_s6 + $0xe0] sm:$0xff]   ;;  %v6782_v22 = vld [vmem:[%s7337_s6 + $0xe8] sm:$0xff]   ;;  %v7375_v42 = vsub.s32 %v1183_v41, %v1185_v34 }
  0x1e   : > { %v6775_v15 = vld [vmem:[%s7337_s6 + $0x18] sm:$0xff]   ;;  %v6779_v19 = vld [vmem:[%s7337_s6 + $0x20] sm:$0xff]   ;;  %v6783_v23 = vld [vmem:[%s7337_s6 + $0x28] sm:$0xff]  }
  0x1f   : > { %6036 = vmatpush3.bf16.msra.mxu0 %v6767_v7  ;;  %v6776_v16 = vld [vmem:[%s7337_s6 + $0x98] sm:$0xff]   ;;  %v6780_v20 = vld [vmem:[%s7337_s6 + $0xa0] sm:$0xff]   ;;  %v6784_v24 = vld [vmem:[%s7337_s6 + $0xa8] sm:$0xff]  }
  0x20   : > { %6058 = vmatpush3.bf16.msra.mxu1 %v6768_v8  ;;  %6037 = vmatprep.subr.bf16.mxu0 %v6769_v9  ;;  %v6785_v25 = vld [vmem:[%s7337_s6 + $0x70] sm:$0xff]   ;;  %v6789_v30 = vld [vmem:[%s7337_s6 + $0x78] sm:$0xff]   ;;  %v270_v35 = vld [vmem:[%s7332_s27] sm:$0xff] }
  0x21   : > { %6059 = vmatprep.subr.bf16.mxu1 %v6770_v10  ;;  %v6786_v26 = vld [vmem:[%s7337_s6 + $0xf0] sm:$0xff]   ;;  %v6790_v31 = vld [vmem:[%s7337_s6 + $0xf8] sm:$0xff]   ;;  %v6794_v36 = vld [vmem:[%s7337_s6 + $0x140] sm:$0xff]   ;;  %v1180_v40 = vcombine.high %v270_v35, %v270_v35  ;;  %v1187_v43 = vrot.slane %v270_v35, %v7375_v42 }
  0x22   : > { %v6787_v27 = vld [vmem:[%s7337_s6 + $0x30] sm:$0xff]   ;;  %v6791_v32 = vld [vmem:[%s7337_s6 + $0x38] sm:$0xff]   ;;  %v6795_v39 = vld [vmem:[%s7337_s6 + $0x1c0] sm:$0xff]  }
  0x23   : > { %6038 = vmatpush3.bf16.msra.mxu0 %v6771_v11  ;;  %v6788_v28 = vld [vmem:[%s7337_s6 + $0xb0] sm:$0xff]   ;;  %v6792_v33 = vld [vmem:[%s7337_s6 + $0xb8] sm:$0xff]   ;;  %v7379_v44 = vrot.slane %v1180_v40, %v7375_v42  ;;  %v1195_v45 = vcombine.high %v1187_v43, %v1187_v43  ;;  %v1203_v46 = vrot.slane %v1187_v43, %v7375_v42  ;;  %v6796_v48 = vld [vmem:[%s7337_s6 + $0x100] sm:$0xff]  }
  0x24   : > { %6060 = vmatpush3.bf16.msra.mxu1 %v6772_v12  ;;  %6039 = vmatprep.subr.bf16.mxu0 %v6773_v13  ;;  %v6797_v50 = vld [vmem:[%s7337_s6 + $0x180] sm:$0xff]   ;;  %v6798_v53 = vld [vmem:[%s7337_s6 + $0x148] sm:$0xff]   ;;  %v6802_v59 = vld [vmem:[%s7337_s6 + $0x150] sm:$0xff]  }
  0x25   : > { %6061 = vmatprep.subr.bf16.mxu1 %v6774_v14  ;;  %v1196_v47 = vcombine.high %v7379_v44, %v7379_v44  ;;  %v1217_v49 = vrot.slane %v1195_v45, %v7375_v42  ;;  %v1225_v52 = vcombine.high %v1203_v46, %v1203_v46  ;;  %v6799_v55 = vld [vmem:[%s7337_s6 + $0x1c8] sm:$0xff]   ;;  %v6803_v60 = vld [vmem:[%s7337_s6 + $0x1d0] sm:$0xff]   ;;  %v6806_v63 = vld [vmem:[%s7337_s6 + $0x158] sm:$0xff]  }
  0x26   : > { %v6800_v56 = vld [vmem:[%s7337_s6 + $0x108] sm:$0xff]   ;;  %v6804_v61 = vld [vmem:[%s7337_s6 + $0x110] sm:$0xff]   ;;  %v6807_v0 = vld [vmem:[%s7337_s6 + $0x1d8] sm:$0xff]  }
  0x27   : > { %6040 = vmatpush3.bf16.msra.mxu0 %v6775_v15  ;;  %v1224_v51 = vrot.slane %v1196_v47, %v7375_v42  ;;  %4299 = vmatprep.mubr.bf16.mxu0 %v1217_v49  ;;  %v1227_v54 = vcombine.high %v1217_v49, %v1217_v49  ;;  %v6801_v58 = vld [vmem:[%s7337_s6 + $0x188] sm:$0xff]   ;;  %v6805_v62 = vld [vmem:[%s7337_s6 + $0x190] sm:$0xff]   ;;  %v6808_v1 = vld [vmem:[%s7337_s6 + $0x118] sm:$0xff]  }
  0x28   : > { %6062 = vmatpush3.bf16.msra.mxu1 %v6776_v16  ;;  %6041 = vmatprep.subr.bf16.mxu0 %v6777_v17  ;;  %v6809_v2 = vld [vmem:[%s7337_s6 + $0x198] sm:$0xff]   ;;  %v6810_v3 = vld [vmem:[%s7337_s6 + $0x160] sm:$0xff]   ;;  %v6814_v7 = vld [vmem:[%s7337_s6 + $0x168] sm:$0xff]  }
  0x29   : > { %6063 = vmatprep.subr.bf16.mxu1 %v6778_v18  ;;  %v1228_v57 = vcombine.high %v1224_v51, %v1224_v51  ;;  %4339 = vmatprep.mubr.bf16.mxu1 %v1227_v54  ;;  %v6811_v4 = vld [vmem:[%s7337_s6 + $0x1e0] sm:$0xff]   ;;  %v6815_v8 = vld [vmem:[%s7337_s6 + $0x1e8] sm:$0xff]   ;;  %v6818_v11 = vld [vmem:[%s7337_s6 + $0x170] sm:$0xff]  }
  0x2a   : > { %v6812_v5 = vld [vmem:[%s7337_s6 + $0x120] sm:$0xff]   ;;  %v6816_v9 = vld [vmem:[%s7337_s6 + $0x128] sm:$0xff]   ;;  %v6819_v12 = vld [vmem:[%s7337_s6 + $0x1f0] sm:$0xff]  }
  0x2b   : > { %6042 = vmatpush3.bf16.msra.mxu0 %v6779_v19  ;;  %v6813_v6 = vld [vmem:[%s7337_s6 + $0x1a0] sm:$0xff]   ;;  %v6817_v10 = vld [vmem:[%s7337_s6 + $0x1a8] sm:$0xff]   ;;  %v6820_v13 = vld [vmem:[%s7337_s6 + $0x130] sm:$0xff]   ;;  %v1210_v19 = vrot.slane %v7379_v44, %v7375_v42 }
  0x2c   : > { %6064 = vmatpush3.bf16.msra.mxu1 %v6780_v20  ;;  %6043 = vmatprep.subr.bf16.mxu0 %v6781_v21  ;;  %v6821_v14 = vld [vmem:[%s7337_s6 + $0x1b0] sm:$0xff]   ;;  %v6822_v15 = vld [vmem:[%s7337_s6 + $0x178] sm:$0xff]   ;;  %v6826_v20 = vld [vmem:[%s7337_s6 + $0x240] sm:$0xff]  }
  0x2d   : > { %6065 = vmatprep.subr.bf16.mxu1 %v6782_v22  ;;  %v6823_v16 = vld [vmem:[%s7337_s6 + $0x1f8] sm:$0xff]   ;;  %v6827_v21 = vld [vmem:[%s7337_s6 + $0x2c0] sm:$0xff]   ;;  %v6834_v29 = vld [vmem:[%s7337_s6 + $0x250] sm:$0xff]  }
  0x2e   : > { %v6824_v17 = vld [vmem:[%s7337_s6 + $0x138] sm:$0xff]   ;;  %v6828_v22 = vld [vmem:[%s7337_s6 + $0x200] sm:$0xff]   ;;  %v6846_v41 = vld [vmem:[%s7337_s6 + $0x268] sm:$0xff]  }
  0x2f   : > { %6044 = vmatpush3.bf16.msra.mxu0 %v6783_v23  ;;  %v6825_v18 = vld [vmem:[%s7337_s6 + $0x1b8] sm:$0xff]   ;;  %v6829_v23 = vld [vmem:[%s7337_s6 + $0x280] sm:$0xff]   ;;  %v6847_v43 = vld [vmem:[%s7337_s6 + $0x2e8] sm:$0xff]  }
  0x30   : > { %6066 = vmatpush3.bf16.msra.mxu1 %v6784_v24  ;;  %6045 = vmatprep.subr.bf16.mxu0 %v6785_v25  ;;  %v1226_v24 = vcombine.high %v1210_v19, %v1210_v19  ;;  %v6830_v25 = vld [vmem:[%s7337_s6 + $0x248] sm:$0xff]   ;;  %v6839_v34 = vld [vmem:[%s7337_s6 + $0x2d8] sm:$0xff]   ;;  %v6842_v37 = vld [vmem:[%s7337_s6 + $0x260] sm:$0xff]  }
  0x31   : > { %6067 = vmatprep.subr.bf16.mxu1 %v6786_v26  ;;  %v6831_v26 = vld [vmem:[%s7337_s6 + $0x2c8] sm:$0xff]   ;;  %v6840_v35 = vld [vmem:[%s7337_s6 + $0x218] sm:$0xff]   ;;  %v6843_v38 = vld [vmem:[%s7337_s6 + $0x2e0] sm:$0xff]  }
  0x32   : > { %v6845_v40 = vld [vmem:[%s7337_s6 + $0x2a0] sm:$0xff]   ;;  %v6848_v44 = vld [vmem:[%s7337_s6 + $0x228] sm:$0xff]  }
  0x33   : > { %6046 = vmatpush3.bf16.msra.mxu0 %v6787_v27  ;;  %v6832_v27 = vld [vmem:[%s7337_s6 + $0x208] sm:$0xff]  }
  0x34   : > { %6068 = vmatpush3.bf16.msra.mxu1 %v6788_v28  ;;  %6047 = vmatprep.subr.bf16.mxu0 %v6789_v30  ;;  %v6833_v28 = vld [vmem:[%s7337_s6 + $0x288] sm:$0xff]   ;;  %v6835_v30 = vld [vmem:[%s7337_s6 + $0x2d0] sm:$0xff]  }
  0x35   : > { %6069 = vmatprep.subr.bf16.mxu1 %v6790_v31  ;;  %v6836_v31 = vld [vmem:[%s7337_s6 + $0x210] sm:$0xff]   ;;  %v6849_v45 = vld [vmem:[%s7337_s6 + $0x2a8] sm:$0xff]  }
  0x36   : > { %v271_v47 = vld [vmem:[%s7332_s27 + $0x8] sm:$0xff] }
  0x37   : > { %6048 = vmatpush3.bf16.msra.mxu0 %v6791_v32  ;;  %v6837_v32 = vld [vmem:[%s7337_s6 + $0x290] sm:$0xff]   ;;  %v1236_v49 = vrot.slane %v271_v47, %v7375_v42 }
  0x38   : > { %6070 = vmatpush3.bf16.msra.mxu1 %v6792_v33  ;;  %6077 = vmatprep.subr.bf16.mxu0 %v6794_v36  ;;  %v6838_v33 = vld [vmem:[%s7337_s6 + $0x258] sm:$0xff]  }
  0x39   : > { %6099 = vmatprep.subr.bf16.mxu1 %v6795_v39  ;;  %v6841_v36 = vld [vmem:[%s7337_s6 + $0x298] sm:$0xff]   ;;  %v6844_v39 = vld [vmem:[%s7337_s6 + $0x220] sm:$0xff]  }
  0x3a   : > { %4300 = vmatmul.mubr.bf16.vlgmr.msra.gmra.mrb[0].mxu0 %v1203_v46  ;;  %v6850_v46 = vld [vmem:[%s7337_s6 + $0x270] sm:$0xff]  }
  0x3b   : > { %6078 = vmatpush3.bf16.msra.mxu0 %v6796_v48  ;;  %4340 = vmatmul.mubr.bf16.vlgmr.msra.gmra.mrb[0].mxu1 %v1225_v52  ;;  %v6851_v48 = vld [vmem:[%s7337_s6 + $0x2f0] sm:$0xff]  }
  0x3c   : > { %6079 = vmatprep.subr.bf16.mxu0 %v6798_v53  ;;  %6100 = vmatpush3.bf16.msra.mxu1 %v6797_v50  ;;  %v1229_v50 = vcombine.high %v271_v47, %v271_v47  ;;  %v6853_v52 = vld [vmem:[%s7337_s6 + $0x2b0] sm:$0xff]   ;;  %v1244_v53 = vcombine.high %v1236_v49, %v1236_v49 }
  0x3d   : > { %4379 = vmatprep.mubr.bf16.mxu0 %v1224_v51  ;;  %6101 = vmatprep.subr.bf16.mxu1 %v6799_v55  ;;  %v6852_v51 = vld [vmem:[%s7337_s6 + $0x230] sm:$0xff]   ;;  %v6854_v55 = vld [vmem:[%s7337_s6 + $0x278] sm:$0xff]  }
  0x3e   : > { %4419 = vmatprep.mubr.bf16.mxu1 %v1228_v57  ;;  %v7449_v54 = vrot.slane %v1229_v50, %v7375_v42  ;;  %v1266_v57 = vrot.slane %v1244_v53, %v7375_v42  ;;  %v6901_v47 = vld [vmem:[%s7337_s6 + $0x410] sm:$0xff]   ;;  %v6904_v50 = vld [vmem:[%s7337_s6 + $0x4d8] sm:$0xff]   ;;  %v6907_v53 = vld [vmem:[%s7337_s6 + $0x460] sm:$0xff]  }
  0x3f   : > { %6080 = vmatpush3.bf16.msra.mxu0 %v6800_v56  ;;  %v6855_v56 = vld [vmem:[%s7337_s6 + $0x2f8] sm:$0xff]  }
  0x40   : > { %6081 = vmatprep.subr.bf16.mxu0 %v6802_v59  ;;  %6102 = vmatpush3.bf16.msra.mxu1 %v6801_v58  ;;  %v1245_v58 = vcombine.high %v7449_v54, %v7449_v54  ;;  %v6856_v59 = vld [vmem:[%s7337_s6 + $0x238] sm:$0xff]  }
  0x41   : > { %6103 = vmatprep.subr.bf16.mxu1 %v6803_v60  ;;  %v6857_v60 = vld [vmem:[%s7337_s6 + $0x2b8] sm:$0xff]  }
  0x43   : > { %6082 = vmatpush3.bf16.msra.mxu0 %v6804_v61  ;;  %v1276_v61 = vcombine.high %v1266_v57, %v1266_v57 }
  0x44   : > { %6083 = vmatprep.subr.bf16.mxu0 %v6806_v63  ;;  %6104 = vmatpush3.bf16.msra.mxu1 %v6805_v62  ;;  %v1252_v62 = vrot.slane %v1236_v49, %v7375_v42  ;;  %v6858_v63 = vld [vmem:[%s7337_s6 + $0x340] sm:$0xff]   ;;  %v6903_v49 = vld [vmem:[%s7337_s6 + $0x458] sm:$0xff]  }
  0x45   : > { %6105 = vmatprep.subr.bf16.mxu1 %v6807_v0  ;;  %v6859_v0 = vld [vmem:[%s7337_s6 + $0x3c0] sm:$0xff]  }
  0x47   : > { %6084 = vmatpush3.bf16.msra.mxu0 %v6808_v1  ;;  %v1273_v1 = vrot.slane %v1245_v58, %v7375_v42  ;;  %v6912_v58 = vld [vmem:[%s7337_s6 + $0x4e8] sm:$0xff]  }
  0x48   : > { %6085 = vmatprep.subr.bf16.mxu0 %v6810_v3  ;;  %6106 = vmatpush3.bf16.msra.mxu1 %v6809_v2  ;;  %v6860_v2 = vld [vmem:[%s7337_s6 + $0x300] sm:$0xff]  }
  0x49   : > { %6107 = vmatprep.subr.bf16.mxu1 %v6811_v4  ;;  %v6861_v3 = vld [vmem:[%s7337_s6 + $0x380] sm:$0xff]   ;;  %v1274_v4 = vcombine.high %v1252_v62, %v1252_v62 }
  0x4b   : > { %6086 = vmatpush3.bf16.msra.mxu0 %v6812_v5  ;;  %v6862_v5 = vld [vmem:[%s7337_s6 + $0x348] sm:$0xff]  }
  0x4c   : > { %6087 = vmatprep.subr.bf16.mxu0 %v6814_v7  ;;  %6108 = vmatpush3.bf16.msra.mxu1 %v6813_v6  ;;  %v6863_v6 = vld [vmem:[%s7337_s6 + $0x3c8] sm:$0xff]   ;;  %v1277_v7 = vcombine.high %v1273_v1, %v1273_v1 }
  0x4d   : > { %6109 = vmatprep.subr.bf16.mxu1 %v6815_v8  ;;  %v6864_v8 = vld [vmem:[%s7337_s6 + $0x308] sm:$0xff]  }
  0x4f   : > { %6088 = vmatpush3.bf16.msra.mxu0 %v6816_v9  ;;  %v6865_v9 = vld [vmem:[%s7337_s6 + $0x388] sm:$0xff]  }
  0x50   : > { %6089 = vmatprep.subr.bf16.mxu0 %v6818_v11  ;;  %6110 = vmatpush3.bf16.msra.mxu1 %v6817_v10  ;;  %v6866_v10 = vld [vmem:[%s7337_s6 + $0x350] sm:$0xff]  }
  0x51   : > { %6111 = vmatprep.subr.bf16.mxu1 %v6819_v12  ;;  %v6867_v11 = vld [vmem:[%s7337_s6 + $0x3d0] sm:$0xff]  }
  0x52   : > { %v6868_v12 = vld [vmem:[%s7337_s6 + $0x310] sm:$0xff]  }
  0x53   : > { %6090 = vmatpush3.bf16.msra.mxu0 %v6820_v13  ;;  %v6869_v13 = vld [vmem:[%s7337_s6 + $0x390] sm:$0xff]  }
  0x54   : > { %6091 = vmatprep.subr.bf16.mxu0 %v6822_v15  ;;  %6112 = vmatpush3.bf16.msra.mxu1 %v6821_v14  ;;  %v6870_v14 = vld [vmem:[%s7337_s6 + $0x358] sm:$0xff]  }
  0x55   : > { %6113 = vmatprep.subr.bf16.mxu1 %v6823_v16  ;;  %v6871_v15 = vld [vmem:[%s7337_s6 + $0x3d8] sm:$0xff]  }
  0x56   : > { %v6872_v16 = vld [vmem:[%s7337_s6 + $0x318] sm:$0xff]  }
  0x57   : > { %6092 = vmatpush3.bf16.msra.mxu0 %v6824_v17  ;;  %v6873_v17 = vld [vmem:[%s7337_s6 + $0x398] sm:$0xff]  }
  0x58   : > { %6121 = vmatprep.subr.bf16.mxu0 %v6826_v20  ;;  %6114 = vmatpush3.bf16.msra.mxu1 %v6825_v18  ;;  %v6874_v18 = vld [vmem:[%s7337_s6 + $0x360] sm:$0xff]  }
  0x59   : > { %6143 = vmatprep.subr.bf16.mxu1 %v6827_v21  ;;  %v6876_v20 = vld [vmem:[%s7337_s6 + $0x320] sm:$0xff]  }
  0x5a   : > { %4380 = vmatmul.mubr.bf16.vlgmr.msra.gmra.mrb[4].mxu0 %v1210_v19  ;;  %v6875_v19 = vld [vmem:[%s7337_s6 + $0x3e0] sm:$0xff]  }
  0x5b   : > { %6122 = vmatpush3.bf16.msra.mxu0 %v6828_v22  ;;  %4420 = vmatmul.mubr.bf16.vlgmr.msra.gmra.mrb[4].mxu1 %v1226_v24  ;;  %v6877_v21 = vld [vmem:[%s7337_s6 + $0x3a0] sm:$0xff]   ;;  %v6878_v22 = vld [vmem:[%s7337_s6 + $0x368] sm:$0xff]  }
  0x5c   : > { %6123 = vmatprep.subr.bf16.mxu0 %v6830_v25  ;;  %6144 = vmatpush3.bf16.msra.mxu1 %v6829_v23  ;;  %v6879_v23 = vld [vmem:[%s7337_s6 + $0x3e8] sm:$0xff]  }
  0x5d   : > { %6145 = vmatprep.subr.bf16.mxu1 %v6831_v26  ;;  %4459 = vmatprep.mubr.bf16.mxu0 %v1266_v57  ;;  %v6880_v24 = vld [vmem:[%s7337_s6 + $0x328] sm:$0xff]   ;;  %v6882_v26 = vld [vmem:[%s7337_s6 + $0x370] sm:$0xff]  }
  0x5e   : > { %4499 = vmatprep.mubr.bf16.mxu1 %v1276_v61  ;;  %v6881_v25 = vld [vmem:[%s7337_s6 + $0x3a8] sm:$0xff]   ;;  %v6915_v61 = vld [vmem:[%s7337_s6 + $0x470] sm:$0xff]  }
  0x5f   : > { %6124 = vmatpush3.bf16.msra.mxu0 %v6832_v27  ;;  %v6883_v27 = vld [vmem:[%s7337_s6 + $0x3f0] sm:$0xff]   ;;  %v6911_v57 = vld [vmem:[%s7337_s6 + $0x468] sm:$0xff]  }
  0x60   : > { %6125 = vmatprep.subr.bf16.mxu0 %v6834_v29  ;;  %6146 = vmatpush3.bf16.msra.mxu1 %v6833_v28  ;;  %v6884_v28 = vld [vmem:[%s7337_s6 + $0x330] sm:$0xff]  }
  0x61   : > { %6147 = vmatprep.subr.bf16.mxu1 %v6835_v30  ;;  %v6885_v29 = vld [vmem:[%s7337_s6 + $0x3b0] sm:$0xff]   ;;  %v6886_v30 = vld [vmem:[%s7337_s6 + $0x378] sm:$0xff]  }
  0x63   : > { %6126 = vmatpush3.bf16.msra.mxu0 %v6836_v31  ;;  %v6887_v31 = vld [vmem:[%s7337_s6 + $0x3f8] sm:$0xff]  }
  0x64   : > { %6127 = vmatprep.subr.bf16.mxu0 %v6838_v33  ;;  %6148 = vmatpush3.bf16.msra.mxu1 %v6837_v32  ;;  %v6888_v32 = vld [vmem:[%s7337_s6 + $0x338] sm:$0xff]  }
  0x65   : > { %6149 = vmatprep.subr.bf16.mxu1 %v6839_v34  ;;  %v6889_v33 = vld [vmem:[%s7337_s6 + $0x3b8] sm:$0xff]   ;;  %v1259_v34 = vrot.slane %v7449_v54, %v7375_v42  ;;  %v6908_v54 = vld [vmem:[%s7337_s6 + $0x4e0] sm:$0xff]  }
  0x67   : > { %6128 = vmatpush3.bf16.msra.mxu0 %v6840_v35  ;;  %v6891_v35 = vld [vmem:[%s7337_s6 + $0x440] sm:$0xff]  }
  0x68   : > { %6129 = vmatprep.subr.bf16.mxu0 %v6842_v37  ;;  %6150 = vmatpush3.bf16.msra.mxu1 %v6841_v36  ;;  %v6892_v36 = vld [vmem:[%s7337_s6 + $0x4c0] sm:$0xff]  }
  0x69   : > { %6151 = vmatprep.subr.bf16.mxu1 %v6843_v38  ;;  %v6893_v37 = vld [vmem:[%s7337_s6 + $0x400] sm:$0xff]  }
  0x6a   : > { %v6894_v38 = vld [vmem:[%s7337_s6 + $0x480] sm:$0xff]  }
  0x6b   : > { %6130 = vmatpush3.bf16.msra.mxu0 %v6844_v39  ;;  %v1275_v39 = vcombine.high %v1259_v34, %v1259_v34 }
  0x6c   : > { %6131 = vmatprep.subr.bf16.mxu0 %v6846_v41  ;;  %6152 = vmatpush3.bf16.msra.mxu1 %v6845_v40  ;;  %v6895_v40 = vld [vmem:[%s7337_s6 + $0x448] sm:$0xff]  }
  0x6d   : > { %6153 = vmatprep.subr.bf16.mxu1 %v6847_v43  ;;  %v6896_v41 = vld [vmem:[%s7337_s6 + $0x4c8] sm:$0xff]  }
  0x6e   : > { %v6897_v43 = vld [vmem:[%s7337_s6 + $0x408] sm:$0xff]  }
  0x6f   : > { %6132 = vmatpush3.bf16.msra.mxu0 %v6848_v44  ;;  %v6898_v44 = vld [vmem:[%s7337_s6 + $0x488] sm:$0xff]  }
  0x70   : > { %6133 = vmatprep.subr.bf16.mxu0 %v6850_v46  ;;  %6154 = vmatpush3.bf16.msra.mxu1 %v6849_v45  ;;  %v6899_v45 = vld [vmem:[%s7337_s6 + $0x450] sm:$0xff]  }
  0x71   : > { %6155 = vmatprep.subr.bf16.mxu1 %v6851_v48  ;;  %v6900_v46 = vld [vmem:[%s7337_s6 + $0x4d0] sm:$0xff]  }
  0x72   : > { %v6902_v48 = vld [vmem:[%s7337_s6 + $0x490] sm:$0xff]  }
  0x73   : > { %6134 = vmatpush3.bf16.msra.mxu0 %v6852_v51  ;;  %v6905_v51 = vld [vmem:[%s7337_s6 + $0x418] sm:$0xff]  }
  0x74   : > { %6135 = vmatprep.subr.bf16.mxu0 %v6854_v55  ;;  %6156 = vmatpush3.bf16.msra.mxu1 %v6853_v52  ;;  %v6906_v52 = vld [vmem:[%s7337_s6 + $0x498] sm:$0xff]   ;;  %v6909_v55 = vld [vmem:[%s7337_s6 + $0x420] sm:$0xff]  }
  0x75   : > { %6157 = vmatprep.subr.bf16.mxu1 %v6855_v56  ;;  %v6910_v56 = vld [vmem:[%s7337_s6 + $0x4a0] sm:$0xff]  }
  0x77   : > { %6136 = vmatpush3.bf16.msra.mxu0 %v6856_v59  ;;  %v6913_v59 = vld [vmem:[%s7337_s6 + $0x428] sm:$0xff]  }
  0x78   : > { %6165 = vmatprep.subr.bf16.mxu0 %v6858_v63  ;;  %6158 = vmatpush3.bf16.msra.mxu1 %v6857_v60  ;;  %v6914_v60 = vld [vmem:[%s7337_s6 + $0x4a8] sm:$0xff]   ;;  %v6916_v63 = vld [vmem:[%s7337_s6 + $0x4f0] sm:$0xff]  }
  0x79   : > { %6187 = vmatprep.subr.bf16.mxu1 %v6859_v0 }
  0x7a   : > { %4460 = vmatmul.mubr.bf16.vlgmr.msra.gmra.mrb[8].mxu0 %v1252_v62  ;;  %v272_v62 = vld [vmem:[%s7332_s27 + $0x10] sm:$0xff] }
  0x7b   : > { %6166 = vmatpush3.bf16.msra.mxu0 %v6860_v2  ;;  %4539 = vmatprep.mubr.bf16.mxu0 %v1273_v1  ;;  %v1285_v0 = vrot.slane %v272_v62, %v7375_v42  ;;  %v1278_v1 = vcombine.high %v272_v62, %v272_v62  ;;  %v6917_v2 = vld [vmem:[%s7337_s6 + $0x430] sm:$0xff]  }
  0x7c   : > { %4500 = vmatmul.mubr.bf16.vlgmr.msra.gmra.mrb[8].mxu1 %v1274_v4  ;;  %6167 = vmatprep.subr.bf16.mxu0 %v6862_v5  ;;  %v6966_v62 = vld [vmem:[%s7337_s6 + $0x610] sm:$0xff]  }
  0x7d   : > { %6188 = vmatpush3.bf16.msra.mxu1 %v6861_v3  ;;  %4579 = vmatprep.mubr.bf16.mxu1 %v1277_v7  ;;  %v6918_v3 = vld [vmem:[%s7337_s6 + $0x4b0] sm:$0xff]   ;;  %v1293_v4 = vcombine.high %v1285_v0, %v1285_v0  ;;  %v7525_v5 = vrot.slane %v1278_v1, %v7375_v42  ;;  %v6920_v7 = vld [vmem:[%s7337_s6 + $0x4f8] sm:$0xff]  }
  0x7e   : > { %6189 = vmatprep.subr.bf16.mxu1 %v6863_v6  ;;  %v6919_v6 = vld [vmem:[%s7337_s6 + $0x478] sm:$0xff]  }
  0x7f   : > { %6168 = vmatpush3.bf16.msra.mxu0 %v6864_v8  ;;  %v1315_v8 = vrot.slane %v1293_v4, %v7375_v42  ;;  %v6969_v1 = vld [vmem:[%s7337_s6 + $0x6d8] sm:$0xff]   ;;  %v6972_v4 = vld [vmem:[%s7337_s6 + $0x660] sm:$0xff]  }
  0x80   : > { %6169 = vmatprep.subr.bf16.mxu0 %v6866_v10  ;;  %v6921_v10 = vld [vmem:[%s7337_s6 + $0x438] sm:$0xff]  }
  0x81   : > { %6190 = vmatpush3.bf16.msra.mxu1 %v6865_v9  ;;  %v1294_v9 = vcombine.high %v7525_v5, %v7525_v5 }
  0x82   : > { %6191 = vmatprep.subr.bf16.mxu1 %v6867_v11  ;;  %v6922_v11 = vld [vmem:[%s7337_s6 + $0x4b8] sm:$0xff]  }
  0x83   : > { %6170 = vmatpush3.bf16.msra.mxu0 %v6868_v12  ;;  %v1325_v12 = vcombine.high %v1315_v8, %v1315_v8 }
  0x84   : > { %6171 = vmatprep.subr.bf16.mxu0 %v6870_v14  ;;  %v6923_v14 = vld [vmem:[%s7337_s6 + $0x540] sm:$0xff]  }
  0x85   : > { %6192 = vmatpush3.bf16.msra.mxu1 %v6869_v13  ;;  %v1301_v13 = vrot.slane %v1285_v0, %v7375_v42  ;;  %v6968_v0 = vld [vmem:[%s7337_s6 + $0x658] sm:$0xff]  }
  0x86   : > { %6193 = vmatprep.subr.bf16.mxu1 %v6871_v15  ;;  %v6924_v15 = vld [vmem:[%s7337_s6 + $0x5c0] sm:$0xff]  }
  0x87   : > { %6172 = vmatpush3.bf16.msra.mxu0 %v6872_v16  ;;  %v1322_v16 = vrot.slane %v1294_v9, %v7375_v42  ;;  %v6977_v9 = vld [vmem:[%s7337_s6 + $0x6e8] sm:$0xff]  }
  0x88   : > { %6173 = vmatprep.subr.bf16.mxu0 %v6874_v18  ;;  %v6926_v18 = vld [vmem:[%s7337_s6 + $0x580] sm:$0xff]  }
  0x89   : > { %6194 = vmatpush3.bf16.msra.mxu1 %v6873_v17  ;;  %v6925_v17 = vld [vmem:[%s7337_s6 + $0x500] sm:$0xff]  }
  0x8a   : > { %6195 = vmatprep.subr.bf16.mxu1 %v6875_v19  ;;  %v1323_v19 = vcombine.high %v1301_v13, %v1301_v13 }
  0x8b   : > { %6174 = vmatpush3.bf16.msra.mxu0 %v6876_v20  ;;  %v6927_v20 = vld [vmem:[%s7337_s6 + $0x548] sm:$0xff]  }
  0x8c   : > { %6175 = vmatprep.subr.bf16.mxu0 %v6878_v22  ;;  %v1326_v22 = vcombine.high %v1322_v16, %v1322_v16 }
  0x8d   : > { %6196 = vmatpush3.bf16.msra.mxu1 %v6877_v21  ;;  %v6928_v21 = vld [vmem:[%s7337_s6 + $0x5c8] sm:$0xff]  }
  0x8e   : > { %6197 = vmatprep.subr.bf16.mxu1 %v6879_v23  ;;  %v6929_v23 = vld [vmem:[%s7337_s6 + $0x508] sm:$0xff]  }
  0x8f   : > { %6176 = vmatpush3.bf16.msra.mxu0 %v6880_v24  ;;  %v6930_v24 = vld [vmem:[%s7337_s6 + $0x588] sm:$0xff]  }
  0x90   : > { %6177 = vmatprep.subr.bf16.mxu0 %v6882_v26  ;;  %v6932_v26 = vld [vmem:[%s7337_s6 + $0x5d0] sm:$0xff]  }
  0x91   : > { %6198 = vmatpush3.bf16.msra.mxu1 %v6881_v25  ;;  %v6931_v25 = vld [vmem:[%s7337_s6 + $0x550] sm:$0xff]  }
  0x92   : > { %6199 = vmatprep.subr.bf16.mxu1 %v6883_v27  ;;  %v6933_v27 = vld [vmem:[%s7337_s6 + $0x510] sm:$0xff]  }
  0x93   : > { %6178 = vmatpush3.bf16.msra.mxu0 %v6884_v28  ;;  %v6934_v28 = vld [vmem:[%s7337_s6 + $0x590] sm:$0xff]  }
  0x94   : > { %6179 = vmatprep.subr.bf16.mxu0 %v6886_v30  ;;  %v6936_v30 = vld [vmem:[%s7337_s6 + $0x5d8] sm:$0xff]  }
  0x95   : > { %6200 = vmatpush3.bf16.msra.mxu1 %v6885_v29  ;;  %v6935_v29 = vld [vmem:[%s7337_s6 + $0x558] sm:$0xff]  }
  0x96   : > { %6201 = vmatprep.subr.bf16.mxu1 %v6887_v31  ;;  %v6937_v31 = vld [vmem:[%s7337_s6 + $0x518] sm:$0xff]  }
  0x97   : > { %6180 = vmatpush3.bf16.msra.mxu0 %v6888_v32  ;;  %v6938_v32 = vld [vmem:[%s7337_s6 + $0x598] sm:$0xff]  }
  0x98   : > { %6209 = vmatprep.subr.bf16.mxu0 %v6891_v35  ;;  %v6941_v35 = vld [vmem:[%s7337_s6 + $0x520] sm:$0xff]  }
  0x99   : > { %6202 = vmatpush3.bf16.msra.mxu1 %v6889_v33  ;;  %v6939_v33 = vld [vmem:[%s7337_s6 + $0x560] sm:$0xff]  }
  0x9a   : > { %4540 = vmatmul.mubr.bf16.vlgmr.msra.gmra.mrb[12].mxu0 %v1259_v34  ;;  %6231 = vmatprep.subr.bf16.mxu1 %v6892_v36  ;;  %v6940_v34 = vld [vmem:[%s7337_s6 + $0x5e0] sm:$0xff]  }
  0x9b   : > { %6210 = vmatpush3.bf16.msra.mxu0 %v6893_v37  ;;  %4619 = vmatprep.mubr.bf16.mxu0 %v1315_v8  ;;  %v6942_v36 = vld [vmem:[%s7337_s6 + $0x5a0] sm:$0xff]   ;;  %v6943_v37 = vld [vmem:[%s7337_s6 + $0x568] sm:$0xff]  }
  0x9c   : > { %4580 = vmatmul.mubr.bf16.vlgmr.msra.gmra.mrb[12].mxu1 %v1275_v39  ;;  %6211 = vmatprep.subr.bf16.mxu0 %v6895_v40  ;;  %v6945_v39 = vld [vmem:[%s7337_s6 + $0x528] sm:$0xff]  }
  0x9d   : > { %6232 = vmatpush3.bf16.msra.mxu1 %v6894_v38  ;;  %4659 = vmatprep.mubr.bf16.mxu1 %v1325_v12  ;;  %v6944_v38 = vld [vmem:[%s7337_s6 + $0x5e8] sm:$0xff]   ;;  %v6980_v12 = vld [vmem:[%s7337_s6 + $0x670] sm:$0xff]  }
  0x9e   : > { %6233 = vmatprep.subr.bf16.mxu1 %v6896_v41  ;;  %v6946_v40 = vld [vmem:[%s7337_s6 + $0x5a8] sm:$0xff]   ;;  %v6947_v41 = vld [vmem:[%s7337_s6 + $0x570] sm:$0xff]  }
  0x9f   : > { %6212 = vmatpush3.bf16.msra.mxu0 %v6897_v43  ;;  %v6948_v43 = vld [vmem:[%s7337_s6 + $0x5f0] sm:$0xff]   ;;  %v6976_v8 = vld [vmem:[%s7337_s6 + $0x668] sm:$0xff]  }
  0xa0   : > { %6213 = vmatprep.subr.bf16.mxu0 %v6899_v45  ;;  %v6950_v45 = vld [vmem:[%s7337_s6 + $0x5b0] sm:$0xff]  }
  0xa1   : > { %6234 = vmatpush3.bf16.msra.mxu1 %v6898_v44  ;;  %v6949_v44 = vld [vmem:[%s7337_s6 + $0x530] sm:$0xff]  }
  0xa2   : > { %6235 = vmatprep.subr.bf16.mxu1 %v6900_v46  ;;  %v6951_v46 = vld [vmem:[%s7337_s6 + $0x578] sm:$0xff]  }
  0xa3   : > { %6214 = vmatpush3.bf16.msra.mxu0 %v6901_v47  ;;  %v6952_v47 = vld [vmem:[%s7337_s6 + $0x5f8] sm:$0xff]  }
  0xa4   : > { %6215 = vmatprep.subr.bf16.mxu0 %v6903_v49  ;;  %v6954_v49 = vld [vmem:[%s7337_s6 + $0x5b8] sm:$0xff]  }
  0xa5   : > { %6236 = vmatpush3.bf16.msra.mxu1 %v6902_v48  ;;  %v6953_v48 = vld [vmem:[%s7337_s6 + $0x538] sm:$0xff]  }
  0xa6   : > { %6237 = vmatprep.subr.bf16.mxu1 %v6904_v50  ;;  %v1308_v50 = vrot.slane %v7525_v5, %v7375_v42  ;;  %v6973_v5 = vld [vmem:[%s7337_s6 + $0x6e0] sm:$0xff]  }
  0xa7   : > { %6216 = vmatpush3.bf16.msra.mxu0 %v6905_v51  ;;  %v6956_v51 = vld [vmem:[%s7337_s6 + $0x640] sm:$0xff]  }
  0xa8   : > { %6217 = vmatprep.subr.bf16.mxu0 %v6907_v53  ;;  %v6958_v53 = vld [vmem:[%s7337_s6 + $0x600] sm:$0xff]  }
  0xa9   : > { %6238 = vmatpush3.bf16.msra.mxu1 %v6906_v52  ;;  %v6957_v52 = vld [vmem:[%s7337_s6 + $0x6c0] sm:$0xff]  }
  0xaa   : > { %6239 = vmatprep.subr.bf16.mxu1 %v6908_v54  ;;  %v6959_v54 = vld [vmem:[%s7337_s6 + $0x680] sm:$0xff]  }
  0xab   : > { %6218 = vmatpush3.bf16.msra.mxu0 %v6909_v55  ;;  %v1324_v55 = vcombine.high %v1308_v50, %v1308_v50 }
  0xac   : > { %6219 = vmatprep.subr.bf16.mxu0 %v6911_v57  ;;  %v6961_v57 = vld [vmem:[%s7337_s6 + $0x6c8] sm:$0xff]  }
  0xad   : > { %6240 = vmatpush3.bf16.msra.mxu1 %v6910_v56  ;;  %v6960_v56 = vld [vmem:[%s7337_s6 + $0x648] sm:$0xff]  }
  0xae   : > { %6241 = vmatprep.subr.bf16.mxu1 %v6912_v58  ;;  %v6962_v58 = vld [vmem:[%s7337_s6 + $0x608] sm:$0xff]  }
  0xaf   : > { %6220 = vmatpush3.bf16.msra.mxu0 %v6913_v59  ;;  %v6963_v59 = vld [vmem:[%s7337_s6 + $0x688] sm:$0xff]  }
  0xb0   : > { %6221 = vmatprep.subr.bf16.mxu0 %v6915_v61  ;;  %v6965_v61 = vld [vmem:[%s7337_s6 + $0x6d0] sm:$0xff]  }
  0xb1   : > { %6242 = vmatpush3.bf16.msra.mxu1 %v6914_v60  ;;  %v6964_v60 = vld [vmem:[%s7337_s6 + $0x650] sm:$0xff]  }
  0xb2   : > { %6243 = vmatprep.subr.bf16.mxu1 %v6916_v63  ;;  %v6967_v63 = vld [vmem:[%s7337_s6 + $0x690] sm:$0xff]  }
  0xb3   : > { %6222 = vmatpush3.bf16.msra.mxu0 %v6917_v2  ;;  %v6970_v2 = vld [vmem:[%s7337_s6 + $0x618] sm:$0xff]  }
  0xb4   : > { %6223 = vmatprep.subr.bf16.mxu0 %v6919_v6  ;;  %v6974_v6 = vld [vmem:[%s7337_s6 + $0x620] sm:$0xff]  }
  0xb5   : > { %6244 = vmatpush3.bf16.msra.mxu1 %v6918_v3  ;;  %v6971_v3 = vld [vmem:[%s7337_s6 + $0x698] sm:$0xff]  }
  0xb6   : > { %6245 = vmatprep.subr.bf16.mxu1 %v6920_v7  ;;  %v6975_v7 = vld [vmem:[%s7337_s6 + $0x6a0] sm:$0xff]  }
  0xb7   : > { %6224 = vmatpush3.bf16.msra.mxu0 %v6921_v10  ;;  %v6978_v10 = vld [vmem:[%s7337_s6 + $0x628] sm:$0xff]  }
  0xb8   : > { %6253 = vmatprep.subr.bf16.mxu0 %v6923_v14  ;;  %v273_v14 = vld [vmem:[%s7332_s27 + $0x18] sm:$0xff] }
  0xb9   : > { %6246 = vmatpush3.bf16.msra.mxu1 %v6922_v11  ;;  %v6979_v11 = vld [vmem:[%s7337_s6 + $0x6a8] sm:$0xff]  }
  0xba   : > { %4620 = vmatmul.mubr.bf16.vlgmr.msra.gmra.mrb[16].mxu0 %v1301_v13  ;;  %6275 = vmatprep.subr.bf16.mxu1 %v6924_v15  ;;  %v6981_v13 = vld [vmem:[%s7337_s6 + $0x6f0] sm:$0xff]  }
  0xbb   : > { %6254 = vmatpush3.bf16.msra.mxu0 %v6925_v17  ;;  %4699 = vmatprep.mubr.bf16.mxu0 %v1322_v16  ;;  %v6982_v15 = vld [vmem:[%s7337_s6 + $0x630] sm:$0xff]   ;;  %v1334_v16 = vrot.slane %v273_v14, %v7375_v42  ;;  %v1327_v17 = vcombine.high %v273_v14, %v273_v14  ;;  %v7022_v14 = vld [vmem:[%s7337_s6 + $0x8c0] sm:$0xff]  }
  0xbc   : > { %4660 = vmatmul.mubr.bf16.vlgmr.msra.gmra.mrb[16].mxu1 %v1323_v19  ;;  %6255 = vmatprep.subr.bf16.mxu0 %v6927_v20  ;;  %v6984_v19 = vld [vmem:[%s7337_s6 + $0x678] sm:$0xff]  }
  0xbd   : > { %6276 = vmatpush3.bf16.msra.mxu1 %v6926_v18  ;;  %4739 = vmatprep.mubr.bf16.mxu1 %v1326_v22  ;;  %v6983_v18 = vld [vmem:[%s7337_s6 + $0x6b0] sm:$0xff]   ;;  %v1342_v20 = vcombine.high %v1334_v16, %v1334_v16  ;;  %v6985_v22 = vld [vmem:[%s7337_s6 + $0x6f8] sm:$0xff]  }
  0xbe   : > { %6277 = vmatprep.subr.bf16.mxu1 %v6928_v21  ;;  %v7602_v21 = vrot.slane %v1327_v17, %v7375_v42 }
  0xbf   : > { %6256 = vmatpush3.bf16.msra.mxu0 %v6929_v23  ;;  %v6986_v23 = vld [vmem:[%s7337_s6 + $0x638] sm:$0xff]  }
  0xc0   : > { %6257 = vmatprep.subr.bf16.mxu0 %v6931_v25  ;;  %v1343_v25 = vcombine.high %v7602_v21, %v7602_v21 }
  0xc1   : > { %6278 = vmatpush3.bf16.msra.mxu1 %v6930_v24  ;;  %v1364_v24 = vrot.slane %v1342_v20, %v7375_v42  ;;  %v7027_v20 = vld [vmem:[%s7337_s6 + $0x808] sm:$0xff]  }
  0xc2   : > { %6279 = vmatprep.subr.bf16.mxu1 %v6932_v26  ;;  %v6987_v26 = vld [vmem:[%s7337_s6 + $0x6b8] sm:$0xff]  }
  0xc3   : > { %6258 = vmatpush3.bf16.msra.mxu0 %v6933_v27  ;;  %v1374_v27 = vcombine.high %v1364_v24, %v1364_v24 }
  0xc4   : > { %6259 = vmatprep.subr.bf16.mxu0 %v6935_v29  ;;  %v6988_v29 = vld [vmem:[%s7337_s6 + $0x740] sm:$0xff]  }
  0xc5   : > { %6280 = vmatpush3.bf16.msra.mxu1 %v6934_v28  ;;  %v1350_v28 = vrot.slane %v1334_v16, %v7375_v42  ;;  %v7024_v16 = vld [vmem:[%s7337_s6 + $0x880] sm:$0xff]  }
  0xc6   : > { %6281 = vmatprep.subr.bf16.mxu1 %v6936_v30  ;;  %v6989_v30 = vld [vmem:[%s7337_s6 + $0x7c0] sm:$0xff]  }
  0xc7   : > { %6260 = vmatpush3.bf16.msra.mxu0 %v6937_v31  ;;  %v1371_v31 = vrot.slane %v1343_v25, %v7375_v42  ;;  %v7032_v25 = vld [vmem:[%s7337_s6 + $0x890] sm:$0xff]  }
  0xc8   : > { %6261 = vmatprep.subr.bf16.mxu0 %v6939_v33  ;;  %v6991_v33 = vld [vmem:[%s7337_s6 + $0x780] sm:$0xff]  }
  0xc9   : > { %6282 = vmatpush3.bf16.msra.mxu1 %v6938_v32  ;;  %v6990_v32 = vld [vmem:[%s7337_s6 + $0x700] sm:$0xff]  }
  0xca   : > { %6283 = vmatprep.subr.bf16.mxu1 %v6940_v34  ;;  %v1372_v34 = vcombine.high %v1350_v28, %v1350_v28 }
  0xcb   : > { %6262 = vmatpush3.bf16.msra.mxu0 %v6941_v35  ;;  %v6992_v35 = vld [vmem:[%s7337_s6 + $0x748] sm:$0xff]  }
  0xcc   : > { %6263 = vmatprep.subr.bf16.mxu0 %v6943_v37  ;;  %v1375_v37 = vcombine.high %v1371_v31, %v1371_v31 }
  0xcd   : > { %6284 = vmatpush3.bf16.msra.mxu1 %v6942_v36  ;;  %v6993_v36 = vld [vmem:[%s7337_s6 + $0x7c8] sm:$0xff]  }
  0xce   : > { %6285 = vmatprep.subr.bf16.mxu1 %v6944_v38  ;;  %v6994_v38 = vld [vmem:[%s7337_s6 + $0x708] sm:$0xff]  }
  0xcf   : > { %6264 = vmatpush3.bf16.msra.mxu0 %v6945_v39  ;;  %v6995_v39 = vld [vmem:[%s7337_s6 + $0x788] sm:$0xff]  }
  0xd0   : > { %6265 = vmatprep.subr.bf16.mxu0 %v6947_v41  ;;  %v6997_v41 = vld [vmem:[%s7337_s6 + $0x7d0] sm:$0xff]  }
  0xd1   : > { %6286 = vmatpush3.bf16.msra.mxu1 %v6946_v40  ;;  %v6996_v40 = vld [vmem:[%s7337_s6 + $0x750] sm:$0xff]  }
  0xd2   : > { %6287 = vmatprep.subr.bf16.mxu1 %v6948_v43  ;;  %v6998_v43 = vld [vmem:[%s7337_s6 + $0x710] sm:$0xff]  }
  0xd3   : > { %6266 = vmatpush3.bf16.msra.mxu0 %v6949_v44  ;;  %v6999_v44 = vld [vmem:[%s7337_s6 + $0x790] sm:$0xff]  }
  0xd4   : > { %6267 = vmatprep.subr.bf16.mxu0 %v6951_v46  ;;  %v7001_v46 = vld [vmem:[%s7337_s6 + $0x7d8] sm:$0xff]  }
  0xd5   : > { %6288 = vmatpush3.bf16.msra.mxu1 %v6950_v45  ;;  %v7000_v45 = vld [vmem:[%s7337_s6 + $0x758] sm:$0xff]  }
  0xd6   : > { %6289 = vmatprep.subr.bf16.mxu1 %v6952_v47  ;;  %v7002_v47 = vld [vmem:[%s7337_s6 + $0x718] sm:$0xff]  }
  0xd7   : > { %6268 = vmatpush3.bf16.msra.mxu0 %v6953_v48  ;;  %v7003_v48 = vld [vmem:[%s7337_s6 + $0x798] sm:$0xff]  }
  0xd8   : > { %6297 = vmatprep.subr.bf16.mxu0 %v6956_v51  ;;  %v7006_v51 = vld [vmem:[%s7337_s6 + $0x720] sm:$0xff]  }
  0xd9   : > { %6290 = vmatpush3.bf16.msra.mxu1 %v6954_v49  ;;  %v7004_v49 = vld [vmem:[%s7337_s6 + $0x760] sm:$0xff]  }
  0xda   : > { %4700 = vmatmul.mubr.bf16.vlgmr.msra.gmra.mrb[20].mxu0 %v1308_v50  ;;  %6319 = vmatprep.subr.bf16.mxu1 %v6957_v52  ;;  %v7005_v50 = vld [vmem:[%s7337_s6 + $0x7e0] sm:$0xff]  }
  0xdb   : > { %6298 = vmatpush3.bf16.msra.mxu0 %v6958_v53  ;;  %4779 = vmatprep.mubr.bf16.mxu0 %v1364_v24  ;;  %v7007_v52 = vld [vmem:[%s7337_s6 + $0x7a0] sm:$0xff]   ;;  %v7008_v53 = vld [vmem:[%s7337_s6 + $0x768] sm:$0xff]   ;;  %v7031_v24 = vld [vmem:[%s7337_s6 + $0x810] sm:$0xff]  }
  0xdc   : > { %4740 = vmatmul.mubr.bf16.vlgmr.msra.gmra.mrb[20].mxu1 %v1324_v55  ;;  %6299 = vmatprep.subr.bf16.mxu0 %v6960_v56  ;;  %v7010_v55 = vld [vmem:[%s7337_s6 + $0x728] sm:$0xff]  }
  0xdd   : > { %6320 = vmatpush3.bf16.msra.mxu1 %v6959_v54  ;;  %4819 = vmatprep.mubr.bf16.mxu1 %v1374_v27  ;;  %v7009_v54 = vld [vmem:[%s7337_s6 + $0x7e8] sm:$0xff]   ;;  %v7034_v27 = vld [vmem:[%s7337_s6 + $0x8d8] sm:$0xff]  }
  0xde   : > { %6321 = vmatprep.subr.bf16.mxu1 %v6961_v57  ;;  %v7011_v56 = vld [vmem:[%s7337_s6 + $0x7a8] sm:$0xff]   ;;  %v7012_v57 = vld [vmem:[%s7337_s6 + $0x770] sm:$0xff]  }
  0xdf   : > { %6300 = vmatpush3.bf16.msra.mxu0 %v6962_v58 }
  0xe0   : > { %6301 = vmatprep.subr.bf16.mxu0 %v6964_v60 }
  0xe1   : > { %6322 = vmatpush3.bf16.msra.mxu1 %v6963_v59  ;;  %v7013_v59 = vld [vmem:[%s7337_s6 + $0x7f0] sm:$0xff]  }
  0xe2   : > { %6323 = vmatprep.subr.bf16.mxu1 %v6965_v61  ;;  %v7014_v61 = vld [vmem:[%s7337_s6 + $0x730] sm:$0xff]  }
  0xe3   : > { %6302 = vmatpush3.bf16.msra.mxu0 %v6966_v62 }
  0xe4   : > { %6303 = vmatprep.subr.bf16.mxu0 %v6968_v0 }
  0xe5   : > { %6324 = vmatpush3.bf16.msra.mxu1 %v6967_v63 }
  0xe6   : > { %6325 = vmatprep.subr.bf16.mxu1 %v6969_v1  ;;  %v7015_v1 = vld [vmem:[%s7337_s6 + $0x7b0] sm:$0xff]  }
  0xe7   : > { %6304 = vmatpush3.bf16.msra.mxu0 %v6970_v2  ;;  %v7016_v2 = vld [vmem:[%s7337_s6 + $0x778] sm:$0xff]  }
  0xe8   : > { %6305 = vmatprep.subr.bf16.mxu0 %v6972_v4 }
  0xe9   : > { %6326 = vmatpush3.bf16.msra.mxu1 %v6971_v3 }
  0xea   : > { %6327 = vmatprep.subr.bf16.mxu1 %v6973_v5 }
  0xeb   : > { %6306 = vmatpush3.bf16.msra.mxu0 %v6974_v6 }
  0xec   : > { %6307 = vmatprep.subr.bf16.mxu0 %v6976_v8 }
  0xed   : > { %6328 = vmatpush3.bf16.msra.mxu1 %v6975_v7  ;;  %v7017_v7 = vld [vmem:[%s7337_s6 + $0x7f8] sm:$0xff]  }
  0xee   : > { %6329 = vmatprep.subr.bf16.mxu1 %v6977_v9  ;;  %v7018_v9 = vld [vmem:[%s7337_s6 + $0x738] sm:$0xff]  }
  0xef   : > { %6308 = vmatpush3.bf16.msra.mxu0 %v6978_v10 }
  0xf0   : > { %6309 = vmatprep.subr.bf16.mxu0 %v6980_v12  ;;  %v1357_v12 = vrot.slane %v7602_v21, %v7375_v42  ;;  %v7028_v21 = vld [vmem:[%s7337_s6 + $0x888] sm:$0xff]  }
  0xf1   : > { %6330 = vmatpush3.bf16.msra.mxu1 %v6979_v11  ;;  %v7019_v11 = vld [vmem:[%s7337_s6 + $0x7b8] sm:$0xff]  }
  0xf2   : > { %6331 = vmatprep.subr.bf16.mxu1 %v6981_v13  ;;  %v7021_v13 = vld [vmem:[%s7337_s6 + $0x840] sm:$0xff]   ;;  %v1373_v17 = vcombine.high %v1357_v12, %v1357_v12 }
  0xf3   : > { %6310 = vmatpush3.bf16.msra.mxu0 %v6982_v15  ;;  %v7023_v15 = vld [vmem:[%s7337_s6 + $0x800] sm:$0xff]  }
  0xf4   : > { %6311 = vmatprep.subr.bf16.mxu0 %v6984_v19  ;;  %v7026_v19 = vld [vmem:[%s7337_s6 + $0x8c8] sm:$0xff]  }
  0xf5   : > { %6332 = vmatpush3.bf16.msra.mxu1 %v6983_v18  ;;  %v7025_v18 = vld [vmem:[%s7337_s6 + $0x848] sm:$0xff]  }
  0xf6   : > { %6333 = vmatprep.subr.bf16.mxu1 %v6985_v22  ;;  %v7029_v22 = vld [vmem:[%s7337_s6 + $0x850] sm:$0xff]  }
  0xf7   : > { %6312 = vmatpush3.bf16.msra.mxu0 %v6986_v23  ;;  %v7030_v23 = vld [vmem:[%s7337_s6 + $0x8d0] sm:$0xff]  }
  0xf8   : > { %6341 = vmatprep.subr.bf16.mxu0 %v6988_v29  ;;  %v7036_v29 = vld [vmem:[%s7337_s6 + $0x898] sm:$0xff]  }
  0xf9   : > { %6334 = vmatpush3.bf16.msra.mxu1 %v6987_v26  ;;  %v7033_v26 = vld [vmem:[%s7337_s6 + $0x858] sm:$0xff]  }
  0xfa   : > { %4780 = vmatmul.mubr.bf16.vlgmr.msra.gmra.mrb[24].mxu0 %v1350_v28  ;;  %6363 = vmatprep.subr.bf16.mxu1 %v6989_v30  ;;  %v7035_v28 = vld [vmem:[%s7337_s6 + $0x818] sm:$0xff]   ;;  %v7037_v30 = vld [vmem:[%s7337_s6 + $0x860] sm:$0xff]  }
  0xfb   : > { %6342 = vmatpush3.bf16.msra.mxu0 %v6990_v32  ;;  %4859 = vmatprep.mubr.bf16.mxu0 %v1371_v31  ;;  %v7038_v31 = vld [vmem:[%s7337_s6 + $0x8e0] sm:$0xff]  }
  0xfc   : > { %4820 = vmatmul.mubr.bf16.vlgmr.msra.gmra.mrb[24].mxu1 %v1372_v34  ;;  %6343 = vmatprep.subr.bf16.mxu0 %v6992_v35  ;;  %v7039_v32 = vld [vmem:[%s7337_s6 + $0x820] sm:$0xff]   ;;  %v7041_v34 = vld [vmem:[%s7337_s6 + $0x868] sm:$0xff]  }
  0xfd   : > { %6364 = vmatpush3.bf16.msra.mxu1 %v6991_v33  ;;  %4899 = vmatprep.mubr.bf16.mxu1 %v1375_v37  ;;  %v7040_v33 = vld [vmem:[%s7337_s6 + $0x8a0] sm:$0xff]   ;;  %v7042_v35 = vld [vmem:[%s7337_s6 + $0x8e8] sm:$0xff]  }
  0xfe   : > { %6365 = vmatprep.subr.bf16.mxu1 %v6993_v36  ;;  %v7043_v36 = vld [vmem:[%s7337_s6 + $0x828] sm:$0xff]  }
  0xff   : > { %6344 = vmatpush3.bf16.msra.mxu0 %v6994_v38  ;;  %v7044_v37 = vld [vmem:[%s7337_s6 + $0x8a8] sm:$0xff]   ;;  %v7045_v38 = vld [vmem:[%s7337_s6 + $0x870] sm:$0xff]  }
 0x100   : > { %6345 = vmatprep.subr.bf16.mxu0 %v6996_v40  ;;  %v7046_v40 = vld [vmem:[%s7337_s6 + $0x8f0] sm:$0xff]  }
 0x101   : > { %6366 = vmatpush3.bf16.msra.mxu1 %v6995_v39 }
 0x102   : > { %6367 = vmatprep.subr.bf16.mxu1 %v6997_v41  ;;  %v274_v41 = vld [vmem:[%s7332_s27 + $0x20] sm:$0xff] }
 0x103   : > { %6346 = vmatpush3.bf16.msra.mxu0 %v6998_v43 }
 0x104   : > { %6347 = vmatprep.subr.bf16.mxu0 %v7000_v45  ;;  %v1383_v45 = vrot.slane %v274_v41, %v7375_v42 }
 0x105   : > { %6368 = vmatpush3.bf16.msra.mxu1 %v6999_v44  ;;  %v7047_v44 = vld [vmem:[%s7337_s6 + $0x830] sm:$0xff]  }
 0x106   : > { %6369 = vmatprep.subr.bf16.mxu1 %v7001_v46  ;;  %v1376_v46 = vcombine.high %v274_v41, %v274_v41 }
 0x107   : > { %6348 = vmatpush3.bf16.msra.mxu0 %v7002_v47 }
 0x108   : > { %6349 = vmatprep.subr.bf16.mxu0 %v7004_v49 }
 0x109   : > { %6370 = vmatpush3.bf16.msra.mxu1 %v7003_v48 }
 0x10a   : > { %6371 = vmatprep.subr.bf16.mxu1 %v7005_v50 }
 0x10b   : > { %6350 = vmatpush3.bf16.msra.mxu0 %v7006_v51 }
 0x10c   : > { %6351 = vmatprep.subr.bf16.mxu0 %v7008_v53  ;;  %v7049_v53 = vld [vmem:[%s7337_s6 + $0x878] sm:$0xff]  }
 0x10d   : > { %6372 = vmatpush3.bf16.msra.mxu1 %v7007_v52  ;;  %v6049_v58 = vpop.f32.mrb[0].mxu0  ;;  %v7048_v52 = vld [vmem:[%s7337_s6 + $0x8b0] sm:$0xff]  }
 0x10e   : > { %v6050_v60 = vpop.f32.mrb[1].mxu0  ;;  %6373 = vmatprep.subr.bf16.mxu1 %v7009_v54  ;;  %v6071_v62 = vpop.f32.mrb[0].mxu1  ;;  %v1391_v54 = vcombine.high %v1383_v45, %v1383_v45 }
 0x10f   : > { %v6051_v63 = vadd.f32 %v6050_v60, %v6049_v58  ;;  %v6052_v0 = vpop.f32.mrb[2].mxu0  ;;  %6352 = vmatpush3.bf16.msra.mxu0 %v7010_v55  ;;  %v6072_v3 = vpop.f32.mrb[1].mxu1  ;;  %v7680_v55 = vrot.slane %v1376_v46, %v7375_v42 }
 0x110   : > { %v6053_v4 = vpop.f32.mrb[3].mxu0  ;;  %6353 = vmatprep.subr.bf16.mxu0 %v7012_v57  ;;  %v6073_v5 = vadd.f32 %v6072_v3, %v6071_v62  ;;  %v6074_v6 = vpop.f32.mrb[2].mxu1  ;;  %v1413_v62 = vrot.slane %v1391_v54, %v7375_v42  ;;  %v1399_v3 = vrot.slane %v1383_v45, %v7375_v42  ;;  %v7087_v54 = vld [vmem:[%s7337_s6 + $0xac0] sm:$0xff]  }
 0x111   : > { %6374 = vmatpush3.bf16.msra.mxu1 %v7011_v56  ;;  %v6075_v8 = vpop.f32.mrb[3].mxu1  ;;  %v7053_v4 = vld [vmem:[%s7337_s6 + $0x940] sm:$0xff]  }
 0x112   : > { %6375 = vmatprep.subr.bf16.mxu1 %v7013_v59  ;;  %v7643_v10 = vadd.f32 %v6073_v5, %v6051_v63  ;;  %v7050_v59 = vld [vmem:[%s7337_s6 + $0x8f8] sm:$0xff]   ;;  %v1392_v63 = vcombine.high %v7680_v55, %v7680_v55  ;;  %v7054_v5 = vld [vmem:[%s7337_s6 + $0x9c0] sm:$0xff]  }
 0x113   : > { %6354 = vmatpush3.bf16.msra.mxu0 %v7014_v61  ;;  %v7051_v61 = vld [vmem:[%s7337_s6 + $0x838] sm:$0xff]   ;;  %v7056_v8 = vld [vmem:[%s7337_s6 + $0x980] sm:$0xff]  }
 0x114   : > { %6355 = vmatprep.subr.bf16.mxu0 %v7016_v2  ;;  %v1423_v2 = vcombine.high %v1413_v62, %v1413_v62  ;;  %v1420_v6 = vrot.slane %v1392_v63, %v7375_v42  ;;  %v7095_v63 = vld [vmem:[%s7337_s6 + $0xad0] sm:$0xff]  }
 0x115   : > { %6376 = vmatpush3.bf16.msra.mxu1 %v7015_v1  ;;  %v7052_v1 = vld [vmem:[%s7337_s6 + $0x8b8] sm:$0xff]  }
 0x116   : > { %6377 = vmatprep.subr.bf16.mxu1 %v7017_v7  ;;  %v7055_v7 = vld [vmem:[%s7337_s6 + $0x900] sm:$0xff]  }
 0x117   : > { %6356 = vmatpush3.bf16.msra.mxu0 %v7018_v9  ;;  %v1421_v9 = vcombine.high %v1399_v3, %v1399_v3 }
 0x118   : > { %6385 = vmatprep.subr.bf16.mxu0 %v7021_v13  ;;  %v7059_v13 = vld [vmem:[%s7337_s6 + $0x908] sm:$0xff]  }
 0x119   : > { %6378 = vmatpush3.bf16.msra.mxu1 %v7019_v11  ;;  %v7058_v11 = vld [vmem:[%s7337_s6 + $0x9c8] sm:$0xff]  }
 0x11a   : > { %4860 = vmatmul.mubr.bf16.vlgmr.msra.gmra.mrb[28].mxu0 %v1357_v12  ;;  %6407 = vmatprep.subr.bf16.mxu1 %v7022_v14  ;;  %v1424_v12 = vcombine.high %v1420_v6, %v1420_v6  ;;  %v7060_v14 = vld [vmem:[%s7337_s6 + $0x988] sm:$0xff]  }
 0x11b   : > { %6386 = vmatpush3.bf16.msra.mxu0 %v7023_v15  ;;  %4939 = vmatprep.mubr.bf16.mxu0 %v1413_v62  ;;  %v7061_v15 = vld [vmem:[%s7337_s6 + $0x950] sm:$0xff]  }
 0x11c   : > { %4900 = vmatmul.mubr.bf16.vlgmr.msra.gmra.mrb[28].mxu1 %v1373_v17  ;;  %6387 = vmatprep.subr.bf16.mxu0 %v7025_v18  ;;  %v7063_v17 = vld [vmem:[%s7337_s6 + $0x910] sm:$0xff]  }
 0x11d   : > { %6408 = vmatpush3.bf16.msra.mxu1 %v7024_v16  ;;  %4979 = vmatprep.mubr.bf16.mxu1 %v1423_v2  ;;  %v7062_v16 = vld [vmem:[%s7337_s6 + $0x9d0] sm:$0xff]   ;;  %v7098_v2 = vld [vmem:[%s7337_s6 + $0xa58] sm:$0xff]  }
 0x11e   : > { %6409 = vmatprep.subr.bf16.mxu1 %v7026_v19  ;;  %v7064_v18 = vld [vmem:[%s7337_s6 + $0x990] sm:$0xff]   ;;  %v7065_v19 = vld [vmem:[%s7337_s6 + $0x958] sm:$0xff]  }
 0x11f   : > { %6388 = vmatpush3.bf16.msra.mxu0 %v7027_v20  ;;  %v7066_v20 = vld [vmem:[%s7337_s6 + $0x9d8] sm:$0xff]   ;;  %v7094_v62 = vld [vmem:[%s7337_s6 + $0xa50] sm:$0xff]  }
 0x120   : > { %6389 = vmatprep.subr.bf16.mxu0 %v7029_v22  ;;  %v7068_v22 = vld [vmem:[%s7337_s6 + $0x998] sm:$0xff]  }
 0x121   : > { %6410 = vmatpush3.bf16.msra.mxu1 %v7028_v21  ;;  %v7067_v21 = vld [vmem:[%s7337_s6 + $0x918] sm:$0xff]  }
 0x122   : > { %6411 = vmatprep.subr.bf16.mxu1 %v7030_v23  ;;  %v7069_v23 = vld [vmem:[%s7337_s6 + $0x960] sm:$0xff]  }
 0x123   : > { %6390 = vmatpush3.bf16.msra.mxu0 %v7031_v24  ;;  %v7070_v24 = vld [vmem:[%s7337_s6 + $0x9e0] sm:$0xff]  }
 0x124   : > { %6391 = vmatprep.subr.bf16.mxu0 %v7033_v26  ;;  %v7072_v26 = vld [vmem:[%s7337_s6 + $0x9a0] sm:$0xff]  }
 0x125   : > { %6412 = vmatpush3.bf16.msra.mxu1 %v7032_v25  ;;  %v7071_v25 = vld [vmem:[%s7337_s6 + $0x920] sm:$0xff]  }
 0x126   : > { %6413 = vmatprep.subr.bf16.mxu1 %v7034_v27  ;;  %v7073_v27 = vld [vmem:[%s7337_s6 + $0x968] sm:$0xff]  }
 0x127   : > { %6392 = vmatpush3.bf16.msra.mxu0 %v7035_v28  ;;  %v7074_v28 = vld [vmem:[%s7337_s6 + $0x9e8] sm:$0xff]  }
 0x128   : > { %6393 = vmatprep.subr.bf16.mxu0 %v7037_v30  ;;  %v7076_v30 = vld [vmem:[%s7337_s6 + $0x9a8] sm:$0xff]  }
 0x129   : > { %6414 = vmatpush3.bf16.msra.mxu1 %v7036_v29  ;;  %v7075_v29 = vld [vmem:[%s7337_s6 + $0x928] sm:$0xff]  }
 0x12a   : > { %6415 = vmatprep.subr.bf16.mxu1 %v7038_v31  ;;  %v7077_v31 = vld [vmem:[%s7337_s6 + $0x970] sm:$0xff]  }
 0x12b   : > { %6394 = vmatpush3.bf16.msra.mxu0 %v7039_v32 }
 0x12c   : > { %6395 = vmatprep.subr.bf16.mxu0 %v7041_v34 }
 0x12d   : > { %6416 = vmatpush3.bf16.msra.mxu1 %v7040_v33  ;;  %v6093_v39 = vpop.f32.mrb[4].mxu0  ;;  %v7078_v33 = vld [vmem:[%s7337_s6 + $0x9f0] sm:$0xff]  }
 0x12e   : > { %v6094_v43 = vpop.f32.mrb[5].mxu0  ;;  %6417 = vmatprep.subr.bf16.mxu1 %v7042_v35  ;;  %v6115_v47 = vpop.f32.mrb[4].mxu1  ;;  %v7079_v35 = vld [vmem:[%s7337_s6 + $0x930] sm:$0xff]  }
 0x12f   : > { %v6095_v48 = vadd.f32 %v6094_v43, %v6093_v39  ;;  %v6096_v49 = vpop.f32.mrb[6].mxu0  ;;  %6396 = vmatpush3.bf16.msra.mxu0 %v7043_v36  ;;  %v6116_v50 = vpop.f32.mrb[5].mxu1  ;;  %v7080_v39 = vld [vmem:[%s7337_s6 + $0x9b0] sm:$0xff]  }
 0x130   : > { %v6097_v51 = vpop.f32.mrb[7].mxu0  ;;  %6397 = vmatprep.subr.bf16.mxu0 %v7045_v38  ;;  %v6117_v57 = vadd.f32 %v6116_v50, %v6115_v47  ;;  %v6118_v58 = vpop.f32.mrb[6].mxu1  ;;  %v7082_v47 = vld [vmem:[%s7337_s6 + $0x9f8] sm:$0xff]  }
 0x131   : > { %v4382_v56 = vadd.f32 %v6095_v48, %v7643_v10  ;;  %6418 = vmatpush3.bf16.msra.mxu1 %v7044_v37  ;;  %v6119_v60 = vpop.f32.mrb[7].mxu1  ;;  %v7057_v10 = vld [vmem:[%s7337_s6 + $0x948] sm:$0xff]   ;;  %v7083_v49 = vld [vmem:[%s7337_s6 + $0x938] sm:$0xff]  }
 0x132   : > { %6419 = vmatprep.subr.bf16.mxu1 %v7046_v40  ;;  %v7081_v40 = vld [vmem:[%s7337_s6 + $0x978] sm:$0xff]   ;;  %v7091_v60 = vld [vmem:[%s7337_s6 + $0xac8] sm:$0xff]  }
 0x133   : > { %v7688_v0 = vadd.f32 %v6117_v57, %v4382_v56  ;;  %6398 = vmatpush3.bf16.msra.mxu0 %v7047_v44  ;;  %v7084_v51 = vld [vmem:[%s7337_s6 + $0x9b8] sm:$0xff]   ;;  %v7088_v56 = vld [vmem:[%s7337_s6 + $0xa00] sm:$0xff]  }
 0x134   : > { %6399 = vmatprep.subr.bf16.mxu0 %v7049_v53  ;;  %v7086_v53 = vld [vmem:[%s7337_s6 + $0xa40] sm:$0xff]  }
 0x135   : > { %6420 = vmatpush3.bf16.msra.mxu1 %v7048_v52  ;;  %v1406_v52 = vrot.slane %v7680_v55, %v7375_v42  ;;  %v7089_v57 = vld [vmem:[%s7337_s6 + $0xa80] sm:$0xff]   ;;  %v7092_v55 = vld [vmem:[%s7337_s6 + $0xa08] sm:$0xff]  }
 0x136   : > { %6421 = vmatprep.subr.bf16.mxu1 %v7050_v59  ;;  %v7090_v59 = vld [vmem:[%s7337_s6 + $0xa48] sm:$0xff]  }
 0x137   : > { %6400 = vmatpush3.bf16.msra.mxu0 %v7051_v61  ;;  %v1422_v58 = vcombine.high %v1406_v52, %v1406_v52  ;;  %v7093_v61 = vld [vmem:[%s7337_s6 + $0xa88] sm:$0xff]  }
 0x138   : > { %6429 = vmatprep.subr.bf16.mxu0 %v7053_v4  ;;  %v7100_v4 = vld [vmem:[%s7337_s6 + $0xa18] sm:$0xff]  }
 0x139   : > { %6422 = vmatpush3.bf16.msra.mxu1 %v7052_v1  ;;  %v7097_v1 = vld [vmem:[%s7337_s6 + $0xa90] sm:$0xff]  }
 0x13a   : > { %4940 = vmatmul.mubr.bf16.vlgmr.msra.gmra.mrb[32].mxu0 %v1399_v3  ;;  %6451 = vmatprep.subr.bf16.mxu1 %v7054_v5  ;;  %v7099_v3 = vld [vmem:[%s7337_s6 + $0xad8] sm:$0xff]  }
 0x13b   : > { %6430 = vmatpush3.bf16.msra.mxu0 %v7055_v7  ;;  %5019 = vmatprep.mubr.bf16.mxu0 %v1420_v6  ;;  %v7101_v5 = vld [vmem:[%s7337_s6 + $0xa98] sm:$0xff]   ;;  %v7102_v6 = vld [vmem:[%s7337_s6 + $0xa60] sm:$0xff]  }
 0x13c   : > { %4980 = vmatmul.mubr.bf16.vlgmr.msra.gmra.mrb[32].mxu1 %v1421_v9  ;;  %6431 = vmatprep.subr.bf16.mxu0 %v7057_v10  ;;  %v7103_v7 = vld [vmem:[%s7337_s6 + $0xae0] sm:$0xff]   ;;  %v7106_v10 = vld [vmem:[%s7337_s6 + $0xa68] sm:$0xff]  }
 0x13d   : > { %6452 = vmatpush3.bf16.msra.mxu1 %v7056_v8  ;;  %5059 = vmatprep.mubr.bf16.mxu1 %v1424_v12  ;;  %v7104_v8 = vld [vmem:[%s7337_s6 + $0xa20] sm:$0xff]   ;;  %v7108_v12 = vld [vmem:[%s7337_s6 + $0xa28] sm:$0xff]  }
 0x13e   : > { %6453 = vmatprep.subr.bf16.mxu1 %v7058_v11  ;;  %v7105_v9 = vld [vmem:[%s7337_s6 + $0xaa0] sm:$0xff]   ;;  %v7107_v11 = vld [vmem:[%s7337_s6 + $0xae8] sm:$0xff]  }
 0x13f   : > { %6432 = vmatpush3.bf16.msra.mxu0 %v7059_v13  ;;  %v7109_v13 = vld [vmem:[%s7337_s6 + $0xaa8] sm:$0xff]  }
 0x140   : > { %6433 = vmatprep.subr.bf16.mxu0 %v7061_v15 }
 0x141   : > { %6454 = vmatpush3.bf16.msra.mxu1 %v7060_v14  ;;  %v7110_v14 = vld [vmem:[%s7337_s6 + $0xa70] sm:$0xff]  }
 0x142   : > { %6455 = vmatprep.subr.bf16.mxu1 %v7062_v16  ;;  %v7111_v16 = vld [vmem:[%s7337_s6 + $0xaf0] sm:$0xff]  }
 0x143   : > { %6434 = vmatpush3.bf16.msra.mxu0 %v7063_v17 }
 0x144   : > { %6435 = vmatprep.subr.bf16.mxu0 %v7065_v19  ;;  %v275_v19 = vld [vmem:[%s7332_s27 + $0x28] sm:$0xff] }
 0x145   : > { %6456 = vmatpush3.bf16.msra.mxu1 %v7064_v18  ;;  %v7112_v18 = vld [vmem:[%s7337_s6 + $0xa30] sm:$0xff]  }
 0x146   : > { %6457 = vmatprep.subr.bf16.mxu1 %v7066_v20 }
 0x147   : > { %6436 = vmatpush3.bf16.msra.mxu0 %v7067_v21 }
 0x148   : > { %6437 = vmatprep.subr.bf16.mxu0 %v7069_v23  ;;  %v1432_v23 = vrot.slane %v275_v19, %v7375_v42 }
 0x149   : > { %6458 = vmatpush3.bf16.msra.mxu1 %v7068_v22 }
 0x14a   : > { %6459 = vmatprep.subr.bf16.mxu1 %v7070_v24  ;;  %v1425_v24 = vcombine.high %v275_v19, %v275_v19 }
 0x14b   : > { %6438 = vmatpush3.bf16.msra.mxu0 %v7071_v25 }
 0x14c   : > { %6439 = vmatprep.subr.bf16.mxu0 %v7073_v27  ;;  %v7113_v27 = vld [vmem:[%s7337_s6 + $0xab0] sm:$0xff]  }
 0x14d   : > { %6460 = vmatpush3.bf16.msra.mxu1 %v7072_v26  ;;  %v6137_v32 = vpop.f32.mrb[8].mxu0 }
 0x14e   : > { %v6138_v34 = vpop.f32.mrb[9].mxu0  ;;  %6461 = vmatprep.subr.bf16.mxu1 %v7074_v28  ;;  %v7114_v28 = vld [vmem:[%s7337_s6 + $0xa78] sm:$0xff]  }
 0x14f   : > { %v6159_v36 = vpop.f32.mrb[8].mxu1  ;;  %v6139_v37 = vadd.f32 %v6138_v34, %v6137_v32  ;;  %v6140_v38 = vpop.f32.mrb[10].mxu0  ;;  %6440 = vmatpush3.bf16.msra.mxu0 %v7075_v29  ;;  %v7115_v32 = vld [vmem:[%s7337_s6 + $0xaf8] sm:$0xff]  }
 0x150   : > { %v6160_v41 = vpop.f32.mrb[9].mxu1  ;;  %v6141_v43 = vpop.f32.mrb[11].mxu0  ;;  %6441 = vmatprep.subr.bf16.mxu0 %v7077_v31  ;;  %v7117_v38 = vld [vmem:[%s7337_s6 + $0xab8] sm:$0xff]  }
 0x151   : > { %v4462_v44 = vadd.f32 %v6139_v37, %v7688_v0  ;;  %v6161_v45 = vadd.f32 %v6160_v41, %v6159_v36  ;;  %v6162_v46 = vpop.f32.mrb[10].mxu1  ;;  %6462 = vmatpush3.bf16.msra.mxu1 %v7076_v30  ;;  %v7096_v0 = vld [vmem:[%s7337_s6 + $0xa10] sm:$0xff]   ;;  %v7765_v36 = vrot.slane %v1425_v24, %v7375_v42  ;;  %v7118_v41 = vld [vmem:[%s7337_s6 + $0xb40] sm:$0xff]   ;;  %v7148_v24 = vld [vmem:[%s7337_s6 + $0xb38] sm:$0xff]  }
 0x152   : > { %v6163_v48 = vpop.f32.mrb[11].mxu1  ;;  %6463 = vmatprep.subr.bf16.mxu1 %v7078_v33  ;;  %v1440_v33 = vcombine.high %v1432_v23, %v1432_v23  ;;  %v7120_v46 = vld [vmem:[%s7337_s6 + $0xb00] sm:$0xff]  }
 0x153   : > { %v7725_v50 = vadd.f32 %v6161_v45, %v4462_v44  ;;  %6442 = vmatpush3.bf16.msra.mxu0 %v7079_v35  ;;  %v7116_v35 = vld [vmem:[%s7337_s6 + $0xa38] sm:$0xff]   ;;  %v1441_v43 = vcombine.high %v7765_v36, %v7765_v36  ;;  %v7119_v45 = vld [vmem:[%s7337_s6 + $0xbc0] sm:$0xff]  }
 0x154   : > { %6443 = vmatprep.subr.bf16.mxu0 %v7081_v40  ;;  %v1448_v40 = vrot.slane %v1432_v23, %v7375_v42  ;;  %v7121_v48 = vld [vmem:[%s7337_s6 + $0xb80] sm:$0xff]  }
 0x155   : > { %6464 = vmatpush3.bf16.msra.mxu1 %v7080_v39  ;;  %v1462_v39 = vrot.slane %v1440_v33, %v7375_v42  ;;  %v7155_v33 = vld [vmem:[%s7337_s6 + $0xc48] sm:$0xff]  }
 0x156   : > { %6465 = vmatprep.subr.bf16.mxu1 %v7082_v47  ;;  %v1469_v47 = vrot.slane %v1441_v43, %v7375_v42  ;;  %v7164_v43 = vld [vmem:[%s7337_s6 + $0xcd8] sm:$0xff]  }
 0x157   : > { %6444 = vmatpush3.bf16.msra.mxu0 %v7083_v49  ;;  %v1472_v44 = vcombine.high %v1462_v39, %v1462_v39  ;;  %v1470_v49 = vcombine.high %v1448_v40, %v1448_v40 }
 0x158   : > { %6473 = vmatprep.subr.bf16.mxu0 %v7086_v53  ;;  %v7124_v53 = vld [vmem:[%s7337_s6 + $0xb08] sm:$0xff]  }
 0x159   : > { %6466 = vmatpush3.bf16.msra.mxu1 %v7084_v51  ;;  %v7123_v51 = vld [vmem:[%s7337_s6 + $0xbc8] sm:$0xff]  }
 0x15a   : > { %5020 = vmatmul.mubr.bf16.vlgmr.msra.gmra.mrb[36].mxu0 %v1406_v52  ;;  %6495 = vmatprep.subr.bf16.mxu1 %v7087_v54  ;;  %v1473_v52 = vcombine.high %v1469_v47, %v1469_v47  ;;  %v7125_v54 = vld [vmem:[%s7337_s6 + $0xb88] sm:$0xff]  }
 0x15b   : > { %6474 = vmatpush3.bf16.msra.mxu0 %v7088_v56  ;;  %5099 = vmatprep.mubr.bf16.mxu0 %v1462_v39  ;;  %v7126_v56 = vld [vmem:[%s7337_s6 + $0xb50] sm:$0xff]  }
 0x15c   : > { %5060 = vmatmul.mubr.bf16.vlgmr.msra.gmra.mrb[36].mxu1 %v1422_v58  ;;  %6475 = vmatprep.subr.bf16.mxu0 %v7090_v59  ;;  %v7128_v58 = vld [vmem:[%s7337_s6 + $0xb10] sm:$0xff]  }
 0x15d   : > { %6496 = vmatpush3.bf16.msra.mxu1 %v7089_v57  ;;  %5139 = vmatprep.mubr.bf16.mxu1 %v1472_v44  ;;  %v7127_v57 = vld [vmem:[%s7337_s6 + $0xbd0] sm:$0xff]   ;;  %v7165_v44 = vld [vmem:[%s7337_s6 + $0xc18] sm:$0xff]  }
 0x15e   : > { %6497 = vmatprep.subr.bf16.mxu1 %v7091_v60  ;;  %v7129_v59 = vld [vmem:[%s7337_s6 + $0xb90] sm:$0xff]   ;;  %v7130_v60 = vld [vmem:[%s7337_s6 + $0xb58] sm:$0xff]  }
 0x15f   : > { %6476 = vmatpush3.bf16.msra.mxu0 %v7092_v55  ;;  %v7131_v55 = vld [vmem:[%s7337_s6 + $0xbd8] sm:$0xff]   ;;  %v7161_v39 = vld [vmem:[%s7337_s6 + $0xc10] sm:$0xff]  }
 0x160   : > { %6477 = vmatprep.subr.bf16.mxu0 %v7094_v62  ;;  %v7133_v62 = vld [vmem:[%s7337_s6 + $0xb98] sm:$0xff]  }
 0x161   : > { %6498 = vmatpush3.bf16.msra.mxu1 %v7093_v61  ;;  %v7132_v61 = vld [vmem:[%s7337_s6 + $0xb18] sm:$0xff]  }
 0x162   : > { %6499 = vmatprep.subr.bf16.mxu1 %v7095_v63  ;;  %v7134_v63 = vld [vmem:[%s7337_s6 + $0xb60] sm:$0xff]  }
 0x163   : > { %6478 = vmatpush3.bf16.msra.mxu0 %v7096_v0  ;;  %v7135_v0 = vld [vmem:[%s7337_s6 + $0xbe0] sm:$0xff]  }
 0x164   : > { %6479 = vmatprep.subr.bf16.mxu0 %v7098_v2  ;;  %v7137_v2 = vld [vmem:[%s7337_s6 + $0xba0] sm:$0xff]  }
 0x165   : > { %6500 = vmatpush3.bf16.msra.mxu1 %v7097_v1  ;;  %v7136_v1 = vld [vmem:[%s7337_s6 + $0xb20] sm:$0xff]  }
 0x166   : > { %6501 = vmatprep.subr.bf16.mxu1 %v7099_v3  ;;  %v7138_v3 = vld [vmem:[%s7337_s6 + $0xb68] sm:$0xff]  }
 0x167   : > { %6480 = vmatpush3.bf16.msra.mxu0 %v7100_v4  ;;  %v7139_v4 = vld [vmem:[%s7337_s6 + $0xbe8] sm:$0xff]  }
 0x168   : > { %6481 = vmatprep.subr.bf16.mxu0 %v7102_v6  ;;  %v7141_v6 = vld [vmem:[%s7337_s6 + $0xba8] sm:$0xff]  }
 0x169   : > { %6502 = vmatpush3.bf16.msra.mxu1 %v7101_v5  ;;  %v7140_v5 = vld [vmem:[%s7337_s6 + $0xb28] sm:$0xff]  }
 0x16a   : > { %6503 = vmatprep.subr.bf16.mxu1 %v7103_v7  ;;  %v7142_v7 = vld [vmem:[%s7337_s6 + $0xb70] sm:$0xff]  }
 0x16b   : > { %6482 = vmatpush3.bf16.msra.mxu0 %v7104_v8 }
 0x16c   : > { %6483 = vmatprep.subr.bf16.mxu0 %v7106_v10 }
 0x16d   : > { %6504 = vmatpush3.bf16.msra.mxu1 %v7105_v9  ;;  %v6181_v15 = vpop.f32.mrb[12].mxu0  ;;  %v7143_v9 = vld [vmem:[%s7337_s6 + $0xbf0] sm:$0xff]  }
 0x16e   : > { %v6182_v17 = vpop.f32.mrb[13].mxu0  ;;  %6505 = vmatprep.subr.bf16.mxu1 %v7107_v11  ;;  %v7144_v11 = vld [vmem:[%s7337_s6 + $0xb30] sm:$0xff]  }
 0x16f   : > { %v6203_v20 = vpop.f32.mrb[12].mxu1  ;;  %v6183_v21 = vadd.f32 %v6182_v17, %v6181_v15  ;;  %v6184_v22 = vpop.f32.mrb[14].mxu0  ;;  %6484 = vmatpush3.bf16.msra.mxu0 %v7108_v12  ;;  %v7145_v15 = vld [vmem:[%s7337_s6 + $0xbb0] sm:$0xff]  }
 0x170   : > { %v6204_v25 = vpop.f32.mrb[13].mxu1  ;;  %v6185_v26 = vpop.f32.mrb[15].mxu0  ;;  %6485 = vmatprep.subr.bf16.mxu0 %v7110_v14  ;;  %v7147_v22 = vld [vmem:[%s7337_s6 + $0xbf8] sm:$0xff]  }
 0x171   : > { %v4542_v29 = vadd.f32 %v6183_v21, %v7725_v50  ;;  %v6205_v30 = vadd.f32 %v6204_v25, %v6203_v20  ;;  %v6206_v31 = vpop.f32.mrb[14].mxu1  ;;  %6506 = vmatpush3.bf16.msra.mxu1 %v7109_v13  ;;  %v7122_v50 = vld [vmem:[%s7337_s6 + $0xb48] sm:$0xff]   ;;  %v7149_v26 = vld [vmem:[%s7337_s6 + $0xbb8] sm:$0xff]  }
 0x172   : > { %v6207_v34 = vpop.f32.mrb[15].mxu1  ;;  %6507 = vmatprep.subr.bf16.mxu1 %v7111_v16  ;;  %v7146_v16 = vld [vmem:[%s7337_s6 + $0xb78] sm:$0xff]   ;;  %v7154_v31 = vld [vmem:[%s7337_s6 + $0xc80] sm:$0xff]  }
 0x173   : > { %v7767_v37 = vadd.f32 %v6205_v30, %v4542_v29  ;;  %6486 = vmatpush3.bf16.msra.mxu0 %v7112_v18  ;;  %v7152_v29 = vld [vmem:[%s7337_s6 + $0xcc0] sm:$0xff]   ;;  %v7156_v34 = vld [vmem:[%s7337_s6 + $0xcc8] sm:$0xff]  }
 0x174   : > { %6487 = vmatprep.subr.bf16.mxu0 %v7114_v28  ;;  %v7151_v28 = vld [vmem:[%s7337_s6 + $0xc40] sm:$0xff]  }
 0x175   : > { %6508 = vmatpush3.bf16.msra.mxu1 %v7113_v27  ;;  %v1455_v27 = vrot.slane %v7765_v36, %v7375_v42  ;;  %v7153_v30 = vld [vmem:[%s7337_s6 + $0xc00] sm:$0xff]   ;;  %v7158_v36 = vld [vmem:[%s7337_s6 + $0xc88] sm:$0xff]  }
 0x176   : > { %6509 = vmatprep.subr.bf16.mxu1 %v7115_v32 }
 0x177   : > { %6488 = vmatpush3.bf16.msra.mxu0 %v7116_v35  ;;  %v1471_v32 = vcombine.high %v1455_v27, %v1455_v27  ;;  %v7157_v35 = vld [vmem:[%s7337_s6 + $0xc08] sm:$0xff]  }
 0x178   : > { %6517 = vmatprep.subr.bf16.mxu0 %v7118_v41  ;;  %v7163_v41 = vld [vmem:[%s7337_s6 + $0xc58] sm:$0xff]  }
 0x179   : > { %6510 = vmatpush3.bf16.msra.mxu1 %v7117_v38  ;;  %v7160_v38 = vld [vmem:[%s7337_s6 + $0xcd0] sm:$0xff]  }
 0x17a   : > { %5100 = vmatmul.mubr.bf16.vlgmr.msra.gmra.mrb[40].mxu0 %v1448_v40  ;;  %6539 = vmatprep.subr.bf16.mxu1 %v7119_v45  ;;  %v7162_v40 = vld [vmem:[%s7337_s6 + $0xc90] sm:$0xff]   ;;  %v7166_v45 = vld [vmem:[%s7337_s6 + $0xc98] sm:$0xff]  }
 0x17b   : > { %6518 = vmatpush3.bf16.msra.mxu0 %v7120_v46  ;;  %5179 = vmatprep.mubr.bf16.mxu0 %v1469_v47  ;;  %v7167_v46 = vld [vmem:[%s7337_s6 + $0xc60] sm:$0xff]  }
 0x17c   : > { %5140 = vmatmul.mubr.bf16.vlgmr.msra.gmra.mrb[40].mxu1 %v1470_v49  ;;  %6519 = vmatprep.subr.bf16.mxu0 %v7122_v50  ;;  %v7168_v47 = vld [vmem:[%s7337_s6 + $0xce0] sm:$0xff]   ;;  %v7171_v50 = vld [vmem:[%s7337_s6 + $0xc68] sm:$0xff]  }
 0x17d   : > { %6540 = vmatpush3.bf16.msra.mxu1 %v7121_v48  ;;  %5219 = vmatprep.mubr.bf16.mxu1 %v1473_v52  ;;  %v7169_v48 = vld [vmem:[%s7337_s6 + $0xc20] sm:$0xff]   ;;  %v7173_v52 = vld [vmem:[%s7337_s6 + $0xc28] sm:$0xff]  }
 0x17e   : > { %6541 = vmatprep.subr.bf16.mxu1 %v7123_v51  ;;  %v7170_v49 = vld [vmem:[%s7337_s6 + $0xca0] sm:$0xff]   ;;  %v7172_v51 = vld [vmem:[%s7337_s6 + $0xce8] sm:$0xff]  }
 0x17f   : > { %6520 = vmatpush3.bf16.msra.mxu0 %v7124_v53  ;;  %v7174_v53 = vld [vmem:[%s7337_s6 + $0xca8] sm:$0xff]  }
 0x180   : > { %6521 = vmatprep.subr.bf16.mxu0 %v7126_v56 }
 0x181   : > { %6542 = vmatpush3.bf16.msra.mxu1 %v7125_v54  ;;  %v7175_v54 = vld [vmem:[%s7337_s6 + $0xc70] sm:$0xff]  }
 0x182   : > { %6543 = vmatprep.subr.bf16.mxu1 %v7127_v57  ;;  %v7176_v57 = vld [vmem:[%s7337_s6 + $0xcf0] sm:$0xff]  }
 0x183   : > { %6522 = vmatpush3.bf16.msra.mxu0 %v7128_v58 }
 0x184   : > { %6523 = vmatprep.subr.bf16.mxu0 %v7130_v60 }
 0x185   : > { %6544 = vmatpush3.bf16.msra.mxu1 %v7129_v59  ;;  %v7177_v59 = vld [vmem:[%s7337_s6 + $0xc30] sm:$0xff]  }
 0x186   : > { %6545 = vmatprep.subr.bf16.mxu1 %v7131_v55 }
 0x187   : > { %6524 = vmatpush3.bf16.msra.mxu0 %v7132_v61 }
 0x188   : > { %6525 = vmatprep.subr.bf16.mxu0 %v7134_v63  ;;  %v276_v63 = vld [vmem:[%s7332_s27 + $0x30] sm:$0xff] }
 0x189   : > { %6546 = vmatpush3.bf16.msra.mxu1 %v7133_v62  ;;  %v7179_v62 = vld [vmem:[%s7337_s6 + $0xc78] sm:$0xff]  }
 0x18a   : > { %6547 = vmatprep.subr.bf16.mxu1 %v7135_v0 }
 0x18b   : > { %6526 = vmatpush3.bf16.msra.mxu0 %v7136_v1 }
 0x18c   : > { %6527 = vmatprep.subr.bf16.mxu0 %v7138_v3  ;;  %v1474_v3 = vcombine.high %v276_v63, %v276_v63 }
 0x18d   : > { %6548 = vmatpush3.bf16.msra.mxu1 %v7137_v2  ;;  %v6225_v8 = vpop.f32.mrb[16].mxu0  ;;  %v1481_v2 = vrot.slane %v276_v63, %v7375_v42  ;;  %v7212_v63 = vld [vmem:[%s7337_s6 + $0xdf8] sm:$0xff]  }
 0x18e   : > { %v6226_v10 = vpop.f32.mrb[17].mxu0  ;;  %6549 = vmatprep.subr.bf16.mxu1 %v7139_v4 }
 0x18f   : > { %v6247_v12 = vpop.f32.mrb[16].mxu1  ;;  %v6227_v13 = vadd.f32 %v6226_v10, %v6225_v8  ;;  %v6228_v14 = vpop.f32.mrb[18].mxu0  ;;  %6528 = vmatpush3.bf16.msra.mxu0 %v7140_v5  ;;  %v1489_v10 = vcombine.high %v1481_v2, %v1481_v2 }
 0x190   : > { %v6248_v17 = vpop.f32.mrb[17].mxu1  ;;  %v6229_v18 = vpop.f32.mrb[19].mxu0  ;;  %6529 = vmatprep.subr.bf16.mxu0 %v7142_v7  ;;  %v7178_v7 = vld [vmem:[%s7337_s6 + $0xcb0] sm:$0xff]  }
 0x191   : > { %v4622_v19 = vadd.f32 %v6227_v13, %v7767_v37  ;;  %v6249_v20 = vadd.f32 %v6248_v17, %v6247_v12  ;;  %v6250_v21 = vpop.f32.mrb[18].mxu1  ;;  %6550 = vmatpush3.bf16.msra.mxu1 %v7141_v6  ;;  %v7159_v37 = vld [vmem:[%s7337_s6 + $0xc50] sm:$0xff]   ;;  %v7181_v13 = vld [vmem:[%s7337_s6 + $0xc38] sm:$0xff]   ;;  %v1511_v14 = vrot.slane %v1489_v10, %v7375_v42 }
 0x192   : > { %v6251_v23 = vpop.f32.mrb[19].mxu1  ;;  %6551 = vmatprep.subr.bf16.mxu1 %v7143_v9  ;;  %v7180_v9 = vld [vmem:[%s7337_s6 + $0xcf8] sm:$0xff]  }
 0x193   : > { %v7807_v25 = vadd.f32 %v6249_v20, %v4622_v19  ;;  %6530 = vmatpush3.bf16.msra.mxu0 %v7144_v11  ;;  %v7846_v11 = vrot.slane %v1474_v3, %v7375_v42  ;;  %v7182_v18 = vld [vmem:[%s7337_s6 + $0xcb8] sm:$0xff]   ;;  %v1521_v19 = vcombine.high %v1511_v14, %v1511_v14  ;;  %v7184_v20 = vld [vmem:[%s7337_s6 + $0xdc0] sm:$0xff]  }
 0x194   : > { %6531 = vmatprep.subr.bf16.mxu0 %v7146_v16  ;;  %v7183_v16 = vld [vmem:[%s7337_s6 + $0xd40] sm:$0xff]   ;;  %v7214_v3 = vld [vmem:[%s7337_s6 + $0xdb8] sm:$0xff]  }
 0x195   : > { %6552 = vmatpush3.bf16.msra.mxu1 %v7145_v15  ;;  %v1497_v15 = vrot.slane %v1481_v2, %v7375_v42  ;;  %v1490_v17 = vcombine.high %v7846_v11, %v7846_v11  ;;  %v1504_v2 = vrot.slane %v7846_v11, %v7375_v42 }
 0x196   : > { %6553 = vmatprep.subr.bf16.mxu1 %v7147_v22  ;;  %v7185_v22 = vld [vmem:[%s7337_s6 + $0xd00] sm:$0xff]  }
 0x197   : > { %6532 = vmatpush3.bf16.msra.mxu0 %v7148_v24  ;;  %v1518_v21 = vrot.slane %v1490_v17, %v7375_v42  ;;  %v1519_v23 = vcombine.high %v1497_v15, %v1497_v15  ;;  %v7187_v24 = vld [vmem:[%s7337_s6 + $0xd48] sm:$0xff]  }
 0x198   : > { %6561 = vmatprep.subr.bf16.mxu0 %v7151_v28  ;;  %v7189_v28 = vld [vmem:[%s7337_s6 + $0xd08] sm:$0xff]  }
 0x199   : > { %6554 = vmatpush3.bf16.msra.mxu1 %v7149_v26  ;;  %v1522_v26 = vcombine.high %v1518_v21, %v1518_v21 }
 0x19a   : > { %5180 = vmatmul.mubr.bf16.vlgmr.msra.gmra.mrb[44].mxu0 %v1455_v27  ;;  %6583 = vmatprep.subr.bf16.mxu1 %v7152_v29  ;;  %v7188_v27 = vld [vmem:[%s7337_s6 + $0xdc8] sm:$0xff]   ;;  %v7191_v29 = vld [vmem:[%s7337_s6 + $0xd50] sm:$0xff]  }
 0x19b   : > { %6562 = vmatpush3.bf16.msra.mxu0 %v7153_v30  ;;  %5259 = vmatprep.mubr.bf16.mxu0 %v1511_v14  ;;  %v7190_v30 = vld [vmem:[%s7337_s6 + $0xd88] sm:$0xff]  }
 0x19c   : > { %5220 = vmatmul.mubr.bf16.vlgmr.msra.gmra.mrb[44].mxu1 %v1471_v32  ;;  %6563 = vmatprep.subr.bf16.mxu0 %v7155_v33  ;;  %v7193_v32 = vld [vmem:[%s7337_s6 + $0xd10] sm:$0xff]   ;;  %v7195_v33 = vld [vmem:[%s7337_s6 + $0xd58] sm:$0xff]  }
 0x19d   : > { %6584 = vmatpush3.bf16.msra.mxu1 %v7154_v31  ;;  %5299 = vmatprep.mubr.bf16.mxu1 %v1521_v19  ;;  %v7192_v31 = vld [vmem:[%s7337_s6 + $0xdd0] sm:$0xff]  }
 0x19e   : > { %6585 = vmatprep.subr.bf16.mxu1 %v7156_v34  ;;  %v7194_v34 = vld [vmem:[%s7337_s6 + $0xd90] sm:$0xff]  }
 0x19f   : > { %6564 = vmatpush3.bf16.msra.mxu0 %v7157_v35  ;;  %v7196_v35 = vld [vmem:[%s7337_s6 + $0xdd8] sm:$0xff]  }
 0x1a0   : > { %6565 = vmatprep.subr.bf16.mxu0 %v7159_v37  ;;  %v7199_v37 = vld [vmem:[%s7337_s6 + $0xd60] sm:$0xff]  }
 0x1a1   : > { %6586 = vmatpush3.bf16.msra.mxu1 %v7158_v36  ;;  %v7197_v36 = vld [vmem:[%s7337_s6 + $0xd18] sm:$0xff]  }
 0x1a2   : > { %6587 = vmatprep.subr.bf16.mxu1 %v7160_v38  ;;  %v7198_v38 = vld [vmem:[%s7337_s6 + $0xd98] sm:$0xff]  }
 0x1a3   : > { %6566 = vmatpush3.bf16.msra.mxu0 %v7161_v39  ;;  %v7200_v39 = vld [vmem:[%s7337_s6 + $0xde0] sm:$0xff]  }
 0x1a4   : > { %6567 = vmatprep.subr.bf16.mxu0 %v7163_v41  ;;  %v7203_v41 = vld [vmem:[%s7337_s6 + $0xd68] sm:$0xff]  }
 0x1a5   : > { %6588 = vmatpush3.bf16.msra.mxu1 %v7162_v40  ;;  %v7201_v40 = vld [vmem:[%s7337_s6 + $0xd20] sm:$0xff]  }
 0x1a6   : > { %6589 = vmatprep.subr.bf16.mxu1 %v7164_v43  ;;  %v7202_v43 = vld [vmem:[%s7337_s6 + $0xda0] sm:$0xff]  }
 0x1a7   : > { %6568 = vmatpush3.bf16.msra.mxu0 %v7165_v44  ;;  %v7204_v44 = vld [vmem:[%s7337_s6 + $0xde8] sm:$0xff]  }
 0x1a8   : > { %6569 = vmatprep.subr.bf16.mxu0 %v7167_v46  ;;  %v7207_v46 = vld [vmem:[%s7337_s6 + $0xd70] sm:$0xff]  }
 0x1a9   : > { %6590 = vmatpush3.bf16.msra.mxu1 %v7166_v45  ;;  %v7205_v45 = vld [vmem:[%s7337_s6 + $0xd28] sm:$0xff]  }
 0x1aa   : > { %6591 = vmatprep.subr.bf16.mxu1 %v7168_v47 }
 0x1ab   : > { %6570 = vmatpush3.bf16.msra.mxu0 %v7169_v48  ;;  %v7206_v48 = vld [vmem:[%s7337_s6 + $0xda8] sm:$0xff]  }
 0x1ac   : > { %6571 = vmatprep.subr.bf16.mxu0 %v7171_v50  ;;  %v7208_v50 = vld [vmem:[%s7337_s6 + $0xdf0] sm:$0xff]  }
 0x1ad   : > { %6592 = vmatpush3.bf16.msra.mxu1 %v7170_v49  ;;  %v6269_v56 = vpop.f32.mrb[20].mxu0 }
 0x1ae   : > { %v6270_v58 = vpop.f32.mrb[21].mxu0  ;;  %6593 = vmatprep.subr.bf16.mxu1 %v7172_v51 }
 0x1af   : > { %v6291_v60 = vpop.f32.mrb[20].mxu1  ;;  %v6271_v55 = vadd.f32 %v6270_v58, %v6269_v56  ;;  %v6272_v61 = vpop.f32.mrb[22].mxu0  ;;  %6572 = vmatpush3.bf16.msra.mxu0 %v7173_v52  ;;  %v7211_v58 = vld [vmem:[%s7337_s6 + $0xd78] sm:$0xff]  }
 0x1b0   : > { %v6292_v0 = vpop.f32.mrb[21].mxu1  ;;  %v6273_v1 = vpop.f32.mrb[23].mxu0  ;;  %6573 = vmatprep.subr.bf16.mxu0 %v7175_v54  ;;  %v7209_v54 = vld [vmem:[%s7337_s6 + $0xd30] sm:$0xff]  }
 0x1b1   : > { %v4702_v4 = vadd.f32 %v6271_v55, %v7807_v25  ;;  %v6293_v5 = vadd.f32 %v6292_v0, %v6291_v60  ;;  %v6294_v6 = vpop.f32.mrb[22].mxu1  ;;  %6594 = vmatpush3.bf16.msra.mxu1 %v7174_v53  ;;  %v7186_v25 = vld [vmem:[%s7337_s6 + $0xd80] sm:$0xff]   ;;  %v7210_v61 = vld [vmem:[%s7337_s6 + $0xdb0] sm:$0xff]   ;;  %v7213_v1 = vld [vmem:[%s7337_s6 + $0xd38] sm:$0xff]  }
 0x1b2   : > { %v6295_v8 = vpop.f32.mrb[23].mxu1  ;;  %6595 = vmatprep.subr.bf16.mxu1 %v7176_v57 }
 0x1b3   : > { %v7848_v12 = vadd.f32 %v6293_v5, %v4702_v4  ;;  %6574 = vmatpush3.bf16.msra.mxu0 %v7177_v59  ;;  %v1520_v4 = vcombine.high %v1504_v2, %v1504_v2 }
 0x1b4   : > { %6575 = vmatprep.subr.bf16.mxu0 %v7179_v62 }
 0x1b5   : > { %6596 = vmatpush3.bf16.msra.mxu1 %v7178_v7 }
 0x1b6   : > { %6597 = vmatprep.subr.bf16.mxu1 %v7180_v9 }
 0x1b7   : > { %6576 = vmatpush3.bf16.msra.mxu0 %v7181_v13 }
 0x1b8   : > { %6605 = vmatprep.subr.bf16.mxu0 %v7183_v16 }
 0x1b9   : > { %6598 = vmatpush3.bf16.msra.mxu1 %v7182_v18 }
 0x1ba   : > { %5260 = vmatmul.mubr.bf16.vlgmr.msra.gmra.mrb[48].mxu0 %v1497_v15  ;;  %6627 = vmatprep.subr.bf16.mxu1 %v7184_v20 }
 0x1bb   : > { %6606 = vmatpush3.bf16.msra.mxu0 %v7185_v22  ;;  %5339 = vmatprep.mubr.bf16.mxu0 %v1518_v21 }
 0x1bc   : > { %5300 = vmatmul.mubr.bf16.vlgmr.msra.gmra.mrb[48].mxu1 %v1519_v23  ;;  %6607 = vmatprep.subr.bf16.mxu0 %v7187_v24 }
 0x1bd   : > { %6628 = vmatpush3.bf16.msra.mxu1 %v7186_v25  ;;  %5379 = vmatprep.mubr.bf16.mxu1 %v1522_v26 }
 0x1be   : > { %6629 = vmatprep.subr.bf16.mxu1 %v7188_v27 }
 0x1bf   : > { %6608 = vmatpush3.bf16.msra.mxu0 %v7189_v28 }
 0x1c0   : > { %6609 = vmatprep.subr.bf16.mxu0 %v7191_v29 }
 0x1c1   : > { %6630 = vmatpush3.bf16.msra.mxu1 %v7190_v30 }
 0x1c2   : > { %6631 = vmatprep.subr.bf16.mxu1 %v7192_v31 }
 0x1c3   : > { %6610 = vmatpush3.bf16.msra.mxu0 %v7193_v32 }
 0x1c4   : > { %6611 = vmatprep.subr.bf16.mxu0 %v7195_v33 }
 0x1c5   : > { %6632 = vmatpush3.bf16.msra.mxu1 %v7194_v34 }
 0x1c6   : > { %6633 = vmatprep.subr.bf16.mxu1 %v7196_v35 }
 0x1c7   : > { %6612 = vmatpush3.bf16.msra.mxu0 %v7197_v36 }
 0x1c8   : > { %6613 = vmatprep.subr.bf16.mxu0 %v7199_v37 }
 0x1c9   : > { %6634 = vmatpush3.bf16.msra.mxu1 %v7198_v38 }
 0x1ca   : > { %6635 = vmatprep.subr.bf16.mxu1 %v7200_v39 }
 0x1cb   : > { %6614 = vmatpush3.bf16.msra.mxu0 %v7201_v40 }
 0x1cc   : > { %6615 = vmatprep.subr.bf16.mxu0 %v7203_v41 }
 0x1cd   : > { %6636 = vmatpush3.bf16.msra.mxu1 %v7202_v43  ;;  %v6313_v47 = vpop.f32.mrb[24].mxu0 }
 0x1ce   : > { %v6314_v49 = vpop.f32.mrb[25].mxu0  ;;  %6637 = vmatprep.subr.bf16.mxu1 %v7204_v44 }
 0x1cf   : > { %v6335_v51 = vpop.f32.mrb[24].mxu1  ;;  %v6315_v52 = vadd.f32 %v6314_v49, %v6313_v47  ;;  %v6316_v53 = vpop.f32.mrb[26].mxu0  ;;  %6616 = vmatpush3.bf16.msra.mxu0 %v7205_v45 }
 0x1d0   : > { %v6336_v56 = vpop.f32.mrb[25].mxu1  ;;  %v6317_v57 = vpop.f32.mrb[27].mxu0  ;;  %6617 = vmatprep.subr.bf16.mxu0 %v7207_v46 }
 0x1d1   : > { %v4782_v59 = vadd.f32 %v6315_v52, %v7848_v12  ;;  %v6337_v60 = vadd.f32 %v6336_v56, %v6335_v51  ;;  %v6338_v55 = vpop.f32.mrb[26].mxu1  ;;  %6638 = vmatpush3.bf16.msra.mxu1 %v7206_v48 }
 0x1d2   : > { %v6339_v62 = vpop.f32.mrb[27].mxu1  ;;  %6639 = vmatprep.subr.bf16.mxu1 %v7208_v50 }
 0x1d3   : > { %v4822_v0 = vadd.f32 %v6337_v60, %v4782_v59  ;;  %6618 = vmatpush3.bf16.msra.mxu0 %v7209_v54 }
 0x1d4   : > { %6619 = vmatprep.subr.bf16.mxu0 %v7211_v58 }
 0x1d5   : > { %6640 = vmatpush3.bf16.msra.mxu1 %v7210_v61 }
 0x1d6   : > { %6641 = vmatprep.subr.bf16.mxu1 %v7212_v63 }
 0x1d7   : > { %6620 = vmatpush3.bf16.msra.mxu0 %v7213_v1 }
 0x1d9   : > { %6642 = vmatpush3.bf16.msra.mxu1 %v7214_v3 }
 0x1da   : > { %5340 = vmatmul.mubr.bf16.vlgmr.msra.gmra.mrb[52].mxu0 %v1504_v2 }
 0x1dc   : > { %5380 = vmatmul.mubr.bf16.vlgmr.msra.gmra.mrb[52].mxu1 %v1520_v4 }
 0x1ed   : > { %v6357_v5 = vpop.f32.mrb[28].mxu0 }
 0x1ee   : > { %v6358_v6 = vpop.f32.mrb[29].mxu0 }
 0x1ef   : > { %v6379_v7 = vpop.f32.mrb[28].mxu1  ;;  %v6359_v8 = vadd.f32 %v6358_v6, %v6357_v5  ;;  %v6360_v9 = vpop.f32.mrb[30].mxu0 }
 0x1f0   : > { %v6380_v10 = vpop.f32.mrb[29].mxu1  ;;  %v6361_v12 = vpop.f32.mrb[31].mxu0 }
 0x1f1   : > { %v4862_v13 = vadd.f32 %v6359_v8, %v4822_v0  ;;  %v6381_v14 = vadd.f32 %v6380_v10, %v6379_v7  ;;  %v6382_v15 = vpop.f32.mrb[30].mxu1 }
 0x1f2   : > { %v6383_v16 = vpop.f32.mrb[31].mxu1 }
 0x1f3   : > { %v4902_v42 = vadd.f32 %v6381_v14, %v4862_v13 }
 0x20d   : > { %v6401_v11 = vpop.f32.mrb[32].mxu0 }
 0x20e   : > { %v6402_v17 = vpop.f32.mrb[33].mxu0 }
 0x20f   : > { %v6423_v18 = vpop.f32.mrb[32].mxu1  ;;  %v6403_v19 = vadd.f32 %v6402_v17, %v6401_v11  ;;  %v6404_v20 = vpop.f32.mrb[34].mxu0 }
 0x210   : > { %v6424_v21 = vpop.f32.mrb[33].mxu1  ;;  %v6405_v22 = vpop.f32.mrb[35].mxu0 }
 0x211   : > { %v4942_v23 = vadd.f32 %v6403_v19, %v4902_v42  ;;  %v6425_v24 = vadd.f32 %v6424_v21, %v6423_v18  ;;  %v6426_v25 = vpop.f32.mrb[34].mxu1  ;;  %v269_v22 = vld [vmem:[#allocation2] sm:$0x3] }
 0x212   : > { %v6427_v26 = vpop.f32.mrb[35].mxu1 }
 0x213   : > { %v4982_v27 = vadd.f32 %v6425_v24, %v4942_v23  ;;  %v5403_v26 = vld [vmem:[%s7987_s3] sm:$0xff] (!%p6026_p7) }
 0x22d   : > { %v6445_v28 = vpop.f32.mrb[36].mxu0 }
 0x22e   : > { %v6446_v29 = vpop.f32.mrb[37].mxu0 }
 0x22f   : > { %v6467_v30 = vpop.f32.mrb[36].mxu1  ;;  %v6447_v31 = vadd.f32 %v6446_v29, %v6445_v28  ;;  %v6448_v32 = vpop.f32.mrb[38].mxu0  ;;  %v5405_v28 = vld [vmem:[%s7987_s3 + $0x10] sm:$0xff] (!%p6026_p7)  ;;  %v7272_v29 = vmov (!%p6026_p7), 0.0|0.0  }
 0x230   : > { %v6468_v33 = vpop.f32.mrb[37].mxu1  ;;  %v6449_v34 = vpop.f32.mrb[39].mxu0  ;;  %6701 = vmatprep.subr.bf16.mxu0 (!%p6026_p7), %v7272_v29  ;;  %v7274_v32 = vmov (!%p6026_p7), 0.0  }
 0x231   : > { %v5022_v35 = vadd.f32 %v6447_v31, %v4982_v27  ;;  %v6469_v36 = vadd.f32 %v6468_v33, %v6467_v30  ;;  %v6470_v37 = vpop.f32.mrb[38].mxu1  ;;  %v5404_v27 = vld [vmem:[%s7987_s3 + $0x8] sm:$0xff] (!%p6026_p7)  ;;  %v5406_v31 = vld [vmem:[%s7987_s3 + $0x18] sm:$0xff] (!%p6026_p7)  ;;  %6698 = vmatprep.mubr.msk.f32.mxu0 (!%p6026_p7), %vm7273_vm0, %v7274_v32  ;;  %v5407_v34 = vld [vmem:[%s7987_s3 + $0x20] sm:$0xff] (!%p6026_p7) }
 0x232   : > { %v6471_v38 = vpop.f32.mrb[39].mxu1  ;;  %v6702_v30 = vpack.c.bf16 (!%p6026_p7), %v5404_v27, %v5403_v26  ;;  %v6705_v33 = vpack.c.bf16 (!%p6026_p7), %v5406_v31, %v5405_v28  ;;  %v5409_v37 = vld [vmem:[%s7987_s3 + $0x30] sm:$0xff] (!%p6026_p7) }
 0x233   : > { %v5062_v39 = vadd.f32 %v6469_v36, %v5022_v35  ;;  %v5408_v35 = vld [vmem:[%s7987_s3 + $0x28] sm:$0xff] (!%p6026_p7)  ;;  %v5410_v38 = vld [vmem:[%s7987_s3 + $0x38] sm:$0xff] (!%p6026_p7) }
 0x234   : > { %6703 = vmatpush3.bf16.msra.mxu0 (!%p6026_p7), %v6702_v30  ;;  %v6708_v36 = vpack.c.bf16 (!%p6026_p7), %v5408_v35, %v5407_v34 }
 0x235   : > { %6704 = vmatprep.subr.bf16.mxu0 (!%p6026_p7), %v7272_v29 }
 0x238   : > { %6706 = vmatpush3.bf16.msra.mxu0 (!%p6026_p7), %v6705_v33 }
 0x239   : > { %6707 = vmatprep.subr.bf16.mxu0 (!%p6026_p7), %v7272_v29 }
 0x23c   : > { %6709 = vmatpush3.bf16.msra.mxu0 (!%p6026_p7), %v6708_v36 }
 0x23d   : > { %6710 = vmatprep.subr.bf16.mxu0 (!%p6026_p7), %v7272_v29 }
 0x24d   : > { %v6489_v40 = vpop.f32.mrb[40].mxu0 }
 0x24e   : > { %v6490_v41 = vpop.f32.mrb[41].mxu0 }
 0x24f   : > { %v6511_v43 = vpop.f32.mrb[40].mxu1  ;;  %v6491_v44 = vadd.f32 %v6490_v41, %v6489_v40  ;;  %v6492_v45 = vpop.f32.mrb[42].mxu0  ;;  %v5411_v40 = vld [vmem:[%s7987_s3 + $0x40] sm:$0xff] (!%p6026_p7)  ;;  %v5412_v41 = vld [vmem:[%s7987_s3 + $0x48] sm:$0xff] (!%p6026_p7) }
 0x250   : > { %v6512_v46 = vpop.f32.mrb[41].mxu1  ;;  %v6493_v47 = vpop.f32.mrb[43].mxu0  ;;  %v5414_v45 = vld [vmem:[%s7987_s3 + $0x58] sm:$0xff] (!%p6026_p7) }
 0x251   : > { %v5102_v48 = vadd.f32 %v6491_v44, %v5062_v39  ;;  %v6513_v49 = vadd.f32 %v6512_v46, %v6511_v43  ;;  %v6514_v50 = vpop.f32.mrb[42].mxu1  ;;  %v6711_v39 = vpack.c.bf16 (!%p6026_p7), %v5410_v38, %v5409_v37  ;;  %v6714_v43 = vpack.c.bf16 (!%p6026_p7), %v5412_v41, %v5411_v40  ;;  %v5413_v44 = vld [vmem:[%s7987_s3 + $0x50] sm:$0xff] (!%p6026_p7)  ;;  %v5415_v47 = vld [vmem:[%s7987_s3 + $0x60] sm:$0xff] (!%p6026_p7) }
 0x252   : > { %v6515_v51 = vpop.f32.mrb[43].mxu1  ;;  %v6717_v46 = vpack.c.bf16 (!%p6026_p7), %v5414_v45, %v5413_v44 }
 0x253   : > { %v5142_v52 = vadd.f32 %v6513_v49, %v5102_v48  ;;  %6712 = vmatpush3.bf16.msra.mxu0 (!%p6026_p7), %v6711_v39  ;;  %v5416_v48 = vld [vmem:[%s7987_s3 + $0x68] sm:$0xff] (!%p6026_p7)  ;;  %v6027_v51 = vld [vmem:[%s7986_s2] ss:$0 sm:$0xff] (!%p6026_p7) }
 0x254   : > { %6713 = vmatprep.subr.bf16.mxu0 (!%p6026_p7), %v7272_v29  ;;  %v6720_v49 = vpack.c.bf16 (!%p6026_p7), %v5416_v48, %v5415_v47 }
 0x257   : > { %6715 = vmatpush3.bf16.msra.mxu0 (!%p6026_p7), %v6714_v43 }
 0x258   : > { %6716 = vmatprep.subr.bf16.mxu0 (!%p6026_p7), %v7272_v29 }
 0x25b   : > { %6718 = vmatpush3.bf16.msra.mxu0 (!%p6026_p7), %v6717_v46 }
 0x25c   : > { %6719 = vmatprep.subr.bf16.mxu0 (!%p6026_p7), %v7272_v29 }
 0x25f   : > { %6721 = vmatpush3.bf16.msra.mxu0 (!%p6026_p7), %v6720_v49 }
 0x260   : > { %6722 = vmatprep.subr.bf16.mxu0 (!%p6026_p7), %v7272_v29 }
 0x26d   : > { %v6533_v53 = vpop.f32.mrb[44].mxu0 }
 0x26e   : > { %v6534_v54 = vpop.f32.mrb[45].mxu0 }
 0x26f   : > { %v6555_v56 = vpop.f32.mrb[44].mxu1  ;;  %v6535_v57 = vadd.f32 %v6534_v54, %v6533_v53  ;;  %v6536_v58 = vpop.f32.mrb[46].mxu0  ;;  %v5418_v53 = vld [vmem:[%s7987_s3 + $0x78] sm:$0xff] (!%p6026_p7) }
 0x270   : > { %v6556_v59 = vpop.f32.mrb[45].mxu1  ;;  %v6537_v60 = vpop.f32.mrb[47].mxu0  ;;  %v6028_v58 = vld [vmem:[%s7988_s4] ss:$0 sm:$0xff] (!%p6026_p7) }
 0x271   : > { %v5182_v55 = vadd.f32 %v6535_v57, %v5142_v52  ;;  %v6557_v61 = vadd.f32 %v6556_v59, %v6555_v56  ;;  %v6558_v62 = vpop.f32.mrb[46].mxu1  ;;  %v5417_v52 = vld [vmem:[%s7987_s3 + $0x70] sm:$0xff] (!%p6026_p7) }
 0x272   : > { %v6559_v63 = vpop.f32.mrb[47].mxu1  ;;  %v6723_v56 = vpack.c.bf16 (!%p6026_p7), %v5418_v53, %v5417_v52 }
 0x273   : > { %v5222_v0 = vadd.f32 %v6557_v61, %v5182_v55 }
 0x274   : > { %6724 = vmatpush3.bf16.msra.mxu0 (!%p6026_p7), %v6723_v56 }
 0x28d   : > { %v6577_v1 = vpop.f32.mrb[48].mxu0 }
 0x28e   : > { %v6578_v2 = vpop.f32.mrb[49].mxu0 }
 0x28f   : > { %v6599_v3 = vpop.f32.mrb[48].mxu1  ;;  %v6579_v4 = vadd.f32 %v6578_v2, %v6577_v1  ;;  %v6580_v5 = vpop.f32.mrb[50].mxu0 }
 0x290   : > { %v6600_v6 = vpop.f32.mrb[49].mxu1  ;;  %v6581_v7 = vpop.f32.mrb[51].mxu0 }
 0x291   : > { %v5262_v8 = vadd.f32 %v6579_v4, %v5222_v0  ;;  %v6601_v9 = vadd.f32 %v6600_v6, %v6599_v3  ;;  %v6602_v10 = vpop.f32.mrb[50].mxu1 }
 0x292   : > { %v6603_v12 = vpop.f32.mrb[51].mxu1 }
 0x293   : > { %v5302_v13 = vadd.f32 %v6601_v9, %v5262_v8 }
 0x2ad   : > { %v6621_v14 = vpop.f32.mrb[52].mxu0 }
 0x2ae   : > { %v6622_v15 = vpop.f32.mrb[53].mxu0 }
 0x2af   : > { %v6643_v16 = vpop.f32.mrb[52].mxu1  ;;  %v6623_v42 = vadd.f32 %v6622_v15, %v6621_v14  ;;  %v6624_v11 = vpop.f32.mrb[54].mxu0 }
 0x2b0   : > { %v6644_v17 = vpop.f32.mrb[53].mxu1  ;;  %v6625_v18 = vpop.f32.mrb[55].mxu0 }
 0x2b1   : > { %v5342_v19 = vadd.f32 %v6623_v42, %v5302_v13  ;;  %v6645_v20 = vadd.f32 %v6644_v17, %v6643_v16  ;;  %v6646_v21 = vpop.f32.mrb[54].mxu1  ;;  %5392 = sbr.rel (%p6026_p7) target bundleno = 922 (0x39a), region = 48 }
 0x2b2   : > { %v6647_v23 = vpop.f32.mrb[55].mxu1 }
 0x2b3   : > { %v5382_v24 = vadd.f32 %v6645_v20, %v5342_v19 }
 0x2b5   : > { %v5387_v25 = vadd.f32 %v5382_v24, %v269_v22 }
 0x2b7   : > { %5388 = vst [vmem:[#allocation2] sm:$0x3] %v5387_v25 }
 0x2be   : > { %v5393_v50 = vld [vmem:[#allocation2] sm:$0x3] }
 0x2bf   : > { %v5401_v54 = vadd.f32 %v6027_v51, %v5393_v50 }
 0x2c1   : > { %v5402_v57 = vmax.f32 %v5401_v54, 0.0 }
 0x2c3   : > { %6699 = vmatmul.mubr.f32.vlgmr.msra.gmra.mrb[0].mxu0 %v5402_v57 }
 0x396   : > { %v5492_v59 = vpop.f32.mrb[0].mxu0 }
 0x397   : > { %v5493_v60 = vadd.f32 %v6028_v58, %v5492_v59  ;;  %v6700_v55 = vpop.f32.mrb[1].mxu0 }
 0x399   : > { %5497 = vst.msk [vmem:[#allocation3] sm:$0x3] %vm5496_vm1, %v5493_v60 }
 0x39a PF: > { %p7949_p8 = scmp.eq.s32.totalorder %s5572_s21, 6  ;;  %s7275_s27 = smov [#allocation3]  }
 0x39b   : > { %s5507_s28 = sshll.u32 %s7275_s27, 4  ;;  %s5508_s28 = int_to_ptr.vmem [resolvable:$true] %s5507_s28 }
 0x39c   : > { %s7216_s29 = scalar_lea.vmem %s5508_s28, 32  ;;  %p7223_p12 = scmp.lt.s32.totalorder %s5508_s28, %s5508_s28 }
 0x39d   : > { %p7217_p9 = scmp.ne.s32.totalorder %s5508_s28, %s7216_s29  ;;  %p7224_p13 = scmp.lt.s32.totalorder %s7216_s29, %s7216_s29 }
 0x39f   : > { %p7218_p10 = pnand %p7217_p9, %p7949_p8  ;;  %p7225_p0 = por %p7224_p13, %p7223_p12 }
 0x3a1   : > { %p7219_p11 = pneg %p7218_p10 }
 0x3a3   : > { %p7226_p1 = pnand %p7225_p0, %p7219_p11 }
 0x3a5   : > { %7229 = shalt.err (!%p7226_p1)
}
 0x3a6   : > { %s7230_s21 = scalar_lea.hbm %s7989_s5, 32 }
 0x3a7   : > { %p7231_p2 = scmp.ne.s32.totalorder %s7989_s5, %s7230_s21  ;;  %p7236_p5 = scmp.lt.u32.totalorder %s7230_s21, %s7989_s5 }
 0x3a9   : > { %p7232_p3 = pnand %p7231_p2, %p7949_p8 }
 0x3ab   : > { %p7233_p4 = pneg %p7232_p3 }
 0x3ad   : > { %p7238_p6 = pnand %p7236_p5, %p7233_p4 }
 0x3af   : > { %7241 = shalt.err (!%p7238_p6)
}
 0x3b0   : > { %6726 = dma.vmem_to_hbm [thread:$0]  (%p7949_p8), %s5508_s28, 32, %s7989_s5, [#allocation4]  }
 0x3b1   : > { %7255 = dma.done.wait (%p7949_p8), [#allocation4], 32  }
 0x3b2   : > { %7257 = vsyncadd (%p7949_p8), [#allocation4], 4294967264 }
 0x3b3 PF: > { %s16_s20 = sadd.s32 1, %s7268_s20   ;;  %s7991_s18 = smov %s7264_s19 }
 0x3b4   : > { %p13_p7 = scmp.ge.s32.totalorder %s16_s20, 9   ;;  %s7992_s19 = smov %s7994_s22 }
 0x3b6   :  { %15 = sbr.rel (!%p13_p7) target bundleno = 2 (0x2), region = 79 }
 0x3bd   :  { %5520 = vsyncpa [#allocation4], 1 }
 0x3be   :  { %5522 = vsyncpa [#allocation4 + $0x1], 1 }

</bundles_post_ra>
